<compile_context>
chip_gen: v7x
topology: tpu7x:2x2x1
jax: 0.10.0
libtpu: 0.0.40
codegen_flags: <defaults>
</compile_context>

<pallas_src>
import jax
import jax.numpy as jnp
from jax.experimental import pallas as pl
from jax.experimental.pallas import tpu as pltpu

IN_FEATURES = 3072   # 3 * 32 * 32
HID1 = 512
HID2 = 256
CLASSES = 10
OUT_PAD = 128        # lane-dense padded logits width (>= CLASSES, multiple of 128)
MAX_TILE_B = 256     # batch tile: MXU-friendly, comfortably under v7x 64 MiB VMEM


def _mlp_kernel(x_ref,
                w1_ref, b1_ref,
                w2_ref, b2_ref,
                w3_ref, b3_ref,
                o_ref):
    # x: (TILE_B, 3072) bf16.  All matmuls run bf16 x bf16 -> f32 accumulate on
    # the MXU.  BN is already folded into (w, b); Dropout is identity (eval).
    x = x_ref[...]

    h1 = jnp.dot(x, w1_ref[...], preferred_element_type=jnp.float32) + b1_ref[...]
    h1 = jnp.maximum(h1, 0.0).astype(jnp.bfloat16)

    h2 = jnp.dot(h1, w2_ref[...], preferred_element_type=jnp.float32) + b2_ref[...]
    h2 = jnp.maximum(h2, 0.0).astype(jnp.bfloat16)

    o_ref[...] = (jnp.dot(h2, w3_ref[...], preferred_element_type=jnp.float32)
                  + b3_ref[...])


def mlp_forward(x_nchw, params):
    """x_nchw: (B, 3, 32, 32) float32.  Returns (B, CLASSES) float32 logits."""
    B = x_nchw.shape[0]
    x = x_nchw.reshape(B, -1).astype(jnp.float32)   # Flatten(1) -> (B, 3072)

    (w1, b1, s1, t1, w2, b2, s2, t2, w3, b3) = params

    # Fold inference-mode BatchNorm affine into the preceding Linear, cast
    # weights to bf16 (biases stay f32 and are added on the f32 accumulator).
    w1f = (w1 * s1).astype(jnp.bfloat16)            # (3072, 512), column-scaled
    b1f = (b1 * s1 + t1).astype(jnp.float32)        # (1, 512)
    w2f = (w2 * s2).astype(jnp.bfloat16)            # (512, 256)
    b2f = (b2 * s2 + t2).astype(jnp.float32)        # (1, 256)

    # Pad the final layer to a lane-dense 128-wide output.
    w3f = (jnp.zeros((HID2, OUT_PAD), jnp.float32)
           .at[:, :CLASSES].set(w3).astype(jnp.bfloat16))
    b3f = jnp.zeros((1, OUT_PAD), jnp.float32).at[:, :CLASSES].set(b3)

    # Tile the batch; pad it to a multiple of the tile size.
    tile_b = min(MAX_TILE_B, max(8, ((B + 7) // 8) * 8))
    b_pad = ((B + tile_b - 1) // tile_b) * tile_b
    xb = (jnp.zeros((b_pad, IN_FEATURES), jnp.bfloat16)
          .at[:B].set(x.astype(jnp.bfloat16)))

    grid = (b_pad // tile_b,)
    const = lambda shape: pl.BlockSpec(shape, lambda i: (0, 0))

    flops = 2 * b_pad * (IN_FEATURES * HID1 + HID1 * HID2 + HID2 * OUT_PAD)
    bytes_accessed = (xb.size * 2
                      + (w1f.size + w2f.size + w3f.size) * 2
                      + (b1f.size + b2f.size + b3f.size) * 4
                      + b_pad * OUT_PAD * 4)

    out = pl.pallas_call(
        _mlp_kernel,
        out_shape=jax.ShapeDtypeStruct((b_pad, OUT_PAD), jnp.float32),
        grid=grid,
        in_specs=[
            pl.BlockSpec((tile_b, IN_FEATURES), lambda i: (i, 0)),   # x: batch-tiled
            const((IN_FEATURES, HID1)), const((1, HID1)),            # W1', b1'
            const((HID1, HID2)),        const((1, HID2)),            # W2', b2'
            const((HID2, OUT_PAD)),     const((1, OUT_PAD)),         # W3 (padded), b3
        ],
        out_specs=pl.BlockSpec((tile_b, OUT_PAD), lambda i: (i, 0)),
        compiler_params=pltpu.CompilerParams(
            dimension_semantics=("parallel",)),
        cost_estimate=pl.CostEstimate(flops=flops, transcendentals=0,
                                      bytes_accessed=bytes_accessed),
    )(xb, w1f, b1f, w2f, b2f, w3f, b3f)

    return out[:B, :CLASSES]


def init_params(key):
    """Deterministic synthetic parameters matching the PyTorch module shapes."""
    keys = jax.random.split(key, 16)
    eps = 1e-5

    def linear(kw, kb, fan_in, fan_out):
        bound = 1.0 / (fan_in ** 0.5)
        w = jax.random.uniform(kw, (fan_in, fan_out), jnp.float32, -bound, bound)
        b = jax.random.uniform(kb, (1, fan_out), jnp.float32, -bound, bound)
        return w, b

    def bn(kg, kb, km, kv, n):
        gamma = 1.0 + 0.1 * jax.random.normal(kg, (1, n), jnp.float32)
        beta = 0.1 * jax.random.normal(kb, (1, n), jnp.float32)
        mean = 0.1 * jax.random.normal(km, (1, n), jnp.float32)
        var = jnp.abs(jax.random.normal(kv, (1, n), jnp.float32)) + 0.5
        scale = gamma / jnp.sqrt(var + eps)          # inference-mode BN folded
        shift = beta - mean * scale
        return scale, shift

    w1, b1 = linear(keys[0], keys[1], IN_FEATURES, HID1)
    s1, t1 = bn(keys[2], keys[3], keys[4], keys[5], HID1)
    w2, b2 = linear(keys[6], keys[7], HID1, HID2)
    s2, t2 = bn(keys[8], keys[9], keys[10], keys[11], HID2)
    w3, b3 = linear(keys[12], keys[13], HID2, CLASSES)
    return (w1, b1, s1, t1, w2, b2, s2, t2, w3, b3)


if __name__ == "__main__":
    key = jax.random.PRNGKey(0)
    k_x, k_p = jax.random.split(key)

    # Small CIFAR-like input: (batch=8, C=3, H=32, W=32) -> flatten to 3072.
    B = 8
    x = jax.random.normal(k_x, (B, 3, 32, 32), jnp.float32)
    params = init_params(k_p)

    logits = mlp_forward(x, params)
    jax.block_until_ready(logits)
    assert logits.shape == (B, CLASSES)

    (w1, b1, s1, t1, w2, b2, s2, t2, w3, b3) = params
    xf = x.reshape(B, -1)

    # Reference 1: exact-match reference with the same bf16 weight/activation
    # casts and f32 accumulation as the kernel (tight tolerance).
    w1f = (w1 * s1).astype(jnp.bfloat16); b1f = b1 * s1 + t1
    w2f = (w2 * s2).astype(jnp.bfloat16); b2f = b2 * s2 + t2
    w3f = w3.astype(jnp.bfloat16)
    h1m = jnp.maximum(jnp.dot(xf.astype(jnp.bfloat16), w1f,
                              preferred_element_type=jnp.float32) + b1f, 0.0)
    h2m = jnp.maximum(jnp.dot(h1m.astype(jnp.bfloat16), w2f,
                              preferred_element_type=jnp.float32) + b2f, 0.0)
    ref_bf16 = jnp.dot(h2m.astype(jnp.bfloat16), w3f,
                       preferred_element_type=jnp.float32) + b3
    assert jnp.allclose(logits, ref_bf16, atol=5e-3, rtol=5e-3)

    # Reference 2: full-f32 eval-mode semantics of the PyTorch module
    # (loose tolerance to cover the bf16 weight quantization).
    h1 = jnp.maximum((xf @ w1 + b1) * s1 + t1, 0.0)
    h2 = jnp.maximum((h1 @ w2 + b2) * s2 + t2, 0.0)
    ref_f32 = h2 @ w3 + b3
    assert jnp.allclose(logits, ref_f32, atol=5e-2, rtol=5e-2)

    print("KERNEL_OK")
</pallas_src>

<mosaic_0001>
module attributes {stable_mosaic.version = 11 : i64} {
  func.func @_mlp_kernel(%arg0: i32, %arg1: memref<8x3072xbf16, #tpu.memory_space<vmem>>, %arg2: memref<3072x512xbf16, #tpu.memory_space<vmem>>, %arg3: memref<1x512xf32, #tpu.memory_space<vmem>>, %arg4: memref<512x256xbf16, #tpu.memory_space<vmem>>, %arg5: memref<1x256xf32, #tpu.memory_space<vmem>>, %arg6: memref<256x128xbf16, #tpu.memory_space<vmem>>, %arg7: memref<1x128xf32, #tpu.memory_space<vmem>>, %arg8: memref<8x128xf32, #tpu.memory_space<vmem>>) attributes {dimension_semantics = [#tpu.dimension_semantics<parallel>], iteration_bounds = array<i64: 1>, scalar_prefetch = 0 : i64, scratch_operands = 0 : i64, tpu.core_type = #tpu.core_type<tc>, window_params = [{transform_indices = @transform_0, window_bounds = array<i64: 8, 3072>}, {pipeline_mode = #tpu.pipeline_mode<synchronous>, transform_indices = @transform_1, window_bounds = array<i64: 3072, 512>}, {pipeline_mode = #tpu.pipeline_mode<synchronous>, transform_indices = @transform_2, window_bounds = array<i64: 1, 512>}, {pipeline_mode = #tpu.pipeline_mode<synchronous>, transform_indices = @transform_3, window_bounds = array<i64: 512, 256>}, {pipeline_mode = #tpu.pipeline_mode<synchronous>, transform_indices = @transform_4, window_bounds = array<i64: 1, 256>}, {pipeline_mode = #tpu.pipeline_mode<synchronous>, transform_indices = @transform_5, window_bounds = array<i64: 256, 128>}, {pipeline_mode = #tpu.pipeline_mode<synchronous>, transform_indices = @transform_6, window_bounds = array<i64: 1, 128>}, {transform_indices = @transform_7, window_bounds = array<i64: 8, 128>}]} {
    %c0 = arith.constant 0 : index
    %c0_0 = arith.constant 0 : index
    %0 = vector.load %arg1[%c0, %c0_0] : memref<8x3072xbf16, #tpu.memory_space<vmem>>, vector<8x3072xbf16>
    %c0_1 = arith.constant 0 : index
    %c0_2 = arith.constant 0 : index
    %1 = vector.load %arg2[%c0_1, %c0_2] : memref<3072x512xbf16, #tpu.memory_space<vmem>>, vector<3072x512xbf16>
    %cst = arith.constant dense<0.000000e+00> : vector<8x512xf32>
    %2 = tpu.matmul %0, %1, %cst {dimension_numbers = #tpu.dot_dimension_numbers<[1], [0], [0], [1], [0, 0, 1, 1], [], []>} : vector<8x3072xbf16>, vector<3072x512xbf16>, vector<8x512xf32> -> vector<8x512xf32>
    %c0_3 = arith.constant 0 : index
    %c0_4 = arith.constant 0 : index
    %3 = vector.load %arg3[%c0_3, %c0_4] : memref<1x512xf32, #tpu.memory_space<vmem>>, vector<1x512xf32>
    %4 = vector.broadcast %3 : vector<1x512xf32> to vector<8x512xf32>
    %5 = arith.addf %2, %4 : vector<8x512xf32>
    %cst_5 = arith.constant 0.000000e+00 : f32
    %6 = vector.broadcast %cst_5 : f32 to vector<8x512xf32>
    %7 = arith.maximumf %5, %6 : vector<8x512xf32>
    %8 = arith.truncf %7 : vector<8x512xf32> to vector<8x512xbf16>
    %c0_6 = arith.constant 0 : index
    %c0_7 = arith.constant 0 : index
    %9 = vector.load %arg4[%c0_6, %c0_7] : memref<512x256xbf16, #tpu.memory_space<vmem>>, vector<512x256xbf16>
    %cst_8 = arith.constant dense<0.000000e+00> : vector<8x256xf32>
    %10 = tpu.matmul %8, %9, %cst_8 {dimension_numbers = #tpu.dot_dimension_numbers<[1], [0], [0], [1], [0, 0, 1, 1], [], []>} : vector<8x512xbf16>, vector<512x256xbf16>, vector<8x256xf32> -> vector<8x256xf32>
    %c0_9 = arith.constant 0 : index
    %c0_10 = arith.constant 0 : index
    %11 = vector.load %arg5[%c0_9, %c0_10] : memref<1x256xf32, #tpu.memory_space<vmem>>, vector<1x256xf32>
    %12 = vector.broadcast %11 : vector<1x256xf32> to vector<8x256xf32>
    %13 = arith.addf %10, %12 : vector<8x256xf32>
    %cst_11 = arith.constant 0.000000e+00 : f32
    %14 = vector.broadcast %cst_11 : f32 to vector<8x256xf32>
    %15 = arith.maximumf %13, %14 : vector<8x256xf32>
    %16 = arith.truncf %15 : vector<8x256xf32> to vector<8x256xbf16>
    %c0_12 = arith.constant 0 : index
    %c0_13 = arith.constant 0 : index
    %17 = vector.load %arg6[%c0_12, %c0_13] : memref<256x128xbf16, #tpu.memory_space<vmem>>, vector<256x128xbf16>
    %cst_14 = arith.constant dense<0.000000e+00> : vector<8x128xf32>
    %18 = tpu.matmul %16, %17, %cst_14 {dimension_numbers = #tpu.dot_dimension_numbers<[1], [0], [0], [1], [0, 0, 1, 1], [], []>} : vector<8x256xbf16>, vector<256x128xbf16>, vector<8x128xf32> -> vector<8x128xf32>
    %c0_15 = arith.constant 0 : index
    %c0_16 = arith.constant 0 : index
    %19 = vector.load %arg7[%c0_15, %c0_16] : memref<1x128xf32, #tpu.memory_space<vmem>>, vector<1x128xf32>
    %20 = vector.broadcast %19 : vector<1x128xf32> to vector<8x128xf32>
    %21 = arith.addf %18, %20 : vector<8x128xf32>
    %c0_17 = arith.constant 0 : index
    %c0_18 = arith.constant 0 : index
    %22 = vector.load %arg8[%c0_17, %c0_18] : memref<8x128xf32, #tpu.memory_space<vmem>>, vector<8x128xf32>
    tpu.vector_store %arg8[%c0_17, %c0_18], %21 {strides = array<i32>} : memref<8x128xf32, #tpu.memory_space<vmem>>, vector<8x128xf32>,
    return
  }
  func.func @transform_0(%arg0: i32) -> (i32, i32) {
    %c0_i32 = arith.constant 0 : i32
    %c0_i32_0 = arith.constant 0 : i32
    return %arg0, %c0_i32 : i32, i32
  }
  func.func @transform_1(%arg0: i32) -> (i32, i32) {
    %c0_i32 = arith.constant 0 : i32
    %c0_i32_0 = arith.constant 0 : i32
    %c0_i32_1 = arith.constant 0 : i32
    return %c0_i32, %c0_i32_0 : i32, i32
  }
  func.func @transform_2(%arg0: i32) -> (i32, i32) {
    %c0_i32 = arith.constant 0 : i32
    %c0_i32_0 = arith.constant 0 : i32
    %c0_i32_1 = arith.constant 0 : i32
    return %c0_i32, %c0_i32_0 : i32, i32
  }
  func.func @transform_3(%arg0: i32) -> (i32, i32) {
    %c0_i32 = arith.constant 0 : i32
    %c0_i32_0 = arith.constant 0 : i32
    %c0_i32_1 = arith.constant 0 : i32
    return %c0_i32, %c0_i32_0 : i32, i32
  }
  func.func @transform_4(%arg0: i32) -> (i32, i32) {
    %c0_i32 = arith.constant 0 : i32
    %c0_i32_0 = arith.constant 0 : i32
    %c0_i32_1 = arith.constant 0 : i32
    return %c0_i32, %c0_i32_0 : i32, i32
  }
  func.func @transform_5(%arg0: i32) -> (i32, i32) {
    %c0_i32 = arith.constant 0 : i32
    %c0_i32_0 = arith.constant 0 : i32
    %c0_i32_1 = arith.constant 0 : i32
    return %c0_i32, %c0_i32_0 : i32, i32
  }
  func.func @transform_6(%arg0: i32) -> (i32, i32) {
    %c0_i32 = arith.constant 0 : i32
    %c0_i32_0 = arith.constant 0 : i32
    %c0_i32_1 = arith.constant 0 : i32
    return %c0_i32, %c0_i32_0 : i32, i32
  }
  func.func @transform_7(%arg0: i32) -> (i32, i32) {
    %c0_i32 = arith.constant 0 : i32
    %c0_i32_0 = arith.constant 0 : i32
    return %arg0, %c0_i32 : i32, i32
  }
}

</mosaic_0001>

<bundles_post_ra>
// kernel: tpu_custom_call.1
= control target key start
LH: loop header
LB: loop body
LE: loop exit
PB: predicated region body
PF: predicated region fallthrough
CT: control target
= control target key end

     0   :  { %12 = vsyncpa [#allocation3], 0  ;;  %s9320_s0 = inlined_call_operand.hbm [shape: bf16[8,3072], index: 0, kind: input, shape index: {}]   ;;  %s9321_s1 = inlined_call_operand.hbm [shape: bf16[3072,512], index: 1, kind: input, shape index: {}]   ;;  %s9322_s2 = inlined_call_operand.hbm [shape: f32[1,512], index: 2, kind: input, shape index: {}]   ;;  %s9323_s3 = inlined_call_operand.hbm [shape: bf16[512,256], index: 3, kind: input, shape index: {}]   ;;  %s9324_s4 = inlined_call_operand.hbm [shape: f32[1,256], index: 4, kind: input, shape index: {}]   ;;  %s9325_s5 = inlined_call_operand.hbm [shape: bf16[256,128], index: 5, kind: input, shape index: {}]   ;;  %s9326_s6 = inlined_call_operand.hbm [shape: f32[1,128], index: 6, kind: input, shape index: {}]   ;;  %s9327_s7 = inlined_call_operand.hbm [shape: f32[8,128], index: 7, kind: output, shape index: {}]  }
   0x1   :  { %13 = vsyncpa [#allocation6], 0 }
   0x2   :  { %14 = vsyncpa [#allocation9], 0 }
   0x3   :  { %15 = vsyncpa [#allocation12], 0 }
   0x4   :  { %16 = vsyncpa [#allocation4], 0  ;;  %s8988_s24 = smov [#allocation5]   ;;  %s8802_s28 = scalar_lea.hbm %s9321_s1, 98304 }
   0x5   :  { %s32_s25 = sshll.u32 %s8988_s24, 4  ;;  %p8803_p0 = scmp.ne.s32.totalorder %s9321_s1, %s8802_s28  ;;  %s33_s25 = int_to_ptr.vmem [resolvable:$true] %s32_s25 }
   0x6   :  { %p8806_p1 = scmp.lt.u32.totalorder %s8802_s28, %s9321_s1 }
   0x8   :  { %p8808_p2 = pnand %p8806_p1, %p8803_p0 }
   0xa   :  { %8811 = shalt.err (!%p8808_p2)
}
   0xb   :  { %s8812_s10 = scalar_lea.vmem %s33_s25, 98304  ;;  %p8817_p4 = scmp.lt.s32.totalorder %s33_s25, %s33_s25 }
   0xc   :  { %p8813_p3 = scmp.ne.s32.totalorder %s33_s25, %s8812_s10  ;;  %p8818_p5 = scmp.lt.s32.totalorder %s8812_s10, %s8812_s10 }
   0xe   :  { %p8819_p6 = por %p8818_p5, %p8817_p4 }
  0x10   :  { %p8820_p7 = pnand %p8819_p6, %p8813_p3 }
  0x12   :  { %8823 = shalt.err (!%p8820_p7)
}
  0x13   :  { %s8989_s11 = smov 256   ;;  %s8990_s12 = smov 16  }
  0x14   :  { %38 = dma.hbm_to_vmem [thread:$0]  %s9321_s1, 98304, %s33_s25, [#allocation6], %s8989_s11, %s8989_s11, %s8990_s12  }
  0x15   :  { %s8991_s15 = smov [#allocation8]   ;;  %s8824_s19 = scalar_lea.hbm %s9323_s3, 8192 }
  0x16   :  { %s54_s16 = sshll.u32 %s8991_s15, 4  ;;  %p8825_p8 = scmp.ne.s32.totalorder %s9323_s3, %s8824_s19  ;;  %s55_s16 = int_to_ptr.vmem [resolvable:$true] %s54_s16 }
  0x17   :  { %p8828_p9 = scmp.lt.u32.totalorder %s8824_s19, %s9323_s3 }
  0x19   :  { %p8830_p10 = pnand %p8828_p9, %p8825_p8 }
  0x1b   :  { %8833 = shalt.err (!%p8830_p10)
}
  0x1c   :  { %s8834_s24 = scalar_lea.vmem %s55_s16, 8192  ;;  %p8839_p12 = scmp.lt.s32.totalorder %s55_s16, %s55_s16 }
  0x1d   :  { %p8835_p11 = scmp.ne.s32.totalorder %s55_s16, %s8834_s24  ;;  %p8840_p13 = scmp.lt.s32.totalorder %s8834_s24, %s8834_s24 }
  0x1f   :  { %p8841_p0 = por %p8840_p13, %p8839_p12 }
  0x21   :  { %p8842_p1 = pnand %p8841_p0, %p8835_p11 }
  0x23   :  { %8845 = shalt.err (!%p8842_p1)
}
  0x24   :  { %s8992_s1 = smov 128   ;;  %s8993_s25 = smov 8  }
  0x25   :  { %60 = dma.hbm_to_vmem [thread:$0]  %s9323_s3, 8192, %s55_s16, [#allocation9], %s8992_s1, %s8992_s1, %s8993_s25  }
  0x26   :  { %s8994_s28 = smov [#allocation11]   ;;  %s8846_s9 = scalar_lea.hbm %s9325_s5, 2048 }
  0x27   :  { %s76_s29 = sshll.u32 %s8994_s28, 4  ;;  %p8847_p2 = scmp.ne.s32.totalorder %s9325_s5, %s8846_s9  ;;  %s77_s29 = int_to_ptr.vmem [resolvable:$true] %s76_s29 }
  0x28   :  { %p8850_p3 = scmp.lt.u32.totalorder %s8846_s9, %s9325_s5 }
  0x2a   :  { %p8852_p4 = pnand %p8850_p3, %p8847_p2 }
  0x2c   :  { %8855 = shalt.err (!%p8852_p4)
}
  0x2d   :  { %s8856_s14 = scalar_lea.vmem %s77_s29, 2048  ;;  %p8861_p6 = scmp.lt.s32.totalorder %s77_s29, %s77_s29 }
  0x2e   :  { %p8857_p5 = scmp.ne.s32.totalorder %s77_s29, %s8856_s14  ;;  %p8862_p7 = scmp.lt.s32.totalorder %s8856_s14, %s8856_s14 }
  0x30   :  { %p8863_p8 = por %p8862_p7, %p8861_p6 }
  0x32   :  { %p8864_p9 = pnand %p8863_p8, %p8857_p5 }
  0x34   :  { %8867 = shalt.err (!%p8864_p9)
}
  0x35   :  { %s8995_s3 = smov 64   ;;  %s8996_s15 = smov 4  }
  0x36   :  { %82 = dma.hbm_to_vmem [thread:$0]  %s9325_s5, 2048, %s77_s29, [#allocation12], %s8995_s3, %s8995_s3, %s8996_s15  }
  0x37   :  { %s8997_s18 = smov [#allocation2]   ;;  %s8998_s20 = smov [#allocation7]  }
  0x38   :  { %s23_s19 = sshll.u32 %s8997_s18, 4  ;;  %s45_s21 = sshll.u32 %s8998_s20, 4  ;;  %s24_s19 = int_to_ptr.vmem [resolvable:$true] %s23_s19  ;;  %s46_s21 = int_to_ptr.vmem [resolvable:$true] %s45_s21 }
  0x39   :  { %s8868_s24 = scalar_lea.hbm %s9320_s0, 1536 }
  0x3a   :  { %p8869_p10 = scmp.ne.s32.totalorder %s9320_s0, %s8868_s24  ;;  %p8872_p11 = scmp.lt.u32.totalorder %s8868_s24, %s9320_s0 }
  0x3c   :  { %p8874_p12 = pnand %p8872_p11, %p8869_p10 }
  0x3e   :  { %8877 = shalt.err (!%p8874_p12)
}
  0x3f   :  { %s8878_s5 = scalar_lea.vmem %s24_s19, 1536  ;;  %p8883_p0 = scmp.lt.s32.totalorder %s24_s19, %s24_s19 }
  0x40   :  { %p8879_p13 = scmp.ne.s32.totalorder %s24_s19, %s8878_s5  ;;  %p8884_p1 = scmp.lt.s32.totalorder %s8878_s5, %s8878_s5 }
  0x42   :  { %p8885_p2 = por %p8884_p1, %p8883_p0 }
  0x44   :  { %p8886_p3 = pnand %p8885_p2, %p8879_p13 }
  0x46   :  { %8889 = shalt.err (!%p8886_p3)
}
  0x47   :  { %26 = dma.hbm_to_vmem [thread:$0]  %s9320_s0, 1536, %s24_s19, [#allocation3]  }
  0x48   :  { %s8890_s9 = scalar_lea.hbm %s9322_s2, 64 }
  0x49   :  { %p8891_p4 = scmp.ne.s32.totalorder %s9322_s2, %s8890_s9  ;;  %p8894_p5 = scmp.lt.u32.totalorder %s8890_s9, %s9322_s2 }
  0x4b   :  { %p8896_p6 = pnand %p8894_p5, %p8891_p4 }
  0x4d   :  { %8899 = shalt.err (!%p8896_p6)
}
  0x4e   :  { %s8900_s14 = scalar_lea.vmem %s46_s21, 64  ;;  %p8905_p8 = scmp.lt.s32.totalorder %s46_s21, %s46_s21 }
  0x4f   :  { %p8901_p7 = scmp.ne.s32.totalorder %s46_s21, %s8900_s14  ;;  %p8906_p9 = scmp.lt.s32.totalorder %s8900_s14, %s8900_s14 }
  0x51   :  { %p8907_p10 = por %p8906_p9, %p8905_p8 }
  0x53   :  { %p8908_p11 = pnand %p8907_p10, %p8901_p7 }
  0x55   :  { %8911 = shalt.err (!%p8908_p11)
}
  0x56   :  { %48 = dma.hbm_to_vmem [thread:$0]  %s9322_s2, 64, %s46_s21, [#allocation6]  }
  0x57   :  { %s8999_s15 = smov [#allocation10]   ;;  %s9000_s17 = smov [#allocation13]  }
  0x58   :  { %s67_s16 = sshll.u32 %s8999_s15, 4  ;;  %s89_s18 = sshll.u32 %s9000_s17, 4  ;;  %s68_s16 = int_to_ptr.vmem [resolvable:$true] %s67_s16  ;;  %s90_s18 = int_to_ptr.vmem [resolvable:$true] %s89_s18 }
  0x59   :  { %s8912_s22 = scalar_lea.hbm %s9324_s4, 32 }
  0x5a   :  { %p8913_p12 = scmp.ne.s32.totalorder %s9324_s4, %s8912_s22  ;;  %p8916_p13 = scmp.lt.u32.totalorder %s8912_s22, %s9324_s4 }
  0x5c   :  { %p8918_p0 = pnand %p8916_p13, %p8913_p12 }
  0x5e   :  { %8921 = shalt.err (!%p8918_p0)
}
  0x5f   :  { %s8922_s2 = scalar_lea.vmem %s68_s16, 32  ;;  %p8927_p2 = scmp.lt.s32.totalorder %s68_s16, %s68_s16 }
  0x60   :  { %p8923_p1 = scmp.ne.s32.totalorder %s68_s16, %s8922_s2  ;;  %p8928_p3 = scmp.lt.s32.totalorder %s8922_s2, %s8922_s2 }
  0x62   :  { %p8929_p4 = por %p8928_p3, %p8927_p2 }
  0x64   :  { %p8930_p5 = pnand %p8929_p4, %p8923_p1 }
  0x66   :  { %8933 = shalt.err (!%p8930_p5)
}
  0x67   :  { %70 = dma.hbm_to_vmem [thread:$0]  %s9324_s4, 32, %s68_s16, [#allocation9]  }
  0x68   :  { %s8934_s28 = scalar_lea.hbm %s9326_s6, 16 }
  0x69   :  { %p8935_p6 = scmp.ne.s32.totalorder %s9326_s6, %s8934_s28  ;;  %p8938_p7 = scmp.lt.u32.totalorder %s8934_s28, %s9326_s6 }
  0x6b   :  { %p8940_p8 = pnand %p8938_p7, %p8935_p6 }
  0x6d   :  { %8943 = shalt.err (!%p8940_p8)
}
  0x6e   :  { %s8944_s10 = scalar_lea.vmem %s90_s18, 16  ;;  %s8948_s11 = scalar_lea.vmem %s90_s18, 32 }
  0x6f   :  { %p8945_p9 = scmp.ne.s32.totalorder %s90_s18, %s8944_s10  ;;  %p8949_p10 = scmp.lt.s32.totalorder %s90_s18, %s90_s18 }
  0x70   :  { %p8950_p11 = scmp.lt.s32.totalorder %s8948_s11, %s8944_s10 }
  0x72   :  { %p8951_p12 = por %p8950_p11, %p8949_p10 }
  0x74   :  { %p8952_p13 = pnand %p8951_p12, %p8945_p9 }
  0x76   :  { %8955 = shalt.err (!%p8952_p13)
}
  0x77   :  { %92 = dma.hbm_to_vmem [thread:$0]  %s9326_s6, 16, %s90_s18, [#allocation12]  }
  0x78   :  { %8978 = dma.done.wait [#allocation3], 1536  }
  0x79   :  { %8979 = vsyncadd [#allocation3], 4294965760 }
  0x7a   :  { %8980 = dma.done.wait [#allocation6], 98368  }
  0x7b   :  { %8981 = vsyncadd [#allocation6], 4294868928 }
  0x7c   :  { %8982 = dma.done.wait [#allocation9], 8224  }
  0x7d   :  { %8983 = vsyncadd [#allocation9], 4294959072 }
  0x7e   :  { %8984 = dma.done.wait [#allocation12], 2064  }
  0x7f   :  { %8985 = vsyncadd [#allocation12], 4294965232  ;;  %v7514_v0 = vld [vmem:[#allocation5 + $0x4] ss:$16 sps:$4 sm:$0xff]   ;;  %v7518_v2 = vld [vmem:[#allocation5] ss:$16 sps:$4 sm:$0xff]  }
  0x80   :  { %v7516_v1 = vld [vmem:[#allocation5 + $0x204] ss:$16 sps:$4 sm:$0xff]   ;;  %4841 = vmatprep.subr.bf16.mxu1 %v7514_v0  ;;  %v7519_v3 = vld [vmem:[#allocation5 + $0x200] ss:$16 sps:$4 sm:$0xff]   ;;  %v116_v48 = vld [vmem:[#allocation2 + $0x8] sm:$0xff]  ;;  %s9001_s6 = smov [#allocation14]  }
  0x81   :  { %4882 = vmatprep.subr.bf16.mxu0 %v7516_v1  ;;  %v7520_v4 = vld [vmem:[#allocation5 + $0x24] ss:$16 sps:$4 sm:$0xff]   ;;  %4842 = vmatpush1.bf16.msra.mxu1 %v7518_v2  ;;  %v7524_v6 = vld [vmem:[#allocation5 + $0x20] ss:$16 sps:$4 sm:$0xff]   ;;  %v9128_v51 = vcombine.high %v116_v48, %v116_v48  ;;  %s6497_s13 = sshll.u32 %s9001_s6, 4  ;;  %s6498_s13 = int_to_ptr.vmem [resolvable:$true] %s6497_s13 }
  0x82   :  { %4883 = vmatpush1.bf16.msra.mxu0 %v7519_v3  ;;  %v7522_v5 = vld [vmem:[#allocation5 + $0x224] ss:$16 sps:$4 sm:$0xff]   ;;  %4843 = vmatprep.subr.bf16.mxu1 %v7520_v4  ;;  %v7525_v7 = vld [vmem:[#allocation5 + $0x220] ss:$16 sps:$4 sm:$0xff]   ;;  %s8956_s14 = scalar_lea.vmem %s6498_s13, 128  ;;  %p8961_p1 = scmp.lt.s32.totalorder %s6498_s13, %s6498_s13 }
  0x83   :  { %4884 = vmatprep.subr.bf16.mxu0 %v7522_v5  ;;  %v7526_v8 = vld [vmem:[#allocation5 + $0x44] ss:$16 sps:$4 sm:$0xff]   ;;  %v7530_v10 = vld [vmem:[#allocation5 + $0x40] ss:$16 sps:$4 sm:$0xff]   ;;  %4914 = vmatprep.mubr.bf16.mxu0 %v9128_v51  ;;  %v7619_v5 = vld [vmem:[#allocation5 + $0xc] ss:$16 sps:$4 sm:$0xff]   ;;  %p8957_p0 = scmp.ne.s32.totalorder %s6498_s13, %s8956_s14  ;;  %p8962_p2 = scmp.lt.s32.totalorder %s8956_s14, %s8956_s14 }
  0x84   :  { %v7528_v9 = vld [vmem:[#allocation5 + $0x244] ss:$16 sps:$4 sm:$0xff]   ;;  %v7531_v11 = vld [vmem:[#allocation5 + $0x240] ss:$16 sps:$4 sm:$0xff]  }
  0x85   :  { %4844 = vmatpush1.bf16.msra.mxu1 %v7524_v6  ;;  %v7532_v12 = vld [vmem:[#allocation5 + $0x64] ss:$16 sps:$4 sm:$0xff]   ;;  %v7536_v14 = vld [vmem:[#allocation5 + $0x60] ss:$16 sps:$4 sm:$0xff]   ;;  %p8963_p3 = por %p8962_p2, %p8961_p1 }
  0x86   :  { %4885 = vmatpush1.bf16.msra.mxu0 %v7525_v7  ;;  %4845 = vmatprep.subr.bf16.mxu1 %v7526_v8  ;;  %v7534_v13 = vld [vmem:[#allocation5 + $0x264] ss:$16 sps:$4 sm:$0xff]   ;;  %v7537_v15 = vld [vmem:[#allocation5 + $0x260] ss:$16 sps:$4 sm:$0xff]   ;;  %v9134_v7 = vcombine.low %v116_v48, %v116_v48 }
  0x87   :  { %4886 = vmatprep.subr.bf16.mxu0 %v7528_v9  ;;  %v7538_v16 = vld [vmem:[#allocation5 + $0x84] ss:$16 sps:$4 sm:$0xff]   ;;  %v7542_v18 = vld [vmem:[#allocation5 + $0x80] ss:$16 sps:$4 sm:$0xff]   ;;  %v7617_v9 = vld [vmem:[#allocation5 + $0x8] ss:$16 sps:$4 sm:$0xff]   ;;  %p8964_p4 = pnand %p8963_p3, %p8957_p0 }
  0x88   :  { %v7540_v17 = vld [vmem:[#allocation5 + $0x284] ss:$16 sps:$4 sm:$0xff]   ;;  %v7543_v19 = vld [vmem:[#allocation5 + $0x280] ss:$16 sps:$4 sm:$0xff]  }
  0x89   :  { %4846 = vmatpush1.bf16.msra.mxu1 %v7530_v10  ;;  %v7544_v20 = vld [vmem:[#allocation5 + $0xa4] ss:$16 sps:$4 sm:$0xff]   ;;  %v7548_v22 = vld [vmem:[#allocation5 + $0xa0] ss:$16 sps:$4 sm:$0xff]  }
  0x8a   :  { %4887 = vmatpush1.bf16.msra.mxu0 %v7531_v11  ;;  %4847 = vmatprep.subr.bf16.mxu1 %v7532_v12  ;;  %v7546_v21 = vld [vmem:[#allocation5 + $0x2a4] ss:$16 sps:$4 sm:$0xff]   ;;  %v7549_v23 = vld [vmem:[#allocation5 + $0x2a0] ss:$16 sps:$4 sm:$0xff]   ;;  %v7625_v11 = vld [vmem:[#allocation5 + $0x2c] ss:$16 sps:$4 sm:$0xff]  }
  0x8b   :  { %4888 = vmatprep.subr.bf16.mxu0 %v7534_v13  ;;  %v7550_v24 = vld [vmem:[#allocation5 + $0xc4] ss:$16 sps:$4 sm:$0xff]   ;;  %v7554_v26 = vld [vmem:[#allocation5 + $0xc0] ss:$16 sps:$4 sm:$0xff]   ;;  %v7623_v13 = vld [vmem:[#allocation5 + $0x28] ss:$16 sps:$4 sm:$0xff]  }
  0x8c   :  { %v7552_v25 = vld [vmem:[#allocation5 + $0x2c4] ss:$16 sps:$4 sm:$0xff]   ;;  %v7555_v27 = vld [vmem:[#allocation5 + $0x2c0] ss:$16 sps:$4 sm:$0xff]  }
  0x8d   :  { %4848 = vmatpush1.bf16.msra.mxu1 %v7536_v14  ;;  %v7556_v28 = vld [vmem:[#allocation5 + $0xe4] ss:$16 sps:$4 sm:$0xff]   ;;  %v7560_v30 = vld [vmem:[#allocation5 + $0xe0] ss:$16 sps:$4 sm:$0xff]  }
  0x8e   :  { %4889 = vmatpush1.bf16.msra.mxu0 %v7537_v15  ;;  %4849 = vmatprep.subr.bf16.mxu1 %v7538_v16  ;;  %v7558_v29 = vld [vmem:[#allocation5 + $0x2e4] ss:$16 sps:$4 sm:$0xff]   ;;  %v7561_v31 = vld [vmem:[#allocation5 + $0x2e0] ss:$16 sps:$4 sm:$0xff]   ;;  %v7631_v15 = vld [vmem:[#allocation5 + $0x4c] ss:$16 sps:$4 sm:$0xff]  }
  0x8f   :  { %4890 = vmatprep.subr.bf16.mxu0 %v7540_v17  ;;  %v7562_v32 = vld [vmem:[#allocation5 + $0x104] ss:$16 sps:$4 sm:$0xff]   ;;  %v7566_v34 = vld [vmem:[#allocation5 + $0x100] ss:$16 sps:$4 sm:$0xff]   ;;  %v7629_v17 = vld [vmem:[#allocation5 + $0x48] ss:$16 sps:$4 sm:$0xff]  }
  0x90   :  { %v7564_v33 = vld [vmem:[#allocation5 + $0x304] ss:$16 sps:$4 sm:$0xff]   ;;  %v7567_v35 = vld [vmem:[#allocation5 + $0x300] ss:$16 sps:$4 sm:$0xff]  }
  0x91   :  { %4850 = vmatpush1.bf16.msra.mxu1 %v7542_v18  ;;  %v7568_v36 = vld [vmem:[#allocation5 + $0x124] ss:$16 sps:$4 sm:$0xff]   ;;  %v7572_v38 = vld [vmem:[#allocation5 + $0x120] ss:$16 sps:$4 sm:$0xff]  }
  0x92   :  { %4891 = vmatpush1.bf16.msra.mxu0 %v7543_v19  ;;  %4851 = vmatprep.subr.bf16.mxu1 %v7544_v20  ;;  %v7570_v37 = vld [vmem:[#allocation5 + $0x324] ss:$16 sps:$4 sm:$0xff]   ;;  %v7573_v39 = vld [vmem:[#allocation5 + $0x320] ss:$16 sps:$4 sm:$0xff]   ;;  %v7637_v19 = vld [vmem:[#allocation5 + $0x6c] ss:$16 sps:$4 sm:$0xff]  }
  0x93   :  { %4892 = vmatprep.subr.bf16.mxu0 %v7546_v21  ;;  %v7574_v40 = vld [vmem:[#allocation5 + $0x144] ss:$16 sps:$4 sm:$0xff]   ;;  %v7578_v42 = vld [vmem:[#allocation5 + $0x140] ss:$16 sps:$4 sm:$0xff]   ;;  %v7635_v21 = vld [vmem:[#allocation5 + $0x68] ss:$16 sps:$4 sm:$0xff]  }
  0x94   :  { %v7576_v41 = vld [vmem:[#allocation5 + $0x344] ss:$16 sps:$4 sm:$0xff]   ;;  %v7579_v43 = vld [vmem:[#allocation5 + $0x340] ss:$16 sps:$4 sm:$0xff]  }
  0x95   :  { %4852 = vmatpush1.bf16.msra.mxu1 %v7548_v22  ;;  %v7580_v44 = vld [vmem:[#allocation5 + $0x164] ss:$16 sps:$4 sm:$0xff]   ;;  %v7584_v49 = vld [vmem:[#allocation5 + $0x160] ss:$16 sps:$4 sm:$0xff]  }
  0x96   :  { %4893 = vmatpush1.bf16.msra.mxu0 %v7549_v23  ;;  %4853 = vmatprep.subr.bf16.mxu1 %v7550_v24  ;;  %v7582_v45 = vld [vmem:[#allocation5 + $0x364] ss:$16 sps:$4 sm:$0xff]   ;;  %v7585_v50 = vld [vmem:[#allocation5 + $0x360] ss:$16 sps:$4 sm:$0xff]   ;;  %v7643_v23 = vld [vmem:[#allocation5 + $0x8c] ss:$16 sps:$4 sm:$0xff]  }
  0x97   :  { %4894 = vmatprep.subr.bf16.mxu0 %v7552_v25  ;;  %v115_v46 = vld [vmem:[#allocation2] sm:$0xff]  ;;  %v7641_v25 = vld [vmem:[#allocation5 + $0x88] ss:$16 sps:$4 sm:$0xff]  }
  0x98   :  { %v9126_v47 = vcombine.high %v115_v46, %v115_v46  ;;  %v7586_v52 = vld [vmem:[#allocation5 + $0x184] ss:$16 sps:$4 sm:$0xff]   ;;  %v7590_v54 = vld [vmem:[#allocation5 + $0x180] ss:$16 sps:$4 sm:$0xff]   ;;  %v9132_v6 = vcombine.low %v115_v46, %v115_v46 }
  0x99   :  { %4854 = vmatpush1.bf16.msra.mxu1 %v7554_v26  ;;  %v7588_v53 = vld [vmem:[#allocation5 + $0x384] ss:$16 sps:$4 sm:$0xff]   ;;  %v7591_v55 = vld [vmem:[#allocation5 + $0x380] ss:$16 sps:$4 sm:$0xff]  }
  0x9a   :  { %4895 = vmatpush1.bf16.msra.mxu0 %v7555_v27  ;;  %4855 = vmatprep.subr.bf16.mxu1 %v7556_v28  ;;  %v7592_v56 = vld [vmem:[#allocation5 + $0x1a4] ss:$16 sps:$4 sm:$0xff]   ;;  %v7596_v58 = vld [vmem:[#allocation5 + $0x1a0] ss:$16 sps:$4 sm:$0xff]   ;;  %v7649_v27 = vld [vmem:[#allocation5 + $0xac] ss:$16 sps:$4 sm:$0xff]  }
  0x9b   :  { %4896 = vmatprep.subr.bf16.mxu0 %v7558_v29  ;;  %4873 = vmatprep.mubr.bf16.mxu1 %v9126_v47  ;;  %v7594_v57 = vld [vmem:[#allocation5 + $0x3a4] ss:$16 sps:$4 sm:$0xff]   ;;  %v7597_v59 = vld [vmem:[#allocation5 + $0x3a0] ss:$16 sps:$4 sm:$0xff]   ;;  %v7647_v29 = vld [vmem:[#allocation5 + $0xa8] ss:$16 sps:$4 sm:$0xff]  }
  0x9c   :  { %v7598_v60 = vld [vmem:[#allocation5 + $0x1c4] ss:$16 sps:$4 sm:$0xff]   ;;  %v7602_v62 = vld [vmem:[#allocation5 + $0x1c0] ss:$16 sps:$4 sm:$0xff]  }
  0x9d   :  { %4856 = vmatpush1.bf16.msra.mxu1 %v7560_v30  ;;  %v7600_v61 = vld [vmem:[#allocation5 + $0x3c4] ss:$16 sps:$4 sm:$0xff]   ;;  %v7603_v63 = vld [vmem:[#allocation5 + $0x3c0] ss:$16 sps:$4 sm:$0xff]  }
  0x9e   :  { %4897 = vmatpush1.bf16.msra.mxu0 %v7561_v31  ;;  %4857 = vmatprep.subr.bf16.mxu1 %v7562_v32  ;;  %v7604_v0 = vld [vmem:[#allocation5 + $0x1e4] ss:$16 sps:$4 sm:$0xff]   ;;  %v7608_v2 = vld [vmem:[#allocation5 + $0x1e0] ss:$16 sps:$4 sm:$0xff]   ;;  %v7655_v31 = vld [vmem:[#allocation5 + $0xcc] ss:$16 sps:$4 sm:$0xff]  }
  0x9f   :  { %4898 = vmatprep.subr.bf16.mxu0 %v7564_v33  ;;  %v7606_v1 = vld [vmem:[#allocation5 + $0x3e4] ss:$16 sps:$4 sm:$0xff]   ;;  %v7609_v3 = vld [vmem:[#allocation5 + $0x3e0] ss:$16 sps:$4 sm:$0xff]  }
  0xa0   :  { %v7616_v4 = vld [vmem:[#allocation5 + $0x404] ss:$16 sps:$4 sm:$0xff]   ;;  %v7614_v8 = vld [vmem:[#allocation5 + $0x400] ss:$16 sps:$4 sm:$0xff]  }
  0xa1   :  { %4858 = vmatpush1.bf16.msra.mxu1 %v7566_v34  ;;  %v7622_v10 = vld [vmem:[#allocation5 + $0x424] ss:$16 sps:$4 sm:$0xff]   ;;  %v7620_v12 = vld [vmem:[#allocation5 + $0x420] ss:$16 sps:$4 sm:$0xff]  }
  0xa2   :  { %4899 = vmatpush1.bf16.msra.mxu0 %v7567_v35  ;;  %4859 = vmatprep.subr.bf16.mxu1 %v7568_v36  ;;  %v7628_v14 = vld [vmem:[#allocation5 + $0x444] ss:$16 sps:$4 sm:$0xff]   ;;  %v7626_v16 = vld [vmem:[#allocation5 + $0x440] ss:$16 sps:$4 sm:$0xff]   ;;  %v7653_v35 = vld [vmem:[#allocation5 + $0xc8] ss:$16 sps:$4 sm:$0xff]  }
  0xa3   :  { %4900 = vmatprep.subr.bf16.mxu0 %v7570_v37  ;;  %v7634_v18 = vld [vmem:[#allocation5 + $0x464] ss:$16 sps:$4 sm:$0xff]   ;;  %v7632_v20 = vld [vmem:[#allocation5 + $0x460] ss:$16 sps:$4 sm:$0xff]   ;;  %v7661_v37 = vld [vmem:[#allocation5 + $0xec] ss:$16 sps:$4 sm:$0xff]  }
  0xa4   :  { %v7640_v22 = vld [vmem:[#allocation5 + $0x484] ss:$16 sps:$4 sm:$0xff]   ;;  %v7638_v24 = vld [vmem:[#allocation5 + $0x480] ss:$16 sps:$4 sm:$0xff]  }
  0xa5   :  { %4860 = vmatpush1.bf16.msra.mxu1 %v7572_v38  ;;  %v7646_v26 = vld [vmem:[#allocation5 + $0x4a4] ss:$16 sps:$4 sm:$0xff]   ;;  %v7644_v28 = vld [vmem:[#allocation5 + $0x4a0] ss:$16 sps:$4 sm:$0xff]  }
  0xa6   :  { %4901 = vmatpush1.bf16.msra.mxu0 %v7573_v39  ;;  %4861 = vmatprep.subr.bf16.mxu1 %v7574_v40  ;;  %v7652_v30 = vld [vmem:[#allocation5 + $0x4c4] ss:$16 sps:$4 sm:$0xff]   ;;  %v7650_v33 = vld [vmem:[#allocation5 + $0x4c0] ss:$16 sps:$4 sm:$0xff]   ;;  %v7659_v39 = vld [vmem:[#allocation5 + $0xe8] ss:$16 sps:$4 sm:$0xff]  }
  0xa7   :  { %4902 = vmatprep.subr.bf16.mxu0 %v7576_v41  ;;  %v9139_v32 = vld [vmem:[#allocation2 + $0x10] sm:$0xff]  ;;  %v7667_v41 = vld [vmem:[#allocation5 + $0x10c] ss:$16 sps:$4 sm:$0xff]  }
  0xa8   :  { %v9143_v34 = vcombine.high %v9139_v32, %v9139_v32  ;;  %v7658_v36 = vld [vmem:[#allocation5 + $0x4e4] ss:$16 sps:$4 sm:$0xff]   ;;  %v7656_v38 = vld [vmem:[#allocation5 + $0x4e0] ss:$16 sps:$4 sm:$0xff]  }
  0xa9   :  { %4862 = vmatpush1.bf16.msra.mxu1 %v7578_v42  ;;  %v7664_v40 = vld [vmem:[#allocation5 + $0x504] ss:$16 sps:$4 sm:$0xff]   ;;  %v7662_v42 = vld [vmem:[#allocation5 + $0x500] ss:$16 sps:$4 sm:$0xff]  }
  0xaa   :  { %4903 = vmatpush1.bf16.msra.mxu0 %v7579_v43  ;;  %4863 = vmatprep.subr.bf16.mxu1 %v7580_v44  ;;  %v7665_v43 = vld [vmem:[#allocation5 + $0x108] ss:$16 sps:$4 sm:$0xff]   ;;  %v7670_v44 = vld [vmem:[#allocation5 + $0x524] ss:$16 sps:$4 sm:$0xff]   ;;  %v7668_v46 = vld [vmem:[#allocation5 + $0x520] ss:$16 sps:$4 sm:$0xff]  }
  0xab   :  { %4904 = vmatprep.subr.bf16.mxu0 %v7582_v45  ;;  %v7673_v45 = vld [vmem:[#allocation5 + $0x12c] ss:$16 sps:$4 sm:$0xff]   ;;  %v7676_v48 = vld [vmem:[#allocation5 + $0x544] ss:$16 sps:$4 sm:$0xff]  }
  0xad   :  { %4864 = vmatpush1.bf16.msra.mxu1 %v7584_v49  ;;  %v7679_v49 = vld [vmem:[#allocation5 + $0x14c] ss:$16 sps:$4 sm:$0xff]  }
  0xae   :  { %4905 = vmatpush1.bf16.msra.mxu0 %v7585_v50  ;;  %4865 = vmatprep.subr.bf16.mxu1 %v7586_v52  ;;  %v7674_v50 = vld [vmem:[#allocation5 + $0x540] ss:$16 sps:$4 sm:$0xff]   ;;  %v7677_v52 = vld [vmem:[#allocation5 + $0x148] ss:$16 sps:$4 sm:$0xff]  }
  0xaf   :  { %4906 = vmatprep.subr.bf16.mxu0 %v7588_v53  ;;  %v7682_v53 = vld [vmem:[#allocation5 + $0x564] ss:$16 sps:$4 sm:$0xff]  }
  0xb1   :  { %4866 = vmatpush1.bf16.msra.mxu1 %v7590_v54  ;;  %v7685_v54 = vld [vmem:[#allocation5 + $0x16c] ss:$16 sps:$4 sm:$0xff]  }
  0xb2   :  { %4907 = vmatpush1.bf16.msra.mxu0 %v7591_v55  ;;  %4867 = vmatprep.subr.bf16.mxu1 %v7592_v56  ;;  %v7680_v55 = vld [vmem:[#allocation5 + $0x560] ss:$16 sps:$4 sm:$0xff]   ;;  %v7683_v56 = vld [vmem:[#allocation5 + $0x168] ss:$16 sps:$4 sm:$0xff]  }
  0xb3   :  { %4908 = vmatprep.subr.bf16.mxu0 %v7594_v57  ;;  %v7688_v57 = vld [vmem:[#allocation5 + $0x584] ss:$16 sps:$4 sm:$0xff]  }
  0xb5   :  { %4868 = vmatpush1.bf16.msra.mxu1 %v7596_v58  ;;  %v7691_v58 = vld [vmem:[#allocation5 + $0x18c] ss:$16 sps:$4 sm:$0xff]  }
  0xb6   :  { %4909 = vmatpush1.bf16.msra.mxu0 %v7597_v59  ;;  %4869 = vmatprep.subr.bf16.mxu1 %v7598_v60  ;;  %v7686_v59 = vld [vmem:[#allocation5 + $0x580] ss:$16 sps:$4 sm:$0xff]   ;;  %v7689_v60 = vld [vmem:[#allocation5 + $0x188] ss:$16 sps:$4 sm:$0xff]  }
  0xb7   :  { %4910 = vmatprep.subr.bf16.mxu0 %v7600_v61  ;;  %v7694_v61 = vld [vmem:[#allocation5 + $0x5a4] ss:$16 sps:$4 sm:$0xff]  }
  0xb9   :  { %4870 = vmatpush1.bf16.msra.mxu1 %v7602_v62  ;;  %v7697_v62 = vld [vmem:[#allocation5 + $0x1ac] ss:$16 sps:$4 sm:$0xff]  }
  0xba   :  { %4911 = vmatpush1.bf16.msra.mxu0 %v7603_v63  ;;  %4871 = vmatprep.subr.bf16.mxu1 %v7604_v0  ;;  %v7692_v63 = vld [vmem:[#allocation5 + $0x5a0] ss:$16 sps:$4 sm:$0xff]   ;;  %v7695_v0 = vld [vmem:[#allocation5 + $0x1a8] ss:$16 sps:$4 sm:$0xff]  }
  0xbb   :  { %4912 = vmatprep.subr.bf16.mxu0 %v7606_v1  ;;  %v7700_v1 = vld [vmem:[#allocation5 + $0x5c4] ss:$16 sps:$4 sm:$0xff]  }
  0xbd   :  { %4872 = vmatpush1.bf16.msra.mxu1 %v7608_v2  ;;  %v7703_v2 = vld [vmem:[#allocation5 + $0x1cc] ss:$16 sps:$4 sm:$0xff]  }
  0xbe   :  { %4913 = vmatpush1.bf16.msra.mxu0 %v7609_v3  ;;  %5333 = vmatprep.subr.bf16.mxu1 %v7619_v5  ;;  %v7698_v3 = vld [vmem:[#allocation5 + $0x5c0] ss:$16 sps:$4 sm:$0xff]   ;;  %v7706_v5 = vld [vmem:[#allocation5 + $0x5e4] ss:$16 sps:$4 sm:$0xff]  }
  0xbf   :  { %4923 = vmatprep.subr.bf16.mxu0 %v7616_v4  ;;  %v7701_v4 = vld [vmem:[#allocation5 + $0x1c8] ss:$16 sps:$4 sm:$0xff]  }
  0xc0   :  { %4874 = vmatmul.mubr.bf16.vlgmr.msra.gmra.mrb[0].mxu1 %v9132_v6 }
  0xc1   :  { %4915 = vmatmul.mubr.bf16.vlgmr.msra.gmra.mrb[0].mxu0 %v9134_v7  ;;  %5334 = vmatpush1.bf16.msra.mxu1 %v7617_v9  ;;  %v7704_v9 = vld [vmem:[#allocation5 + $0x5e0] ss:$16 sps:$4 sm:$0xff]  }
  0xc2   :  { %4924 = vmatpush1.bf16.msra.mxu0 %v7614_v8  ;;  %5335 = vmatprep.subr.bf16.mxu1 %v7625_v11  ;;  %v7709_v8 = vld [vmem:[#allocation5 + $0x1ec] ss:$16 sps:$4 sm:$0xff]   ;;  %v7714_v11 = vld [vmem:[#allocation5 + $0x604] ss:$16 sps:$4 sm:$0xff]  }
  0xc3   :  { %4925 = vmatprep.subr.bf16.mxu0 %v7622_v10  ;;  %5365 = vmatprep.mubr.bf16.mxu1 %v9126_v47  ;;  %v7671_v47 = vld [vmem:[#allocation5 + $0x128] ss:$16 sps:$4 sm:$0xff]  }
  0xc4   :  { %4955 = vmatprep.mubr.bf16.mxu0 %v9143_v34  ;;  %v7707_v10 = vld [vmem:[#allocation5 + $0x1e8] ss:$16 sps:$4 sm:$0xff]  }
  0xc5   :  { %5336 = vmatpush1.bf16.msra.mxu1 %v7623_v13  ;;  %v9148_v13 = vcombine.low %v9139_v32, %v9139_v32  ;;  %v7739_v32 = vld [vmem:[#allocation5 + $0x288] ss:$16 sps:$4 sm:$0xff]  }
  0xc6   :  { %4926 = vmatpush1.bf16.msra.mxu0 %v7620_v12  ;;  %5337 = vmatprep.subr.bf16.mxu1 %v7631_v15  ;;  %v7717_v12 = vld [vmem:[#allocation5 + $0x20c] ss:$16 sps:$4 sm:$0xff]   ;;  %v7715_v15 = vld [vmem:[#allocation5 + $0x208] ss:$16 sps:$4 sm:$0xff]  }
  0xc7   :  { %4927 = vmatprep.subr.bf16.mxu0 %v7628_v14  ;;  %v7712_v14 = vld [vmem:[#allocation5 + $0x600] ss:$16 sps:$4 sm:$0xff]  }
  0xc9   :  { %5338 = vmatpush1.bf16.msra.mxu1 %v7629_v17  ;;  %v7723_v17 = vld [vmem:[#allocation5 + $0x22c] ss:$16 sps:$4 sm:$0xff]  }
  0xca   :  { %4928 = vmatpush1.bf16.msra.mxu0 %v7626_v16  ;;  %5339 = vmatprep.subr.bf16.mxu1 %v7637_v19  ;;  %v7720_v16 = vld [vmem:[#allocation5 + $0x624] ss:$16 sps:$4 sm:$0xff]  }
  0xcb   :  { %4929 = vmatprep.subr.bf16.mxu0 %v7634_v18  ;;  %v9150_v18 = vld [vmem:[#allocation2 + $0x18] sm:$0xff] }
  0xcc   :  { %v9154_v19 = vcombine.high %v9150_v18, %v9150_v18 }
  0xcd   :  { %5340 = vmatpush1.bf16.msra.mxu1 %v7635_v21  ;;  %v7721_v21 = vld [vmem:[#allocation5 + $0x228] ss:$16 sps:$4 sm:$0xff]  }
  0xce   :  { %4930 = vmatpush1.bf16.msra.mxu0 %v7632_v20  ;;  %5341 = vmatprep.subr.bf16.mxu1 %v7643_v23  ;;  %v7718_v20 = vld [vmem:[#allocation5 + $0x620] ss:$16 sps:$4 sm:$0xff]   ;;  %v7729_v23 = vld [vmem:[#allocation5 + $0x24c] ss:$16 sps:$4 sm:$0xff]  }
  0xcf   :  { %4931 = vmatprep.subr.bf16.mxu0 %v7640_v22  ;;  %v7726_v22 = vld [vmem:[#allocation5 + $0x644] ss:$16 sps:$4 sm:$0xff]  }
  0xd1   :  { %5342 = vmatpush1.bf16.msra.mxu1 %v7641_v25  ;;  %v7727_v25 = vld [vmem:[#allocation5 + $0x248] ss:$16 sps:$4 sm:$0xff]  }
  0xd2   :  { %4932 = vmatpush1.bf16.msra.mxu0 %v7638_v24  ;;  %5343 = vmatprep.subr.bf16.mxu1 %v7649_v27  ;;  %v7724_v24 = vld [vmem:[#allocation5 + $0x640] ss:$16 sps:$4 sm:$0xff]  }
  0xd3   :  { %4933 = vmatprep.subr.bf16.mxu0 %v7646_v26  ;;  %v7732_v26 = vld [vmem:[#allocation5 + $0x664] ss:$16 sps:$4 sm:$0xff]   ;;  %v7730_v27 = vld [vmem:[#allocation5 + $0x660] ss:$16 sps:$4 sm:$0xff]  }
  0xd5   :  { %5344 = vmatpush1.bf16.msra.mxu1 %v7647_v29  ;;  %v7738_v29 = vld [vmem:[#allocation5 + $0x684] ss:$16 sps:$4 sm:$0xff]  }
  0xd6   :  { %4934 = vmatpush1.bf16.msra.mxu0 %v7644_v28  ;;  %5345 = vmatprep.subr.bf16.mxu1 %v7655_v31  ;;  %v7733_v28 = vld [vmem:[#allocation5 + $0x268] ss:$16 sps:$4 sm:$0xff]   ;;  %v7736_v31 = vld [vmem:[#allocation5 + $0x680] ss:$16 sps:$4 sm:$0xff]  }
  0xd7   :  { %4935 = vmatprep.subr.bf16.mxu0 %v7652_v30  ;;  %v7741_v30 = vld [vmem:[#allocation5 + $0x28c] ss:$16 sps:$4 sm:$0xff]  }
  0xd9   :  { %5346 = vmatpush1.bf16.msra.mxu1 %v7653_v35  ;;  %v7742_v35 = vld [vmem:[#allocation5 + $0x6a0] ss:$16 sps:$4 sm:$0xff]  }
  0xda   :  { %4936 = vmatpush1.bf16.msra.mxu0 %v7650_v33  ;;  %5347 = vmatprep.subr.bf16.mxu1 %v7661_v37  ;;  %v7747_v33 = vld [vmem:[#allocation5 + $0x2ac] ss:$16 sps:$4 sm:$0xff]   ;;  %v7750_v37 = vld [vmem:[#allocation5 + $0x6c4] ss:$16 sps:$4 sm:$0xff]  }
  0xdb   :  { %4937 = vmatprep.subr.bf16.mxu0 %v7658_v36  ;;  %v7745_v36 = vld [vmem:[#allocation5 + $0x2a8] ss:$16 sps:$4 sm:$0xff]  }
  0xdd   :  { %5348 = vmatpush1.bf16.msra.mxu1 %v7659_v39  ;;  %v7748_v39 = vld [vmem:[#allocation5 + $0x6c0] ss:$16 sps:$4 sm:$0xff]  }
  0xde   :  { %4938 = vmatpush1.bf16.msra.mxu0 %v7656_v38  ;;  %5349 = vmatprep.subr.bf16.mxu1 %v7667_v41  ;;  %v7753_v38 = vld [vmem:[#allocation5 + $0x2cc] ss:$16 sps:$4 sm:$0xff]   ;;  %v7756_v41 = vld [vmem:[#allocation5 + $0x6e4] ss:$16 sps:$4 sm:$0xff]  }
  0xdf   :  { %4939 = vmatprep.subr.bf16.mxu0 %v7664_v40  ;;  %v7751_v40 = vld [vmem:[#allocation5 + $0x2c8] ss:$16 sps:$4 sm:$0xff]  }
  0xe1   :  { %5350 = vmatpush1.bf16.msra.mxu1 %v7665_v43  ;;  %v7754_v43 = vld [vmem:[#allocation5 + $0x6e0] ss:$16 sps:$4 sm:$0xff]  }
  0xe2   :  { %4940 = vmatpush1.bf16.msra.mxu0 %v7662_v42  ;;  %5351 = vmatprep.subr.bf16.mxu1 %v7673_v45  ;;  %v7759_v42 = vld [vmem:[#allocation5 + $0x2ec] ss:$16 sps:$4 sm:$0xff]   ;;  %v7762_v45 = vld [vmem:[#allocation5 + $0x704] ss:$16 sps:$4 sm:$0xff]  }
  0xe3   :  { %4941 = vmatprep.subr.bf16.mxu0 %v7670_v44  ;;  %v7757_v44 = vld [vmem:[#allocation5 + $0x2e8] ss:$16 sps:$4 sm:$0xff]  }
  0xe5   :  { %5352 = vmatpush1.bf16.msra.mxu1 %v7671_v47  ;;  %v7760_v47 = vld [vmem:[#allocation5 + $0x700] ss:$16 sps:$4 sm:$0xff]  }
  0xe6   :  { %4942 = vmatpush1.bf16.msra.mxu0 %v7668_v46  ;;  %5353 = vmatprep.subr.bf16.mxu1 %v7679_v49  ;;  %v7765_v46 = vld [vmem:[#allocation5 + $0x30c] ss:$16 sps:$4 sm:$0xff]   ;;  %v7768_v49 = vld [vmem:[#allocation5 + $0x724] ss:$16 sps:$4 sm:$0xff]  }
  0xe7   :  { %4943 = vmatprep.subr.bf16.mxu0 %v7676_v48  ;;  %v7763_v48 = vld [vmem:[#allocation5 + $0x308] ss:$16 sps:$4 sm:$0xff]  }
  0xe9   :  { %5354 = vmatpush1.bf16.msra.mxu1 %v7677_v52  ;;  %v7766_v52 = vld [vmem:[#allocation5 + $0x720] ss:$16 sps:$4 sm:$0xff]  }
  0xea   :  { %4944 = vmatpush1.bf16.msra.mxu0 %v7674_v50  ;;  %5355 = vmatprep.subr.bf16.mxu1 %v7685_v54  ;;  %v7771_v50 = vld [vmem:[#allocation5 + $0x32c] ss:$16 sps:$4 sm:$0xff]   ;;  %v7774_v54 = vld [vmem:[#allocation5 + $0x744] ss:$16 sps:$4 sm:$0xff]  }
  0xeb   :  { %4945 = vmatprep.subr.bf16.mxu0 %v7682_v53  ;;  %v7769_v53 = vld [vmem:[#allocation5 + $0x328] ss:$16 sps:$4 sm:$0xff]  }
  0xed   :  { %5356 = vmatpush1.bf16.msra.mxu1 %v7683_v56  ;;  %v7772_v56 = vld [vmem:[#allocation5 + $0x740] ss:$16 sps:$4 sm:$0xff]  }
  0xee   :  { %4946 = vmatpush1.bf16.msra.mxu0 %v7680_v55  ;;  %5357 = vmatprep.subr.bf16.mxu1 %v7691_v58  ;;  %v7777_v55 = vld [vmem:[#allocation5 + $0x34c] ss:$16 sps:$4 sm:$0xff]   ;;  %v7780_v58 = vld [vmem:[#allocation5 + $0x764] ss:$16 sps:$4 sm:$0xff]  }
  0xef   :  { %4947 = vmatprep.subr.bf16.mxu0 %v7688_v57  ;;  %v7775_v57 = vld [vmem:[#allocation5 + $0x348] ss:$16 sps:$4 sm:$0xff]  }
  0xf1   :  { %5358 = vmatpush1.bf16.msra.mxu1 %v7689_v60  ;;  %v7778_v60 = vld [vmem:[#allocation5 + $0x760] ss:$16 sps:$4 sm:$0xff]  }
  0xf2   :  { %4948 = vmatpush1.bf16.msra.mxu0 %v7686_v59  ;;  %5359 = vmatprep.subr.bf16.mxu1 %v7697_v62  ;;  %v7783_v59 = vld [vmem:[#allocation5 + $0x36c] ss:$16 sps:$4 sm:$0xff]   ;;  %v7786_v62 = vld [vmem:[#allocation5 + $0x784] ss:$16 sps:$4 sm:$0xff]  }
  0xf3   :  { %4949 = vmatprep.subr.bf16.mxu0 %v7694_v61  ;;  %v7781_v61 = vld [vmem:[#allocation5 + $0x368] ss:$16 sps:$4 sm:$0xff]  }
  0xf5   :  { %5360 = vmatpush1.bf16.msra.mxu1 %v7695_v0  ;;  %v7784_v0 = vld [vmem:[#allocation5 + $0x780] ss:$16 sps:$4 sm:$0xff]  }
  0xf6   :  { %4950 = vmatpush1.bf16.msra.mxu0 %v7692_v63  ;;  %5361 = vmatprep.subr.bf16.mxu1 %v7703_v2  ;;  %v7789_v63 = vld [vmem:[#allocation5 + $0x38c] ss:$16 sps:$4 sm:$0xff]   ;;  %v7792_v2 = vld [vmem:[#allocation5 + $0x7a4] ss:$16 sps:$4 sm:$0xff]  }
  0xf7   :  { %4951 = vmatprep.subr.bf16.mxu0 %v7700_v1  ;;  %v7787_v1 = vld [vmem:[#allocation5 + $0x388] ss:$16 sps:$4 sm:$0xff]  }
  0xf9   :  { %5362 = vmatpush1.bf16.msra.mxu1 %v7701_v4  ;;  %v7790_v4 = vld [vmem:[#allocation5 + $0x7a0] ss:$16 sps:$4 sm:$0xff]  }
  0xfa   :  { %4952 = vmatpush1.bf16.msra.mxu0 %v7698_v3  ;;  %5363 = vmatprep.subr.bf16.mxu1 %v7709_v8  ;;  %v7795_v3 = vld [vmem:[#allocation5 + $0x3ac] ss:$16 sps:$4 sm:$0xff]   ;;  %v7798_v8 = vld [vmem:[#allocation5 + $0x7c4] ss:$16 sps:$4 sm:$0xff]  }
  0xfb   :  { %4953 = vmatprep.subr.bf16.mxu0 %v7706_v5  ;;  %v7793_v5 = vld [vmem:[#allocation5 + $0x3a8] ss:$16 sps:$4 sm:$0xff]  }
  0xfd   :  { %5364 = vmatpush1.bf16.msra.mxu1 %v7707_v10  ;;  %v7796_v10 = vld [vmem:[#allocation5 + $0x7c0] ss:$16 sps:$4 sm:$0xff]  }
  0xfe   :  { %4954 = vmatpush1.bf16.msra.mxu0 %v7704_v9  ;;  %5374 = vmatprep.subr.bf16.mxu1 %v7717_v12  ;;  %v7801_v9 = vld [vmem:[#allocation5 + $0x3cc] ss:$16 sps:$4 sm:$0xff]   ;;  %v7804_v12 = vld [vmem:[#allocation5 + $0x7e4] ss:$16 sps:$4 sm:$0xff]  }
  0xff   :  { %4964 = vmatprep.subr.bf16.mxu0 %v7714_v11  ;;  %v7799_v11 = vld [vmem:[#allocation5 + $0x3c8] ss:$16 sps:$4 sm:$0xff]  }
 0x100   :  { %5366 = vmatmul.mubr.bf16.vlgmr.msra.gmra.mrb[4].mxu1 %v9132_v6  ;;  %v7735_v6 = vld [vmem:[#allocation5 + $0x26c] ss:$16 sps:$4 sm:$0xff]  }
 0x101   :  { %4956 = vmatmul.mubr.bf16.vlgmr.msra.gmra.mrb[0].mxu0 %v9148_v13  ;;  %5375 = vmatpush1.bf16.msra.mxu1 %v7715_v15  ;;  %v7802_v15 = vld [vmem:[#allocation5 + $0x7e0] ss:$16 sps:$4 sm:$0xff]  }
 0x102   :  { %4965 = vmatpush1.bf16.msra.mxu0 %v7712_v14  ;;  %5376 = vmatprep.subr.bf16.mxu1 %v7723_v17  ;;  %v7807_v14 = vld [vmem:[#allocation5 + $0x3ec] ss:$16 sps:$4 sm:$0xff]   ;;  %v7812_v17 = vld [vmem:[#allocation5 + $0x804] ss:$16 sps:$4 sm:$0xff]  }
 0x103   :  { %4966 = vmatprep.subr.bf16.mxu0 %v7720_v16  ;;  %4996 = vmatprep.mubr.bf16.mxu0 %v9154_v19  ;;  %v7805_v16 = vld [vmem:[#allocation5 + $0x3e8] ss:$16 sps:$4 sm:$0xff]  }
 0x104   :  { %5406 = vmatprep.mubr.bf16.mxu1 %v9128_v51  ;;  %v7744_v51 = vld [vmem:[#allocation5 + $0x6a4] ss:$16 sps:$4 sm:$0xff]  }
 0x105   :  { %5377 = vmatpush1.bf16.msra.mxu1 %v7721_v21  ;;  %v9162_v21 = vcombine.low %v9150_v18, %v9150_v18  ;;  %v7816_v18 = vld [vmem:[#allocation5 + $0x820] ss:$16 sps:$4 sm:$0xff]  }
 0x106   :  { %4967 = vmatpush1.bf16.msra.mxu0 %v7718_v20  ;;  %5378 = vmatprep.subr.bf16.mxu1 %v7729_v23  ;;  %v7815_v20 = vld [vmem:[#allocation5 + $0x40c] ss:$16 sps:$4 sm:$0xff]   ;;  %v7810_v23 = vld [vmem:[#allocation5 + $0x800] ss:$16 sps:$4 sm:$0xff]  }
 0x107   :  { %4968 = vmatprep.subr.bf16.mxu0 %v7726_v22  ;;  %v9164_v22 = vld [vmem:[#allocation2 + $0x20] sm:$0xff] }
 0x109   :  { %5379 = vmatpush1.bf16.msra.mxu1 %v7727_v25  ;;  %v7818_v25 = vld [vmem:[#allocation5 + $0x824] ss:$16 sps:$4 sm:$0xff]  }
 0x10a   :  { %4969 = vmatpush1.bf16.msra.mxu0 %v7724_v24  ;;  %5380 = vmatprep.subr.bf16.mxu1 %v7735_v6  ;;  %v7813_v24 = vld [vmem:[#allocation5 + $0x408] ss:$16 sps:$4 sm:$0xff]   ;;  %v9168_v6 = vcombine.high %v9164_v22, %v9164_v22 }
 0x10b   :  { %4970 = vmatprep.subr.bf16.mxu0 %v7732_v26  ;;  %v7821_v26 = vld [vmem:[#allocation5 + $0x42c] ss:$16 sps:$4 sm:$0xff]  }
 0x10d   :  { %5381 = vmatpush1.bf16.msra.mxu1 %v7733_v28  ;;  %v7824_v28 = vld [vmem:[#allocation5 + $0x844] ss:$16 sps:$4 sm:$0xff]  }
 0x10e   :  { %4971 = vmatpush1.bf16.msra.mxu0 %v7730_v27  ;;  %5382 = vmatprep.subr.bf16.mxu1 %v7741_v30  ;;  %v7819_v27 = vld [vmem:[#allocation5 + $0x428] ss:$16 sps:$4 sm:$0xff]   ;;  %v7822_v30 = vld [vmem:[#allocation5 + $0x840] ss:$16 sps:$4 sm:$0xff]  }
 0x10f   :  { %4972 = vmatprep.subr.bf16.mxu0 %v7738_v29  ;;  %v7827_v29 = vld [vmem:[#allocation5 + $0x44c] ss:$16 sps:$4 sm:$0xff]  }
 0x111   :  { %5383 = vmatpush1.bf16.msra.mxu1 %v7739_v32  ;;  %v7830_v32 = vld [vmem:[#allocation5 + $0x864] ss:$16 sps:$4 sm:$0xff]  }
 0x112   :  { %4973 = vmatpush1.bf16.msra.mxu0 %v7736_v31  ;;  %5384 = vmatprep.subr.bf16.mxu1 %v7747_v33  ;;  %v7825_v31 = vld [vmem:[#allocation5 + $0x448] ss:$16 sps:$4 sm:$0xff]  }
 0x113   :  { %4974 = vmatprep.subr.bf16.mxu0 %v7744_v51  ;;  %v7828_v51 = vld [vmem:[#allocation5 + $0x860] ss:$16 sps:$4 sm:$0xff]   ;;  %v7831_v33 = vld [vmem:[#allocation5 + $0x468] ss:$16 sps:$4 sm:$0xff]  }
 0x115   :  { %5385 = vmatpush1.bf16.msra.mxu1 %v7745_v36  ;;  %v7839_v36 = vld [vmem:[#allocation5 + $0x48c] ss:$16 sps:$4 sm:$0xff]  }
 0x116   :  { %4975 = vmatpush1.bf16.msra.mxu0 %v7742_v35  ;;  %5386 = vmatprep.subr.bf16.mxu1 %v7753_v38  ;;  %v7836_v35 = vld [vmem:[#allocation5 + $0x884] ss:$16 sps:$4 sm:$0xff]  }
 0x117   :  { %4976 = vmatprep.subr.bf16.mxu0 %v7750_v37  ;;  %v7834_v37 = vld [vmem:[#allocation5 + $0x880] ss:$16 sps:$4 sm:$0xff]   ;;  %v7842_v38 = vld [vmem:[#allocation5 + $0x8a4] ss:$16 sps:$4 sm:$0xff]  }
 0x119   :  { %5387 = vmatpush1.bf16.msra.mxu1 %v7751_v40  ;;  %v7840_v40 = vld [vmem:[#allocation5 + $0x8a0] ss:$16 sps:$4 sm:$0xff]  }
 0x11a   :  { %4977 = vmatpush1.bf16.msra.mxu0 %v7748_v39  ;;  %5388 = vmatprep.subr.bf16.mxu1 %v7759_v42  ;;  %v7845_v39 = vld [vmem:[#allocation5 + $0x4ac] ss:$16 sps:$4 sm:$0xff]   ;;  %v7848_v42 = vld [vmem:[#allocation5 + $0x8c4] ss:$16 sps:$4 sm:$0xff]  }
 0x11b   :  { %4978 = vmatprep.subr.bf16.mxu0 %v7756_v41  ;;  %v7843_v41 = vld [vmem:[#allocation5 + $0x4a8] ss:$16 sps:$4 sm:$0xff]  }
 0x11d   :  { %5389 = vmatpush1.bf16.msra.mxu1 %v7757_v44  ;;  %v7846_v44 = vld [vmem:[#allocation5 + $0x8c0] ss:$16 sps:$4 sm:$0xff]  }
 0x11e   :  { %4979 = vmatpush1.bf16.msra.mxu0 %v7754_v43  ;;  %5390 = vmatprep.subr.bf16.mxu1 %v7765_v46  ;;  %v7851_v43 = vld [vmem:[#allocation5 + $0x4cc] ss:$16 sps:$4 sm:$0xff]   ;;  %v7854_v46 = vld [vmem:[#allocation5 + $0x8e4] ss:$16 sps:$4 sm:$0xff]  }
 0x11f   :  { %4980 = vmatprep.subr.bf16.mxu0 %v7762_v45  ;;  %v7849_v45 = vld [vmem:[#allocation5 + $0x4c8] ss:$16 sps:$4 sm:$0xff]  }
 0x121   :  { %5391 = vmatpush1.bf16.msra.mxu1 %v7763_v48  ;;  %v7852_v48 = vld [vmem:[#allocation5 + $0x8e0] ss:$16 sps:$4 sm:$0xff]  }
 0x122   :  { %4981 = vmatpush1.bf16.msra.mxu0 %v7760_v47  ;;  %5392 = vmatprep.subr.bf16.mxu1 %v7771_v50  ;;  %v7857_v47 = vld [vmem:[#allocation5 + $0x4ec] ss:$16 sps:$4 sm:$0xff]   ;;  %v7860_v50 = vld [vmem:[#allocation5 + $0x904] ss:$16 sps:$4 sm:$0xff]  }
 0x123   :  { %4982 = vmatprep.subr.bf16.mxu0 %v7768_v49  ;;  %v7855_v49 = vld [vmem:[#allocation5 + $0x4e8] ss:$16 sps:$4 sm:$0xff]  }
 0x125   :  { %5393 = vmatpush1.bf16.msra.mxu1 %v7769_v53  ;;  %v7858_v53 = vld [vmem:[#allocation5 + $0x900] ss:$16 sps:$4 sm:$0xff]  }
 0x126   :  { %4983 = vmatpush1.bf16.msra.mxu0 %v7766_v52  ;;  %5394 = vmatprep.subr.bf16.mxu1 %v7777_v55  ;;  %v7863_v52 = vld [vmem:[#allocation5 + $0x50c] ss:$16 sps:$4 sm:$0xff]   ;;  %v7866_v55 = vld [vmem:[#allocation5 + $0x924] ss:$16 sps:$4 sm:$0xff]  }
 0x127   :  { %4984 = vmatprep.subr.bf16.mxu0 %v7774_v54  ;;  %v7861_v54 = vld [vmem:[#allocation5 + $0x508] ss:$16 sps:$4 sm:$0xff]  }
 0x129   :  { %5395 = vmatpush1.bf16.msra.mxu1 %v7775_v57  ;;  %v7864_v57 = vld [vmem:[#allocation5 + $0x920] ss:$16 sps:$4 sm:$0xff]  }
 0x12a   :  { %4985 = vmatpush1.bf16.msra.mxu0 %v7772_v56  ;;  %5396 = vmatprep.subr.bf16.mxu1 %v7783_v59  ;;  %v7869_v56 = vld [vmem:[#allocation5 + $0x52c] ss:$16 sps:$4 sm:$0xff]   ;;  %v7872_v59 = vld [vmem:[#allocation5 + $0x944] ss:$16 sps:$4 sm:$0xff]  }
 0x12b   :  { %4986 = vmatprep.subr.bf16.mxu0 %v7780_v58  ;;  %v7867_v58 = vld [vmem:[#allocation5 + $0x528] ss:$16 sps:$4 sm:$0xff]  }
 0x12d   :  { %5397 = vmatpush1.bf16.msra.mxu1 %v7781_v61  ;;  %v7870_v61 = vld [vmem:[#allocation5 + $0x940] ss:$16 sps:$4 sm:$0xff]  }
 0x12e   :  { %4987 = vmatpush1.bf16.msra.mxu0 %v7778_v60  ;;  %5398 = vmatprep.subr.bf16.mxu1 %v7789_v63  ;;  %v7875_v60 = vld [vmem:[#allocation5 + $0x54c] ss:$16 sps:$4 sm:$0xff]   ;;  %v7878_v63 = vld [vmem:[#allocation5 + $0x964] ss:$16 sps:$4 sm:$0xff]  }
 0x12f   :  { %4988 = vmatprep.subr.bf16.mxu0 %v7786_v62  ;;  %v7873_v62 = vld [vmem:[#allocation5 + $0x548] ss:$16 sps:$4 sm:$0xff]  }
 0x131   :  { %5399 = vmatpush1.bf16.msra.mxu1 %v7787_v1  ;;  %v7876_v1 = vld [vmem:[#allocation5 + $0x960] ss:$16 sps:$4 sm:$0xff]  }
 0x132   :  { %4989 = vmatpush1.bf16.msra.mxu0 %v7784_v0  ;;  %5400 = vmatprep.subr.bf16.mxu1 %v7795_v3  ;;  %v7881_v0 = vld [vmem:[#allocation5 + $0x56c] ss:$16 sps:$4 sm:$0xff]   ;;  %v7884_v3 = vld [vmem:[#allocation5 + $0x984] ss:$16 sps:$4 sm:$0xff]  }
 0x133   :  { %4990 = vmatprep.subr.bf16.mxu0 %v7792_v2  ;;  %v7879_v2 = vld [vmem:[#allocation5 + $0x568] ss:$16 sps:$4 sm:$0xff]  }
 0x135   :  { %5401 = vmatpush1.bf16.msra.mxu1 %v7793_v5  ;;  %v7882_v5 = vld [vmem:[#allocation5 + $0x980] ss:$16 sps:$4 sm:$0xff]  }
 0x136   :  { %4991 = vmatpush1.bf16.msra.mxu0 %v7790_v4  ;;  %5402 = vmatprep.subr.bf16.mxu1 %v7801_v9  ;;  %v7887_v4 = vld [vmem:[#allocation5 + $0x58c] ss:$16 sps:$4 sm:$0xff]   ;;  %v7890_v9 = vld [vmem:[#allocation5 + $0x9a4] ss:$16 sps:$4 sm:$0xff]  }
 0x137   :  { %4992 = vmatprep.subr.bf16.mxu0 %v7798_v8  ;;  %v7885_v8 = vld [vmem:[#allocation5 + $0x588] ss:$16 sps:$4 sm:$0xff]  }
 0x139   :  { %5403 = vmatpush1.bf16.msra.mxu1 %v7799_v11  ;;  %v7888_v11 = vld [vmem:[#allocation5 + $0x9a0] ss:$16 sps:$4 sm:$0xff]  }
 0x13a   :  { %4993 = vmatpush1.bf16.msra.mxu0 %v7796_v10  ;;  %5404 = vmatprep.subr.bf16.mxu1 %v7807_v14  ;;  %v7893_v10 = vld [vmem:[#allocation5 + $0x5ac] ss:$16 sps:$4 sm:$0xff]   ;;  %v7896_v14 = vld [vmem:[#allocation5 + $0x9c4] ss:$16 sps:$4 sm:$0xff]  }
 0x13b   :  { %4994 = vmatprep.subr.bf16.mxu0 %v7804_v12  ;;  %v7891_v12 = vld [vmem:[#allocation5 + $0x5a8] ss:$16 sps:$4 sm:$0xff]  }
 0x13d   :  { %5405 = vmatpush1.bf16.msra.mxu1 %v7805_v16  ;;  %v7894_v16 = vld [vmem:[#allocation5 + $0x9c0] ss:$16 sps:$4 sm:$0xff]  }
 0x13e   :  { %4995 = vmatpush1.bf16.msra.mxu0 %v7802_v15  ;;  %5415 = vmatprep.subr.bf16.mxu1 %v7815_v20  ;;  %v7899_v15 = vld [vmem:[#allocation5 + $0x5cc] ss:$16 sps:$4 sm:$0xff]   ;;  %v7902_v20 = vld [vmem:[#allocation5 + $0x9e4] ss:$16 sps:$4 sm:$0xff]  }
 0x13f   :  { %5005 = vmatprep.subr.bf16.mxu0 %v7812_v17  ;;  %v7897_v17 = vld [vmem:[#allocation5 + $0x5c8] ss:$16 sps:$4 sm:$0xff]  }
 0x140   :  { %5407 = vmatmul.mubr.bf16.vlgmr.msra.gmra.mrb[4].mxu1 %v9134_v7  ;;  %v7833_v7 = vld [vmem:[#allocation5 + $0x46c] ss:$16 sps:$4 sm:$0xff]  }
 0x141   :  { %4997 = vmatmul.mubr.bf16.vlgmr.msra.gmra.mrb[0].mxu0 %v9162_v21  ;;  %5416 = vmatpush1.bf16.msra.mxu1 %v7813_v24  ;;  %v7900_v24 = vld [vmem:[#allocation5 + $0x9e0] ss:$16 sps:$4 sm:$0xff]  }
 0x142   :  { %5006 = vmatpush1.bf16.msra.mxu0 %v7810_v23  ;;  %5417 = vmatprep.subr.bf16.mxu1 %v7821_v26  ;;  %v7905_v23 = vld [vmem:[#allocation5 + $0x5ec] ss:$16 sps:$4 sm:$0xff]   ;;  %v7910_v26 = vld [vmem:[#allocation5 + $0xa04] ss:$16 sps:$4 sm:$0xff]  }
 0x143   :  { %5007 = vmatprep.subr.bf16.mxu0 %v7818_v25  ;;  %5037 = vmatprep.mubr.bf16.mxu0 %v9168_v6  ;;  %v7903_v25 = vld [vmem:[#allocation5 + $0x5e8] ss:$16 sps:$4 sm:$0xff]  }
 0x144   :  { %5447 = vmatprep.mubr.bf16.mxu1 %v9143_v34  ;;  %v7837_v34 = vld [vmem:[#allocation5 + $0x488] ss:$16 sps:$4 sm:$0xff]  }
 0x145   :  { %5418 = vmatpush1.bf16.msra.mxu1 %v7819_v27  ;;  %v9176_v27 = vcombine.low %v9164_v22, %v9164_v22  ;;  %v7914_v22 = vld [vmem:[#allocation5 + $0xa20] ss:$16 sps:$4 sm:$0xff]  }
 0x146   :  { %5008 = vmatpush1.bf16.msra.mxu0 %v7816_v18  ;;  %5419 = vmatprep.subr.bf16.mxu1 %v7827_v29  ;;  %v7913_v18 = vld [vmem:[#allocation5 + $0x60c] ss:$16 sps:$4 sm:$0xff]  }
 0x147   :  { %5009 = vmatprep.subr.bf16.mxu0 %v7824_v28  ;;  %v7908_v28 = vld [vmem:[#allocation5 + $0xa00] ss:$16 sps:$4 sm:$0xff]   ;;  %v9178_v29 = vld [vmem:[#allocation2 + $0x28] sm:$0xff] }
 0x149   :  { %5420 = vmatpush1.bf16.msra.mxu1 %v7825_v31  ;;  %v7916_v31 = vld [vmem:[#allocation5 + $0xa24] ss:$16 sps:$4 sm:$0xff]  }
 0x14a   :  { %5010 = vmatpush1.bf16.msra.mxu0 %v7822_v30  ;;  %5421 = vmatprep.subr.bf16.mxu1 %v7833_v7  ;;  %v7911_v30 = vld [vmem:[#allocation5 + $0x608] ss:$16 sps:$4 sm:$0xff]   ;;  %v9182_v7 = vcombine.high %v9178_v29, %v9178_v29 }
 0x14b   :  { %5011 = vmatprep.subr.bf16.mxu0 %v7830_v32  ;;  %v7919_v32 = vld [vmem:[#allocation5 + $0x62c] ss:$16 sps:$4 sm:$0xff]  }
 0x14d   :  { %5422 = vmatpush1.bf16.msra.mxu1 %v7831_v33  ;;  %v7922_v33 = vld [vmem:[#allocation5 + $0xa44] ss:$16 sps:$4 sm:$0xff]  }
 0x14e   :  { %5012 = vmatpush1.bf16.msra.mxu0 %v7828_v51  ;;  %5423 = vmatprep.subr.bf16.mxu1 %v7839_v36  ;;  %v7917_v51 = vld [vmem:[#allocation5 + $0x628] ss:$16 sps:$4 sm:$0xff]   ;;  %v7920_v36 = vld [vmem:[#allocation5 + $0xa40] ss:$16 sps:$4 sm:$0xff]  }
 0x14f   :  { %5013 = vmatprep.subr.bf16.mxu0 %v7836_v35  ;;  %v7925_v35 = vld [vmem:[#allocation5 + $0x64c] ss:$16 sps:$4 sm:$0xff]  }
 0x151   :  { %5424 = vmatpush1.bf16.msra.mxu1 %v7837_v34  ;;  %v7928_v34 = vld [vmem:[#allocation5 + $0xa64] ss:$16 sps:$4 sm:$0xff]  }
 0x152   :  { %5014 = vmatpush1.bf16.msra.mxu0 %v7834_v37  ;;  %5425 = vmatprep.subr.bf16.mxu1 %v7845_v39  ;;  %v7923_v37 = vld [vmem:[#allocation5 + $0x648] ss:$16 sps:$4 sm:$0xff]  }
 0x153   :  { %5015 = vmatprep.subr.bf16.mxu0 %v7842_v38  ;;  %v7926_v38 = vld [vmem:[#allocation5 + $0xa60] ss:$16 sps:$4 sm:$0xff]   ;;  %v7929_v39 = vld [vmem:[#allocation5 + $0x668] ss:$16 sps:$4 sm:$0xff]  }
 0x155   :  { %5426 = vmatpush1.bf16.msra.mxu1 %v7843_v41  ;;  %v7937_v41 = vld [vmem:[#allocation5 + $0x68c] ss:$16 sps:$4 sm:$0xff]  }
 0x156   :  { %5016 = vmatpush1.bf16.msra.mxu0 %v7840_v40  ;;  %5427 = vmatprep.subr.bf16.mxu1 %v7851_v43  ;;  %v7934_v40 = vld [vmem:[#allocation5 + $0xa84] ss:$16 sps:$4 sm:$0xff]  }
 0x157   :  { %5017 = vmatprep.subr.bf16.mxu0 %v7848_v42  ;;  %v7932_v42 = vld [vmem:[#allocation5 + $0xa80] ss:$16 sps:$4 sm:$0xff]   ;;  %v7940_v43 = vld [vmem:[#allocation5 + $0xaa4] ss:$16 sps:$4 sm:$0xff]  }
 0x159   :  { %5428 = vmatpush1.bf16.msra.mxu1 %v7849_v45  ;;  %v7938_v45 = vld [vmem:[#allocation5 + $0xaa0] ss:$16 sps:$4 sm:$0xff]  }
 0x15a   :  { %5018 = vmatpush1.bf16.msra.mxu0 %v7846_v44  ;;  %5429 = vmatprep.subr.bf16.mxu1 %v7857_v47  ;;  %v7943_v44 = vld [vmem:[#allocation5 + $0x6ac] ss:$16 sps:$4 sm:$0xff]   ;;  %v7946_v47 = vld [vmem:[#allocation5 + $0xac4] ss:$16 sps:$4 sm:$0xff]  }
 0x15b   :  { %5019 = vmatprep.subr.bf16.mxu0 %v7854_v46  ;;  %v7941_v46 = vld [vmem:[#allocation5 + $0x6a8] ss:$16 sps:$4 sm:$0xff]  }
 0x15d   :  { %5430 = vmatpush1.bf16.msra.mxu1 %v7855_v49 }
 0x15e   :  { %5020 = vmatpush1.bf16.msra.mxu0 %v7852_v48  ;;  %5431 = vmatprep.subr.bf16.mxu1 %v7863_v52  ;;  %v7949_v48 = vld [vmem:[#allocation5 + $0x6cc] ss:$16 sps:$4 sm:$0xff]  }
 0x15f   :  { %5021 = vmatprep.subr.bf16.mxu0 %v7860_v50 }
 0x161   :  { %5432 = vmatpush1.bf16.msra.mxu1 %v7861_v54  ;;  %v7947_v54 = vld [vmem:[#allocation5 + $0x6c8] ss:$16 sps:$4 sm:$0xff]  }
 0x162   :  { %5022 = vmatpush1.bf16.msra.mxu0 %v7858_v53  ;;  %5433 = vmatprep.subr.bf16.mxu1 %v7869_v56  ;;  %v7944_v53 = vld [vmem:[#allocation5 + $0xac0] ss:$16 sps:$4 sm:$0xff]   ;;  %v7952_v56 = vld [vmem:[#allocation5 + $0xae4] ss:$16 sps:$4 sm:$0xff]  }
 0x163   :  { %5023 = vmatprep.subr.bf16.mxu0 %v7866_v55 }
 0x165   :  { %5434 = vmatpush1.bf16.msra.mxu1 %v7867_v58  ;;  %v7950_v58 = vld [vmem:[#allocation5 + $0xae0] ss:$16 sps:$4 sm:$0xff]  }
 0x166   :  { %5024 = vmatpush1.bf16.msra.mxu0 %v7864_v57  ;;  %5435 = vmatprep.subr.bf16.mxu1 %v7875_v60  ;;  %v7955_v57 = vld [vmem:[#allocation5 + $0x6ec] ss:$16 sps:$4 sm:$0xff]   ;;  %v7958_v60 = vld [vmem:[#allocation5 + $0xb04] ss:$16 sps:$4 sm:$0xff]  }
 0x167   :  { %5025 = vmatprep.subr.bf16.mxu0 %v7872_v59  ;;  %v7953_v59 = vld [vmem:[#allocation5 + $0x6e8] ss:$16 sps:$4 sm:$0xff]  }
 0x169   :  { %5436 = vmatpush1.bf16.msra.mxu1 %v7873_v62  ;;  %v7956_v62 = vld [vmem:[#allocation5 + $0xb00] ss:$16 sps:$4 sm:$0xff]  }
 0x16a   :  { %5026 = vmatpush1.bf16.msra.mxu0 %v7870_v61  ;;  %5437 = vmatprep.subr.bf16.mxu1 %v7881_v0  ;;  %v7961_v61 = vld [vmem:[#allocation5 + $0x70c] ss:$16 sps:$4 sm:$0xff]   ;;  %v7964_v0 = vld [vmem:[#allocation5 + $0xb24] ss:$16 sps:$4 sm:$0xff]  }
 0x16b   :  { %5027 = vmatprep.subr.bf16.mxu0 %v7878_v63  ;;  %v7959_v63 = vld [vmem:[#allocation5 + $0x708] ss:$16 sps:$4 sm:$0xff]  }
 0x16d   :  { %5438 = vmatpush1.bf16.msra.mxu1 %v7879_v2  ;;  %v7962_v2 = vld [vmem:[#allocation5 + $0xb20] ss:$16 sps:$4 sm:$0xff]  }
 0x16e   :  { %5028 = vmatpush1.bf16.msra.mxu0 %v7876_v1  ;;  %5439 = vmatprep.subr.bf16.mxu1 %v7887_v4  ;;  %v7967_v1 = vld [vmem:[#allocation5 + $0x72c] ss:$16 sps:$4 sm:$0xff]   ;;  %v7970_v4 = vld [vmem:[#allocation5 + $0xb44] ss:$16 sps:$4 sm:$0xff]  }
 0x16f   :  { %5029 = vmatprep.subr.bf16.mxu0 %v7884_v3  ;;  %v7965_v3 = vld [vmem:[#allocation5 + $0x728] ss:$16 sps:$4 sm:$0xff]  }
 0x171   :  { %5440 = vmatpush1.bf16.msra.mxu1 %v7885_v8  ;;  %v7968_v8 = vld [vmem:[#allocation5 + $0xb40] ss:$16 sps:$4 sm:$0xff]  }
 0x172   :  { %5030 = vmatpush1.bf16.msra.mxu0 %v7882_v5  ;;  %5441 = vmatprep.subr.bf16.mxu1 %v7893_v10  ;;  %v7973_v5 = vld [vmem:[#allocation5 + $0x74c] ss:$16 sps:$4 sm:$0xff]   ;;  %v7976_v10 = vld [vmem:[#allocation5 + $0xb64] ss:$16 sps:$4 sm:$0xff]  }
 0x173   :  { %5031 = vmatprep.subr.bf16.mxu0 %v7890_v9  ;;  %v7971_v9 = vld [vmem:[#allocation5 + $0x748] ss:$16 sps:$4 sm:$0xff]  }
 0x175   :  { %5442 = vmatpush1.bf16.msra.mxu1 %v7891_v12  ;;  %v7974_v12 = vld [vmem:[#allocation5 + $0xb60] ss:$16 sps:$4 sm:$0xff]  }
 0x176   :  { %5032 = vmatpush1.bf16.msra.mxu0 %v7888_v11  ;;  %5443 = vmatprep.subr.bf16.mxu1 %v7899_v15  ;;  %v7979_v11 = vld [vmem:[#allocation5 + $0x76c] ss:$16 sps:$4 sm:$0xff]   ;;  %v7982_v15 = vld [vmem:[#allocation5 + $0xb84] ss:$16 sps:$4 sm:$0xff]  }
 0x177   :  { %5033 = vmatprep.subr.bf16.mxu0 %v7896_v14  ;;  %v7977_v14 = vld [vmem:[#allocation5 + $0x768] ss:$16 sps:$4 sm:$0xff]  }
 0x179   :  { %5444 = vmatpush1.bf16.msra.mxu1 %v7897_v17  ;;  %v7980_v17 = vld [vmem:[#allocation5 + $0xb80] ss:$16 sps:$4 sm:$0xff]  }
 0x17a   :  { %5034 = vmatpush1.bf16.msra.mxu0 %v7894_v16  ;;  %5445 = vmatprep.subr.bf16.mxu1 %v7905_v23  ;;  %v7985_v16 = vld [vmem:[#allocation5 + $0x78c] ss:$16 sps:$4 sm:$0xff]   ;;  %v7988_v23 = vld [vmem:[#allocation5 + $0xba4] ss:$16 sps:$4 sm:$0xff]  }
 0x17b   :  { %5035 = vmatprep.subr.bf16.mxu0 %v7902_v20  ;;  %v7983_v20 = vld [vmem:[#allocation5 + $0x788] ss:$16 sps:$4 sm:$0xff]  }
 0x17d   :  { %5446 = vmatpush1.bf16.msra.mxu1 %v7903_v25  ;;  %v7986_v25 = vld [vmem:[#allocation5 + $0xba0] ss:$16 sps:$4 sm:$0xff]  }
 0x17e   :  { %5036 = vmatpush1.bf16.msra.mxu0 %v7900_v24  ;;  %5456 = vmatprep.subr.bf16.mxu1 %v7913_v18  ;;  %v7991_v24 = vld [vmem:[#allocation5 + $0x7ac] ss:$16 sps:$4 sm:$0xff]   ;;  %v7994_v18 = vld [vmem:[#allocation5 + $0xbc4] ss:$16 sps:$4 sm:$0xff]  }
 0x17f   :  { %5046 = vmatprep.subr.bf16.mxu0 %v7910_v26  ;;  %v7989_v26 = vld [vmem:[#allocation5 + $0x7a8] ss:$16 sps:$4 sm:$0xff]  }
 0x180   :  { %5448 = vmatmul.mubr.bf16.vlgmr.msra.gmra.mrb[4].mxu1 %v9148_v13  ;;  %v7931_v13 = vld [vmem:[#allocation5 + $0x66c] ss:$16 sps:$4 sm:$0xff]  }
 0x181   :  { %5038 = vmatmul.mubr.bf16.vlgmr.msra.gmra.mrb[0].mxu0 %v9176_v27  ;;  %5457 = vmatpush1.bf16.msra.mxu1 %v7911_v30  ;;  %v7992_v30 = vld [vmem:[#allocation5 + $0xbc0] ss:$16 sps:$4 sm:$0xff]  }
 0x182   :  { %5047 = vmatpush1.bf16.msra.mxu0 %v7908_v28  ;;  %5458 = vmatprep.subr.bf16.mxu1 %v7919_v32  ;;  %v7997_v28 = vld [vmem:[#allocation5 + $0x7cc] ss:$16 sps:$4 sm:$0xff]   ;;  %v8000_v32 = vld [vmem:[#allocation5 + $0xbe4] ss:$16 sps:$4 sm:$0xff]  }
 0x183   :  { %5048 = vmatprep.subr.bf16.mxu0 %v7916_v31  ;;  %5078 = vmatprep.mubr.bf16.mxu0 %v9182_v7  ;;  %v7995_v31 = vld [vmem:[#allocation5 + $0x7c8] ss:$16 sps:$4 sm:$0xff]  }
 0x184   :  { %5488 = vmatprep.mubr.bf16.mxu1 %v9154_v19  ;;  %v7935_v19 = vld [vmem:[#allocation5 + $0x688] ss:$16 sps:$4 sm:$0xff]  }
 0x185   :  { %5459 = vmatpush1.bf16.msra.mxu1 %v7917_v51  ;;  %v7998_v51 = vld [vmem:[#allocation5 + $0xbe0] ss:$16 sps:$4 sm:$0xff]  }
 0x186   :  { %5049 = vmatpush1.bf16.msra.mxu0 %v7914_v22  ;;  %5460 = vmatprep.subr.bf16.mxu1 %v7925_v35  ;;  %v8003_v22 = vld [vmem:[#allocation5 + $0x7ec] ss:$16 sps:$4 sm:$0xff]   ;;  %v8008_v35 = vld [vmem:[#allocation5 + $0xc04] ss:$16 sps:$4 sm:$0xff]  }
 0x187   :  { %5050 = vmatprep.subr.bf16.mxu0 %v7922_v33  ;;  %v8001_v33 = vld [vmem:[#allocation5 + $0x7e8] ss:$16 sps:$4 sm:$0xff]  }
 0x189   :  { %5461 = vmatpush1.bf16.msra.mxu1 %v7923_v37  ;;  %v9192_v37 = vld [vmem:[#allocation2 + $0x30] sm:$0xff] }
 0x18a   :  { %5051 = vmatpush1.bf16.msra.mxu0 %v7920_v36  ;;  %5462 = vmatprep.subr.bf16.mxu1 %v7931_v13  ;;  %v8011_v36 = vld [vmem:[#allocation5 + $0x80c] ss:$16 sps:$4 sm:$0xff]   ;;  %v8006_v13 = vld [vmem:[#allocation5 + $0xc00] ss:$16 sps:$4 sm:$0xff]  }
 0x18b   :  { %5052 = vmatprep.subr.bf16.mxu0 %v7928_v34  ;;  %v9196_v34 = vcombine.low %v9178_v29, %v9178_v29  ;;  %v8012_v29 = vld [vmem:[#allocation5 + $0xc20] ss:$16 sps:$4 sm:$0xff]  }
 0x18d   :  { %5463 = vmatpush1.bf16.msra.mxu1 %v7929_v39  ;;  %v8014_v39 = vld [vmem:[#allocation5 + $0xc24] ss:$16 sps:$4 sm:$0xff]  }
 0x18e   :  { %5053 = vmatpush1.bf16.msra.mxu0 %v7926_v38  ;;  %5464 = vmatprep.subr.bf16.mxu1 %v7937_v41  ;;  %v8009_v38 = vld [vmem:[#allocation5 + $0x808] ss:$16 sps:$4 sm:$0xff]   ;;  %v9200_v41 = vcombine.high %v9192_v37, %v9192_v37 }
 0x18f   :  { %5054 = vmatprep.subr.bf16.mxu0 %v7934_v40  ;;  %v8017_v40 = vld [vmem:[#allocation5 + $0x82c] ss:$16 sps:$4 sm:$0xff]  }
 0x191   :  { %5465 = vmatpush1.bf16.msra.mxu1 %v7935_v19  ;;  %v8020_v19 = vld [vmem:[#allocation5 + $0xc44] ss:$16 sps:$4 sm:$0xff]  }
 0x192   :  { %5055 = vmatpush1.bf16.msra.mxu0 %v7932_v42  ;;  %5466 = vmatprep.subr.bf16.mxu1 %v7943_v44  ;;  %v8015_v42 = vld [vmem:[#allocation5 + $0x828] ss:$16 sps:$4 sm:$0xff]   ;;  %v8018_v44 = vld [vmem:[#allocation5 + $0xc40] ss:$16 sps:$4 sm:$0xff]  }
 0x193   :  { %5056 = vmatprep.subr.bf16.mxu0 %v7940_v43  ;;  %v9188_v49 = vpop.f32.mrb[0].mxu1  ;;  %v8023_v43 = vld [vmem:[#allocation5 + $0x84c] ss:$16 sps:$4 sm:$0xff]  }
 0x194   :  { %v9190_v50 = vpop.f32.mrb[1].mxu1 }
 0x195   :  { %v4879_v52 = vpop.f32.mrb[2].mxu1  ;;  %5467 = vmatpush1.bf16.msra.mxu1 %v7941_v46  ;;  %v8026_v46 = vld [vmem:[#allocation5 + $0xc64] ss:$16 sps:$4 sm:$0xff]  }
 0x196   :  { %5057 = vmatpush1.bf16.msra.mxu0 %v7938_v45  ;;  %v4880_v55 = vpop.f32.mrb[3].mxu1  ;;  %5468 = vmatprep.subr.bf16.mxu1 %v7949_v48  ;;  %v8021_v45 = vld [vmem:[#allocation5 + $0x848] ss:$16 sps:$4 sm:$0xff]   ;;  %v8032_v52 = vld [vmem:[#allocation5 + $0xc84] ss:$16 sps:$4 sm:$0xff]  }
 0x197   :  { %5058 = vmatprep.subr.bf16.mxu0 %v7946_v47  ;;  %v8024_v47 = vld [vmem:[#allocation5 + $0xc60] ss:$16 sps:$4 sm:$0xff]   ;;  %v8027_v48 = vld [vmem:[#allocation5 + $0x868] ss:$16 sps:$4 sm:$0xff]   ;;  %v8038_v55 = vld [vmem:[#allocation5 + $0xca4] ss:$16 sps:$4 sm:$0xff]  }
 0x199   :  { %5469 = vmatpush1.bf16.msra.mxu1 %v7947_v54  ;;  %v8030_v54 = vld [vmem:[#allocation5 + $0xc80] ss:$16 sps:$4 sm:$0xff]  }
 0x19a   :  { %5059 = vmatpush1.bf16.msra.mxu0 %v7944_v53  ;;  %5470 = vmatprep.subr.bf16.mxu1 %v7955_v57  ;;  %v8035_v53 = vld [vmem:[#allocation5 + $0x88c] ss:$16 sps:$4 sm:$0xff]   ;;  %v8036_v57 = vld [vmem:[#allocation5 + $0xca0] ss:$16 sps:$4 sm:$0xff]  }
 0x19b   :  { %5060 = vmatprep.subr.bf16.mxu0 %v7952_v56  ;;  %v8041_v56 = vld [vmem:[#allocation5 + $0x8ac] ss:$16 sps:$4 sm:$0xff]  }
 0x19d   :  { %5471 = vmatpush1.bf16.msra.mxu1 %v7953_v59  ;;  %v8044_v59 = vld [vmem:[#allocation5 + $0xcc4] ss:$16 sps:$4 sm:$0xff]  }
 0x19e   :  { %5061 = vmatpush1.bf16.msra.mxu0 %v7950_v58  ;;  %5472 = vmatprep.subr.bf16.mxu1 %v7961_v61  ;;  %v8039_v58 = vld [vmem:[#allocation5 + $0x8a8] ss:$16 sps:$4 sm:$0xff]   ;;  %v8042_v61 = vld [vmem:[#allocation5 + $0xcc0] ss:$16 sps:$4 sm:$0xff]  }
 0x19f   :  { %5062 = vmatprep.subr.bf16.mxu0 %v7958_v60  ;;  %v8047_v60 = vld [vmem:[#allocation5 + $0x8cc] ss:$16 sps:$4 sm:$0xff]  }
 0x1a1   :  { %5473 = vmatpush1.bf16.msra.mxu1 %v7959_v63  ;;  %v8050_v63 = vld [vmem:[#allocation5 + $0xce4] ss:$16 sps:$4 sm:$0xff]  }
 0x1a2   :  { %5063 = vmatpush1.bf16.msra.mxu0 %v7956_v62  ;;  %5474 = vmatprep.subr.bf16.mxu1 %v7967_v1  ;;  %v8045_v62 = vld [vmem:[#allocation5 + $0x8c8] ss:$16 sps:$4 sm:$0xff]   ;;  %v8048_v1 = vld [vmem:[#allocation5 + $0xce0] ss:$16 sps:$4 sm:$0xff]  }
 0x1a3   :  { %5064 = vmatprep.subr.bf16.mxu0 %v7964_v0  ;;  %v8053_v0 = vld [vmem:[#allocation5 + $0x8ec] ss:$16 sps:$4 sm:$0xff]  }
 0x1a5   :  { %5475 = vmatpush1.bf16.msra.mxu1 %v7965_v3  ;;  %v8056_v3 = vld [vmem:[#allocation5 + $0xd04] ss:$16 sps:$4 sm:$0xff]  }
 0x1a6   :  { %5065 = vmatpush1.bf16.msra.mxu0 %v7962_v2  ;;  %5476 = vmatprep.subr.bf16.mxu1 %v7973_v5  ;;  %v8051_v2 = vld [vmem:[#allocation5 + $0x8e8] ss:$16 sps:$4 sm:$0xff]   ;;  %v8054_v5 = vld [vmem:[#allocation5 + $0xd00] ss:$16 sps:$4 sm:$0xff]  }
 0x1a7   :  { %5066 = vmatprep.subr.bf16.mxu0 %v7970_v4  ;;  %v8059_v4 = vld [vmem:[#allocation5 + $0x90c] ss:$16 sps:$4 sm:$0xff]  }
 0x1a9   :  { %5477 = vmatpush1.bf16.msra.mxu1 %v7971_v9  ;;  %v8062_v9 = vld [vmem:[#allocation5 + $0xd24] ss:$16 sps:$4 sm:$0xff]  }
 0x1aa   :  { %5067 = vmatpush1.bf16.msra.mxu0 %v7968_v8  ;;  %5478 = vmatprep.subr.bf16.mxu1 %v7979_v11  ;;  %v8057_v8 = vld [vmem:[#allocation5 + $0x908] ss:$16 sps:$4 sm:$0xff]   ;;  %v8060_v11 = vld [vmem:[#allocation5 + $0xd20] ss:$16 sps:$4 sm:$0xff]  }
 0x1ab   :  { %5068 = vmatprep.subr.bf16.mxu0 %v7976_v10  ;;  %v8065_v10 = vld [vmem:[#allocation5 + $0x92c] ss:$16 sps:$4 sm:$0xff]  }
 0x1ad   :  { %5479 = vmatpush1.bf16.msra.mxu1 %v7977_v14  ;;  %v8068_v14 = vld [vmem:[#allocation5 + $0xd44] ss:$16 sps:$4 sm:$0xff]  }
 0x1ae   :  { %5069 = vmatpush1.bf16.msra.mxu0 %v7974_v12  ;;  %5480 = vmatprep.subr.bf16.mxu1 %v7985_v16  ;;  %v8063_v12 = vld [vmem:[#allocation5 + $0x928] ss:$16 sps:$4 sm:$0xff]   ;;  %v8066_v16 = vld [vmem:[#allocation5 + $0xd40] ss:$16 sps:$4 sm:$0xff]  }
 0x1af   :  { %5070 = vmatprep.subr.bf16.mxu0 %v7982_v15  ;;  %v8071_v15 = vld [vmem:[#allocation5 + $0x94c] ss:$16 sps:$4 sm:$0xff]  }
 0x1b1   :  { %5481 = vmatpush1.bf16.msra.mxu1 %v7983_v20  ;;  %v8074_v20 = vld [vmem:[#allocation5 + $0xd64] ss:$16 sps:$4 sm:$0xff]  }
 0x1b2   :  { %5071 = vmatpush1.bf16.msra.mxu0 %v7980_v17  ;;  %5482 = vmatprep.subr.bf16.mxu1 %v7991_v24  ;;  %v8069_v17 = vld [vmem:[#allocation5 + $0x948] ss:$16 sps:$4 sm:$0xff]   ;;  %v8072_v24 = vld [vmem:[#allocation5 + $0xd60] ss:$16 sps:$4 sm:$0xff]  }
 0x1b3   :  { %5072 = vmatprep.subr.bf16.mxu0 %v7988_v23  ;;  %v8077_v23 = vld [vmem:[#allocation5 + $0x96c] ss:$16 sps:$4 sm:$0xff]  }
 0x1b5   :  { %5483 = vmatpush1.bf16.msra.mxu1 %v7989_v26  ;;  %v8080_v26 = vld [vmem:[#allocation5 + $0xd84] ss:$16 sps:$4 sm:$0xff]  }
 0x1b6   :  { %5073 = vmatpush1.bf16.msra.mxu0 %v7986_v25  ;;  %5484 = vmatprep.subr.bf16.mxu1 %v7997_v28  ;;  %v8075_v25 = vld [vmem:[#allocation5 + $0x968] ss:$16 sps:$4 sm:$0xff]   ;;  %v8078_v28 = vld [vmem:[#allocation5 + $0xd80] ss:$16 sps:$4 sm:$0xff]  }
 0x1b7   :  { %5074 = vmatprep.subr.bf16.mxu0 %v7994_v18  ;;  %v8083_v18 = vld [vmem:[#allocation5 + $0x98c] ss:$16 sps:$4 sm:$0xff]  }
 0x1b9   :  { %5485 = vmatpush1.bf16.msra.mxu1 %v7995_v31  ;;  %v8086_v31 = vld [vmem:[#allocation5 + $0xda4] ss:$16 sps:$4 sm:$0xff]  }
 0x1ba   :  { %5075 = vmatpush1.bf16.msra.mxu0 %v7992_v30  ;;  %5486 = vmatprep.subr.bf16.mxu1 %v8003_v22  ;;  %v8081_v30 = vld [vmem:[#allocation5 + $0x988] ss:$16 sps:$4 sm:$0xff]   ;;  %v8084_v22 = vld [vmem:[#allocation5 + $0xda0] ss:$16 sps:$4 sm:$0xff]  }
 0x1bb   :  { %5076 = vmatprep.subr.bf16.mxu0 %v8000_v32  ;;  %v8089_v32 = vld [vmem:[#allocation5 + $0x9ac] ss:$16 sps:$4 sm:$0xff]  }
 0x1bd   :  { %5487 = vmatpush1.bf16.msra.mxu1 %v8001_v33  ;;  %v8092_v33 = vld [vmem:[#allocation5 + $0xdc4] ss:$16 sps:$4 sm:$0xff]  }
 0x1be   :  { %5077 = vmatpush1.bf16.msra.mxu0 %v7998_v51  ;;  %5497 = vmatprep.subr.bf16.mxu1 %v8011_v36  ;;  %v8087_v51 = vld [vmem:[#allocation5 + $0x9a8] ss:$16 sps:$4 sm:$0xff]   ;;  %v8090_v36 = vld [vmem:[#allocation5 + $0xdc0] ss:$16 sps:$4 sm:$0xff]  }
 0x1bf   :  { %5087 = vmatprep.subr.bf16.mxu0 %v8008_v35  ;;  %v8095_v35 = vld [vmem:[#allocation5 + $0x9cc] ss:$16 sps:$4 sm:$0xff]  }
 0x1c0   :  { %5489 = vmatmul.mubr.bf16.vlgmr.msra.gmra.mrb[4].mxu1 %v9162_v21  ;;  %v8029_v21 = vld [vmem:[#allocation5 + $0x86c] ss:$16 sps:$4 sm:$0xff]  }
 0x1c1   :  { %5079 = vmatmul.mubr.bf16.vlgmr.msra.gmra.mrb[0].mxu0 %v9196_v34  ;;  %5498 = vmatpush1.bf16.msra.mxu1 %v8009_v38  ;;  %v8098_v38 = vld [vmem:[#allocation5 + $0xde4] ss:$16 sps:$4 sm:$0xff]  }
 0x1c2   :  { %5088 = vmatpush1.bf16.msra.mxu0 %v8006_v13  ;;  %5499 = vmatprep.subr.bf16.mxu1 %v8017_v40  ;;  %v8093_v13 = vld [vmem:[#allocation5 + $0x9c8] ss:$16 sps:$4 sm:$0xff]   ;;  %v8096_v40 = vld [vmem:[#allocation5 + $0xde0] ss:$16 sps:$4 sm:$0xff]  }
 0x1c3   :  { %5089 = vmatprep.subr.bf16.mxu0 %v8014_v39  ;;  %5119 = vmatprep.mubr.bf16.mxu0 %v9200_v41  ;;  %v8101_v39 = vld [vmem:[#allocation5 + $0x9ec] ss:$16 sps:$4 sm:$0xff]  }
 0x1c4   :  { %5529 = vmatprep.mubr.bf16.mxu1 %v9168_v6  ;;  %v8033_v6 = vld [vmem:[#allocation5 + $0x888] ss:$16 sps:$4 sm:$0xff]  }
 0x1c5   :  { %5500 = vmatpush1.bf16.msra.mxu1 %v8015_v42  ;;  %v8106_v42 = vld [vmem:[#allocation5 + $0xe04] ss:$16 sps:$4 sm:$0xff]  }
 0x1c6   :  { %5090 = vmatpush1.bf16.msra.mxu0 %v8012_v29  ;;  %5501 = vmatprep.subr.bf16.mxu1 %v8023_v43  ;;  %v8099_v29 = vld [vmem:[#allocation5 + $0x9e8] ss:$16 sps:$4 sm:$0xff]  }
 0x1c7   :  { %5091 = vmatprep.subr.bf16.mxu0 %v8020_v19  ;;  %v8109_v19 = vld [vmem:[#allocation5 + $0xa0c] ss:$16 sps:$4 sm:$0xff]  }
 0x1c8   :  { %v9206_v43 = vld [vmem:[#allocation2 + $0x38] sm:$0xff] }
 0x1c9   :  { %5502 = vmatpush1.bf16.msra.mxu1 %v8021_v45  ;;  %v8104_v45 = vld [vmem:[#allocation5 + $0xe00] ss:$16 sps:$4 sm:$0xff]  }
 0x1ca   :  { %5092 = vmatpush1.bf16.msra.mxu0 %v8018_v44  ;;  %5503 = vmatprep.subr.bf16.mxu1 %v8029_v21  ;;  %v9210_v44 = vcombine.low %v9192_v37, %v9192_v37  ;;  %v8112_v21 = vld [vmem:[#allocation5 + $0xe24] ss:$16 sps:$4 sm:$0xff]   ;;  %v8110_v37 = vld [vmem:[#allocation5 + $0xe20] ss:$16 sps:$4 sm:$0xff]  }
 0x1cb   :  { %5093 = vmatprep.subr.bf16.mxu0 %v8026_v46  ;;  %v8107_v46 = vld [vmem:[#allocation5 + $0xa08] ss:$16 sps:$4 sm:$0xff]  }
 0x1cd   :  { %5504 = vmatpush1.bf16.msra.mxu1 %v8027_v48  ;;  %v9214_v48 = vcombine.high %v9206_v43, %v9206_v43 }
 0x1ce   :  { %5094 = vmatpush1.bf16.msra.mxu0 %v8024_v47  ;;  %5505 = vmatprep.subr.bf16.mxu1 %v8035_v53  ;;  %v8115_v47 = vld [vmem:[#allocation5 + $0xa2c] ss:$16 sps:$4 sm:$0xff]   ;;  %v8118_v53 = vld [vmem:[#allocation5 + $0xe44] ss:$16 sps:$4 sm:$0xff]  }
 0x1cf   :  { %5095 = vmatprep.subr.bf16.mxu0 %v8032_v52  ;;  %v8113_v52 = vld [vmem:[#allocation5 + $0xa28] ss:$16 sps:$4 sm:$0xff]  }
 0x1d1   :  { %5506 = vmatpush1.bf16.msra.mxu1 %v8033_v6  ;;  %v8116_v6 = vld [vmem:[#allocation5 + $0xe40] ss:$16 sps:$4 sm:$0xff]  }
 0x1d2   :  { %5096 = vmatpush1.bf16.msra.mxu0 %v8030_v54  ;;  %5507 = vmatprep.subr.bf16.mxu1 %v8041_v56  ;;  %v8121_v54 = vld [vmem:[#allocation5 + $0xa4c] ss:$16 sps:$4 sm:$0xff]   ;;  %v8124_v56 = vld [vmem:[#allocation5 + $0xe64] ss:$16 sps:$4 sm:$0xff]  }
 0x1d3   :  { %5097 = vmatprep.subr.bf16.mxu0 %v8038_v55  ;;  %v8119_v55 = vld [vmem:[#allocation5 + $0xa48] ss:$16 sps:$4 sm:$0xff]  }
 0x1d5   :  { %5508 = vmatpush1.bf16.msra.mxu1 %v8039_v58  ;;  %v8125_v58 = vld [vmem:[#allocation5 + $0xa68] ss:$16 sps:$4 sm:$0xff]  }
 0x1d6   :  { %5098 = vmatpush1.bf16.msra.mxu0 %v8036_v57  ;;  %5509 = vmatprep.subr.bf16.mxu1 %v8047_v60  ;;  %v8122_v57 = vld [vmem:[#allocation5 + $0xe60] ss:$16 sps:$4 sm:$0xff]   ;;  %v8133_v60 = vld [vmem:[#allocation5 + $0xa8c] ss:$16 sps:$4 sm:$0xff]  }
 0x1d7   :  { %5099 = vmatprep.subr.bf16.mxu0 %v8044_v59  ;;  %v8130_v59 = vld [vmem:[#allocation5 + $0xe84] ss:$16 sps:$4 sm:$0xff]  }
 0x1d9   :  { %5510 = vmatpush1.bf16.msra.mxu1 %v8045_v62  ;;  %v8136_v62 = vld [vmem:[#allocation5 + $0xea4] ss:$16 sps:$4 sm:$0xff]  }
 0x1da   :  { %5100 = vmatpush1.bf16.msra.mxu0 %v8042_v61  ;;  %5511 = vmatprep.subr.bf16.mxu1 %v8053_v0  ;;  %v8128_v61 = vld [vmem:[#allocation5 + $0xe80] ss:$16 sps:$4 sm:$0xff]  }
 0x1db   :  { %5101 = vmatprep.subr.bf16.mxu0 %v8050_v63  ;;  %v8139_v63 = vld [vmem:[#allocation5 + $0xaac] ss:$16 sps:$4 sm:$0xff]   ;;  %v8134_v0 = vld [vmem:[#allocation5 + $0xea0] ss:$16 sps:$4 sm:$0xff]  }
 0x1dd   :  { %5512 = vmatpush1.bf16.msra.mxu1 %v8051_v2  ;;  %v8142_v2 = vld [vmem:[#allocation5 + $0xec4] ss:$16 sps:$4 sm:$0xff]  }
 0x1de   :  { %5102 = vmatpush1.bf16.msra.mxu0 %v8048_v1  ;;  %5513 = vmatprep.subr.bf16.mxu1 %v8059_v4  ;;  %v8137_v1 = vld [vmem:[#allocation5 + $0xaa8] ss:$16 sps:$4 sm:$0xff]   ;;  %v8140_v4 = vld [vmem:[#allocation5 + $0xec0] ss:$16 sps:$4 sm:$0xff]  }
 0x1df   :  { %5103 = vmatprep.subr.bf16.mxu0 %v8056_v3  ;;  %v8145_v3 = vld [vmem:[#allocation5 + $0xacc] ss:$16 sps:$4 sm:$0xff]  }
 0x1e1   :  { %5514 = vmatpush1.bf16.msra.mxu1 %v8057_v8  ;;  %v8148_v8 = vld [vmem:[#allocation5 + $0xee4] ss:$16 sps:$4 sm:$0xff]  }
 0x1e2   :  { %5104 = vmatpush1.bf16.msra.mxu0 %v8054_v5  ;;  %5515 = vmatprep.subr.bf16.mxu1 %v8065_v10  ;;  %v8143_v5 = vld [vmem:[#allocation5 + $0xac8] ss:$16 sps:$4 sm:$0xff]   ;;  %v8146_v10 = vld [vmem:[#allocation5 + $0xee0] ss:$16 sps:$4 sm:$0xff]  }
 0x1e3   :  { %5105 = vmatprep.subr.bf16.mxu0 %v8062_v9  ;;  %v8151_v9 = vld [vmem:[#allocation5 + $0xaec] ss:$16 sps:$4 sm:$0xff]  }
 0x1e5   :  { %5516 = vmatpush1.bf16.msra.mxu1 %v8063_v12  ;;  %v8154_v12 = vld [vmem:[#allocation5 + $0xf04] ss:$16 sps:$4 sm:$0xff]  }
 0x1e6   :  { %5106 = vmatpush1.bf16.msra.mxu0 %v8060_v11  ;;  %5517 = vmatprep.subr.bf16.mxu1 %v8071_v15  ;;  %v8149_v11 = vld [vmem:[#allocation5 + $0xae8] ss:$16 sps:$4 sm:$0xff]   ;;  %v8152_v15 = vld [vmem:[#allocation5 + $0xf00] ss:$16 sps:$4 sm:$0xff]  }
 0x1e7   :  { %5107 = vmatprep.subr.bf16.mxu0 %v8068_v14  ;;  %v8157_v14 = vld [vmem:[#allocation5 + $0xb0c] ss:$16 sps:$4 sm:$0xff]  }
 0x1e9   :  { %5518 = vmatpush1.bf16.msra.mxu1 %v8069_v17  ;;  %v8160_v17 = vld [vmem:[#allocation5 + $0xf24] ss:$16 sps:$4 sm:$0xff]  }
 0x1ea   :  { %5108 = vmatpush1.bf16.msra.mxu0 %v8066_v16  ;;  %5519 = vmatprep.subr.bf16.mxu1 %v8077_v23  ;;  %v8155_v16 = vld [vmem:[#allocation5 + $0xb08] ss:$16 sps:$4 sm:$0xff]   ;;  %v8158_v23 = vld [vmem:[#allocation5 + $0xf20] ss:$16 sps:$4 sm:$0xff]  }
 0x1eb   :  { %5109 = vmatprep.subr.bf16.mxu0 %v8074_v20  ;;  %v8163_v20 = vld [vmem:[#allocation5 + $0xb2c] ss:$16 sps:$4 sm:$0xff]  }
 0x1ed   :  { %5520 = vmatpush1.bf16.msra.mxu1 %v8075_v25  ;;  %v8166_v25 = vld [vmem:[#allocation5 + $0xf44] ss:$16 sps:$4 sm:$0xff]  }
 0x1ee   :  { %5110 = vmatpush1.bf16.msra.mxu0 %v8072_v24  ;;  %5521 = vmatprep.subr.bf16.mxu1 %v8083_v18  ;;  %v8161_v24 = vld [vmem:[#allocation5 + $0xb28] ss:$16 sps:$4 sm:$0xff]   ;;  %v8164_v18 = vld [vmem:[#allocation5 + $0xf40] ss:$16 sps:$4 sm:$0xff]  }
 0x1ef   :  { %5111 = vmatprep.subr.bf16.mxu0 %v8080_v26  ;;  %v8169_v26 = vld [vmem:[#allocation5 + $0xb4c] ss:$16 sps:$4 sm:$0xff]  }
 0x1f1   :  { %5522 = vmatpush1.bf16.msra.mxu1 %v8081_v30  ;;  %v8172_v30 = vld [vmem:[#allocation5 + $0xf64] ss:$16 sps:$4 sm:$0xff]  }
 0x1f2   :  { %5112 = vmatpush1.bf16.msra.mxu0 %v8078_v28  ;;  %5523 = vmatprep.subr.bf16.mxu1 %v8089_v32  ;;  %v8167_v28 = vld [vmem:[#allocation5 + $0xb48] ss:$16 sps:$4 sm:$0xff]   ;;  %v8170_v32 = vld [vmem:[#allocation5 + $0xf60] ss:$16 sps:$4 sm:$0xff]  }
 0x1f3   :  { %5113 = vmatprep.subr.bf16.mxu0 %v8086_v31  ;;  %v8175_v31 = vld [vmem:[#allocation5 + $0xb6c] ss:$16 sps:$4 sm:$0xff]  }
 0x1f5   :  { %5524 = vmatpush1.bf16.msra.mxu1 %v8087_v51  ;;  %v8178_v51 = vld [vmem:[#allocation5 + $0xf84] ss:$16 sps:$4 sm:$0xff]  }
 0x1f6   :  { %5114 = vmatpush1.bf16.msra.mxu0 %v8084_v22  ;;  %5525 = vmatprep.subr.bf16.mxu1 %v8095_v35  ;;  %v8173_v22 = vld [vmem:[#allocation5 + $0xb68] ss:$16 sps:$4 sm:$0xff]   ;;  %v8176_v35 = vld [vmem:[#allocation5 + $0xf80] ss:$16 sps:$4 sm:$0xff]  }
 0x1f7   :  { %5115 = vmatprep.subr.bf16.mxu0 %v8092_v33  ;;  %v8181_v33 = vld [vmem:[#allocation5 + $0xb8c] ss:$16 sps:$4 sm:$0xff]  }
 0x1f9   :  { %5526 = vmatpush1.bf16.msra.mxu1 %v8093_v13  ;;  %v8184_v13 = vld [vmem:[#allocation5 + $0xfa4] ss:$16 sps:$4 sm:$0xff]  }
 0x1fa   :  { %5116 = vmatpush1.bf16.msra.mxu0 %v8090_v36  ;;  %5527 = vmatprep.subr.bf16.mxu1 %v8101_v39  ;;  %v8179_v36 = vld [vmem:[#allocation5 + $0xb88] ss:$16 sps:$4 sm:$0xff]   ;;  %v8182_v39 = vld [vmem:[#allocation5 + $0xfa0] ss:$16 sps:$4 sm:$0xff]  }
 0x1fb   :  { %5117 = vmatprep.subr.bf16.mxu0 %v8098_v38  ;;  %v8187_v38 = vld [vmem:[#allocation5 + $0xbac] ss:$16 sps:$4 sm:$0xff]  }
 0x1fd   :  { %5528 = vmatpush1.bf16.msra.mxu1 %v8099_v29  ;;  %v8190_v29 = vld [vmem:[#allocation5 + $0xfc4] ss:$16 sps:$4 sm:$0xff]  }
 0x1fe   :  { %5118 = vmatpush1.bf16.msra.mxu0 %v8096_v40  ;;  %5538 = vmatprep.subr.bf16.mxu1 %v8109_v19  ;;  %v8185_v40 = vld [vmem:[#allocation5 + $0xba8] ss:$16 sps:$4 sm:$0xff]   ;;  %v8188_v19 = vld [vmem:[#allocation5 + $0xfc0] ss:$16 sps:$4 sm:$0xff]  }
 0x1ff   :  { %5128 = vmatprep.subr.bf16.mxu0 %v8106_v42  ;;  %v8193_v42 = vld [vmem:[#allocation5 + $0xbcc] ss:$16 sps:$4 sm:$0xff]  }
 0x200   :  { %5530 = vmatmul.mubr.bf16.vlgmr.msra.gmra.mrb[4].mxu1 %v9176_v27  ;;  %v8127_v27 = vld [vmem:[#allocation5 + $0xa6c] ss:$16 sps:$4 sm:$0xff]  }
 0x201   :  { %5120 = vmatmul.mubr.bf16.vlgmr.msra.gmra.mrb[0].mxu0 %v9210_v44  ;;  %5539 = vmatpush1.bf16.msra.mxu1 %v8107_v46  ;;  %v8196_v46 = vld [vmem:[#allocation5 + $0xfe4] ss:$16 sps:$4 sm:$0xff]  }
 0x202   :  { %5129 = vmatpush1.bf16.msra.mxu0 %v8104_v45  ;;  %5540 = vmatprep.subr.bf16.mxu1 %v8115_v47  ;;  %v8191_v45 = vld [vmem:[#allocation5 + $0xbc8] ss:$16 sps:$4 sm:$0xff]   ;;  %v8194_v47 = vld [vmem:[#allocation5 + $0xfe0] ss:$16 sps:$4 sm:$0xff]  }
 0x203   :  { %5130 = vmatprep.subr.bf16.mxu0 %v8112_v21  ;;  %5160 = vmatprep.mubr.bf16.mxu0 %v9214_v48  ;;  %v8199_v21 = vld [vmem:[#allocation5 + $0xbec] ss:$16 sps:$4 sm:$0xff]  }
 0x204   :  { %5570 = vmatprep.mubr.bf16.mxu1 %v9182_v7  ;;  %v8131_v7 = vld [vmem:[#allocation5 + $0xa88] ss:$16 sps:$4 sm:$0xff]  }
 0x205   :  { %5541 = vmatpush1.bf16.msra.mxu1 %v8113_v52  ;;  %v8204_v52 = vld [vmem:[#allocation5 + $0x1004] ss:$16 sps:$4 sm:$0xff]  }
 0x206   :  { %5131 = vmatpush1.bf16.msra.mxu0 %v8110_v37  ;;  %5542 = vmatprep.subr.bf16.mxu1 %v8121_v54  ;;  %v8197_v37 = vld [vmem:[#allocation5 + $0xbe8] ss:$16 sps:$4 sm:$0xff]   ;;  %v9220_v54 = vld [vmem:[#allocation2 + $0x40] sm:$0xff] }
 0x207   :  { %5132 = vmatprep.subr.bf16.mxu0 %v8118_v53  ;;  %v8207_v53 = vld [vmem:[#allocation5 + $0xc0c] ss:$16 sps:$4 sm:$0xff]  }
 0x209   :  { %5543 = vmatpush1.bf16.msra.mxu1 %v8119_v55  ;;  %v8202_v55 = vld [vmem:[#allocation5 + $0x1000] ss:$16 sps:$4 sm:$0xff]  }
 0x20a   :  { %5133 = vmatpush1.bf16.msra.mxu0 %v8116_v6  ;;  %5544 = vmatprep.subr.bf16.mxu1 %v8127_v27  ;;  %v9224_v6 = vcombine.low %v9206_v43, %v9206_v43  ;;  %v8210_v27 = vld [vmem:[#allocation5 + $0x1024] ss:$16 sps:$4 sm:$0xff]   ;;  %v8208_v43 = vld [vmem:[#allocation5 + $0x1020] ss:$16 sps:$4 sm:$0xff]  }
 0x20b   :  { %5134 = vmatprep.subr.bf16.mxu0 %v8124_v56  ;;  %v8205_v56 = vld [vmem:[#allocation5 + $0xc08] ss:$16 sps:$4 sm:$0xff]  }
 0x20d   :  { %5545 = vmatpush1.bf16.msra.mxu1 %v8125_v58  ;;  %v9228_v58 = vcombine.high %v9220_v54, %v9220_v54 }
 0x20e   :  { %5135 = vmatpush1.bf16.msra.mxu0 %v8122_v57  ;;  %5546 = vmatprep.subr.bf16.mxu1 %v8133_v60  ;;  %v8213_v57 = vld [vmem:[#allocation5 + $0xc2c] ss:$16 sps:$4 sm:$0xff]   ;;  %v8216_v60 = vld [vmem:[#allocation5 + $0x1044] ss:$16 sps:$4 sm:$0xff]  }
 0x20f   :  { %5136 = vmatprep.subr.bf16.mxu0 %v8130_v59  ;;  %v8211_v59 = vld [vmem:[#allocation5 + $0xc28] ss:$16 sps:$4 sm:$0xff]  }
 0x211   :  { %5547 = vmatpush1.bf16.msra.mxu1 %v8131_v7  ;;  %v8214_v7 = vld [vmem:[#allocation5 + $0x1040] ss:$16 sps:$4 sm:$0xff]  }
 0x212   :  { %5137 = vmatpush1.bf16.msra.mxu0 %v8128_v61  ;;  %5548 = vmatprep.subr.bf16.mxu1 %v8139_v63  ;;  %v8219_v61 = vld [vmem:[#allocation5 + $0xc4c] ss:$16 sps:$4 sm:$0xff]   ;;  %v8222_v63 = vld [vmem:[#allocation5 + $0x1064] ss:$16 sps:$4 sm:$0xff]  }
 0x213   :  { %5138 = vmatprep.subr.bf16.mxu0 %v8136_v62  ;;  %v8217_v62 = vld [vmem:[#allocation5 + $0xc48] ss:$16 sps:$4 sm:$0xff]  }
 0x215   :  { %5549 = vmatpush1.bf16.msra.mxu1 %v8137_v1  ;;  %v8223_v1 = vld [vmem:[#allocation5 + $0xc68] ss:$16 sps:$4 sm:$0xff]  }
 0x216   :  { %5139 = vmatpush1.bf16.msra.mxu0 %v8134_v0  ;;  %5550 = vmatprep.subr.bf16.mxu1 %v8145_v3  ;;  %v8220_v0 = vld [vmem:[#allocation5 + $0x1060] ss:$16 sps:$4 sm:$0xff]   ;;  %v8231_v3 = vld [vmem:[#allocation5 + $0xc8c] ss:$16 sps:$4 sm:$0xff]  }
 0x217   :  { %5140 = vmatprep.subr.bf16.mxu0 %v8142_v2  ;;  %v8228_v2 = vld [vmem:[#allocation5 + $0x1084] ss:$16 sps:$4 sm:$0xff]  }
 0x219   :  { %5551 = vmatpush1.bf16.msra.mxu1 %v8143_v5  ;;  %v8234_v5 = vld [vmem:[#allocation5 + $0x10a4] ss:$16 sps:$4 sm:$0xff]  }
 0x21a   :  { %5141 = vmatpush1.bf16.msra.mxu0 %v8140_v4  ;;  %5552 = vmatprep.subr.bf16.mxu1 %v8151_v9  ;;  %v8226_v4 = vld [vmem:[#allocation5 + $0x1080] ss:$16 sps:$4 sm:$0xff]  }
 0x21b   :  { %5142 = vmatprep.subr.bf16.mxu0 %v8148_v8  ;;  %v8237_v8 = vld [vmem:[#allocation5 + $0xcac] ss:$16 sps:$4 sm:$0xff]   ;;  %v8232_v9 = vld [vmem:[#allocation5 + $0x10a0] ss:$16 sps:$4 sm:$0xff]  }
 0x21d   :  { %5553 = vmatpush1.bf16.msra.mxu1 %v8149_v11  ;;  %v8240_v11 = vld [vmem:[#allocation5 + $0x10c4] ss:$16 sps:$4 sm:$0xff]  }
 0x21e   :  { %5143 = vmatpush1.bf16.msra.mxu0 %v8146_v10  ;;  %5554 = vmatprep.subr.bf16.mxu1 %v8157_v14  ;;  %v8235_v10 = vld [vmem:[#allocation5 + $0xca8] ss:$16 sps:$4 sm:$0xff]   ;;  %v8238_v14 = vld [vmem:[#allocation5 + $0x10c0] ss:$16 sps:$4 sm:$0xff]  }
 0x21f   :  { %5144 = vmatprep.subr.bf16.mxu0 %v8154_v12  ;;  %v8243_v12 = vld [vmem:[#allocation5 + $0xccc] ss:$16 sps:$4 sm:$0xff]  }
 0x221   :  { %5555 = vmatpush1.bf16.msra.mxu1 %v8155_v16  ;;  %v8246_v16 = vld [vmem:[#allocation5 + $0x10e4] ss:$16 sps:$4 sm:$0xff]  }
 0x222   :  { %5145 = vmatpush1.bf16.msra.mxu0 %v8152_v15  ;;  %5556 = vmatprep.subr.bf16.mxu1 %v8163_v20  ;;  %v8241_v15 = vld [vmem:[#allocation5 + $0xcc8] ss:$16 sps:$4 sm:$0xff]   ;;  %v8244_v20 = vld [vmem:[#allocation5 + $0x10e0] ss:$16 sps:$4 sm:$0xff]  }
 0x223   :  { %5146 = vmatprep.subr.bf16.mxu0 %v8160_v17  ;;  %v8249_v17 = vld [vmem:[#allocation5 + $0xcec] ss:$16 sps:$4 sm:$0xff]  }
 0x225   :  { %5557 = vmatpush1.bf16.msra.mxu1 %v8161_v24  ;;  %v8252_v24 = vld [vmem:[#allocation5 + $0x1104] ss:$16 sps:$4 sm:$0xff]  }
 0x226   :  { %5147 = vmatpush1.bf16.msra.mxu0 %v8158_v23  ;;  %5558 = vmatprep.subr.bf16.mxu1 %v8169_v26  ;;  %v8247_v23 = vld [vmem:[#allocation5 + $0xce8] ss:$16 sps:$4 sm:$0xff]   ;;  %v8250_v26 = vld [vmem:[#allocation5 + $0x1100] ss:$16 sps:$4 sm:$0xff]  }
 0x227   :  { %5148 = vmatprep.subr.bf16.mxu0 %v8166_v25  ;;  %v8255_v25 = vld [vmem:[#allocation5 + $0xd0c] ss:$16 sps:$4 sm:$0xff]  }
 0x229   :  { %5559 = vmatpush1.bf16.msra.mxu1 %v8167_v28  ;;  %v8258_v28 = vld [vmem:[#allocation5 + $0x1124] ss:$16 sps:$4 sm:$0xff]  }
 0x22a   :  { %5149 = vmatpush1.bf16.msra.mxu0 %v8164_v18  ;;  %5560 = vmatprep.subr.bf16.mxu1 %v8175_v31  ;;  %v8253_v18 = vld [vmem:[#allocation5 + $0xd08] ss:$16 sps:$4 sm:$0xff]   ;;  %v8256_v31 = vld [vmem:[#allocation5 + $0x1120] ss:$16 sps:$4 sm:$0xff]  }
 0x22b   :  { %5150 = vmatprep.subr.bf16.mxu0 %v8172_v30  ;;  %v8261_v30 = vld [vmem:[#allocation5 + $0xd2c] ss:$16 sps:$4 sm:$0xff]  }
 0x22d   :  { %5561 = vmatpush1.bf16.msra.mxu1 %v8173_v22  ;;  %v8264_v22 = vld [vmem:[#allocation5 + $0x1144] ss:$16 sps:$4 sm:$0xff]  }
 0x22e   :  { %5151 = vmatpush1.bf16.msra.mxu0 %v8170_v32  ;;  %5562 = vmatprep.subr.bf16.mxu1 %v8181_v33  ;;  %v8259_v32 = vld [vmem:[#allocation5 + $0xd28] ss:$16 sps:$4 sm:$0xff]   ;;  %v8262_v33 = vld [vmem:[#allocation5 + $0x1140] ss:$16 sps:$4 sm:$0xff]  }
 0x22f   :  { %5152 = vmatprep.subr.bf16.mxu0 %v8178_v51  ;;  %v8267_v51 = vld [vmem:[#allocation5 + $0xd4c] ss:$16 sps:$4 sm:$0xff]  }
 0x231   :  { %5563 = vmatpush1.bf16.msra.mxu1 %v8179_v36  ;;  %v8270_v36 = vld [vmem:[#allocation5 + $0x1164] ss:$16 sps:$4 sm:$0xff]  }
 0x232   :  { %5153 = vmatpush1.bf16.msra.mxu0 %v8176_v35  ;;  %5564 = vmatprep.subr.bf16.mxu1 %v8187_v38  ;;  %v8265_v35 = vld [vmem:[#allocation5 + $0xd48] ss:$16 sps:$4 sm:$0xff]   ;;  %v8268_v38 = vld [vmem:[#allocation5 + $0x1160] ss:$16 sps:$4 sm:$0xff]  }
 0x233   :  { %5154 = vmatprep.subr.bf16.mxu0 %v8184_v13  ;;  %v8273_v13 = vld [vmem:[#allocation5 + $0xd6c] ss:$16 sps:$4 sm:$0xff]  }
 0x235   :  { %5565 = vmatpush1.bf16.msra.mxu1 %v8185_v40  ;;  %v8276_v40 = vld [vmem:[#allocation5 + $0x1184] ss:$16 sps:$4 sm:$0xff]  }
 0x236   :  { %5155 = vmatpush1.bf16.msra.mxu0 %v8182_v39  ;;  %5566 = vmatprep.subr.bf16.mxu1 %v8193_v42  ;;  %v8271_v39 = vld [vmem:[#allocation5 + $0xd68] ss:$16 sps:$4 sm:$0xff]   ;;  %v8274_v42 = vld [vmem:[#allocation5 + $0x1180] ss:$16 sps:$4 sm:$0xff]  }
 0x237   :  { %5156 = vmatprep.subr.bf16.mxu0 %v8190_v29  ;;  %v8279_v29 = vld [vmem:[#allocation5 + $0xd8c] ss:$16 sps:$4 sm:$0xff]  }
 0x239   :  { %5567 = vmatpush1.bf16.msra.mxu1 %v8191_v45  ;;  %v8282_v45 = vld [vmem:[#allocation5 + $0x11a4] ss:$16 sps:$4 sm:$0xff]  }
 0x23a   :  { %5157 = vmatpush1.bf16.msra.mxu0 %v8188_v19  ;;  %5568 = vmatprep.subr.bf16.mxu1 %v8199_v21  ;;  %v8277_v19 = vld [vmem:[#allocation5 + $0xd88] ss:$16 sps:$4 sm:$0xff]   ;;  %v8280_v21 = vld [vmem:[#allocation5 + $0x11a0] ss:$16 sps:$4 sm:$0xff]  }
 0x23b   :  { %5158 = vmatprep.subr.bf16.mxu0 %v8196_v46  ;;  %v8285_v46 = vld [vmem:[#allocation5 + $0xdac] ss:$16 sps:$4 sm:$0xff]  }
 0x23d   :  { %5569 = vmatpush1.bf16.msra.mxu1 %v8197_v37  ;;  %v8288_v37 = vld [vmem:[#allocation5 + $0x11c4] ss:$16 sps:$4 sm:$0xff]  }
 0x23e   :  { %5159 = vmatpush1.bf16.msra.mxu0 %v8194_v47  ;;  %5579 = vmatprep.subr.bf16.mxu1 %v8207_v53  ;;  %v8283_v47 = vld [vmem:[#allocation5 + $0xda8] ss:$16 sps:$4 sm:$0xff]   ;;  %v8286_v53 = vld [vmem:[#allocation5 + $0x11c0] ss:$16 sps:$4 sm:$0xff]  }
 0x23f   :  { %5169 = vmatprep.subr.bf16.mxu0 %v8204_v52  ;;  %v8291_v52 = vld [vmem:[#allocation5 + $0xdcc] ss:$16 sps:$4 sm:$0xff]  }
 0x240   :  { %5571 = vmatmul.mubr.bf16.vlgmr.msra.gmra.mrb[4].mxu1 %v9196_v34  ;;  %v8225_v34 = vld [vmem:[#allocation5 + $0xc6c] ss:$16 sps:$4 sm:$0xff]  }
 0x241   :  { %5161 = vmatmul.mubr.bf16.vlgmr.msra.gmra.mrb[0].mxu0 %v9224_v6  ;;  %5580 = vmatpush1.bf16.msra.mxu1 %v8205_v56  ;;  %v8294_v56 = vld [vmem:[#allocation5 + $0x11e4] ss:$16 sps:$4 sm:$0xff]  }
 0x242   :  { %5170 = vmatpush1.bf16.msra.mxu0 %v8202_v55  ;;  %5581 = vmatprep.subr.bf16.mxu1 %v8213_v57  ;;  %v8289_v55 = vld [vmem:[#allocation5 + $0xdc8] ss:$16 sps:$4 sm:$0xff]   ;;  %v8292_v57 = vld [vmem:[#allocation5 + $0x11e0] ss:$16 sps:$4 sm:$0xff]  }
 0x243   :  { %5171 = vmatprep.subr.bf16.mxu0 %v8210_v27  ;;  %5201 = vmatprep.mubr.bf16.mxu0 %v9228_v58  ;;  %v8297_v27 = vld [vmem:[#allocation5 + $0xdec] ss:$16 sps:$4 sm:$0xff]  }
 0x244   :  { %5611 = vmatprep.mubr.bf16.mxu1 %v9200_v41  ;;  %v8229_v41 = vld [vmem:[#allocation5 + $0xc88] ss:$16 sps:$4 sm:$0xff]  }
 0x245   :  { %5582 = vmatpush1.bf16.msra.mxu1 %v8211_v59  ;;  %v8302_v59 = vld [vmem:[#allocation5 + $0x1204] ss:$16 sps:$4 sm:$0xff]  }
 0x246   :  { %5172 = vmatpush1.bf16.msra.mxu0 %v8208_v43  ;;  %5583 = vmatprep.subr.bf16.mxu1 %v8219_v61  ;;  %v8295_v43 = vld [vmem:[#allocation5 + $0xde8] ss:$16 sps:$4 sm:$0xff]   ;;  %v9236_v61 = vcombine.low %v9220_v54, %v9220_v54  ;;  %v8306_v54 = vld [vmem:[#allocation5 + $0x1220] ss:$16 sps:$4 sm:$0xff]  }
 0x247   :  { %5173 = vmatprep.subr.bf16.mxu0 %v8216_v60  ;;  %v8305_v60 = vld [vmem:[#allocation5 + $0xe0c] ss:$16 sps:$4 sm:$0xff]  }
 0x249   :  { %5584 = vmatpush1.bf16.msra.mxu1 %v8217_v62  ;;  %v8300_v62 = vld [vmem:[#allocation5 + $0x1200] ss:$16 sps:$4 sm:$0xff]  }
 0x24a   :  { %5174 = vmatpush1.bf16.msra.mxu0 %v8214_v7  ;;  %5585 = vmatprep.subr.bf16.mxu1 %v8225_v34  ;;  %v9238_v7 = vld [vmem:[#allocation2 + $0x48] sm:$0xff]  ;;  %v8308_v34 = vld [vmem:[#allocation5 + $0x1224] ss:$16 sps:$4 sm:$0xff]  }
 0x24b   :  { %5175 = vmatprep.subr.bf16.mxu0 %v8222_v63  ;;  %v8303_v63 = vld [vmem:[#allocation5 + $0xe08] ss:$16 sps:$4 sm:$0xff]  }
 0x24d   :  { %5586 = vmatpush1.bf16.msra.mxu1 %v8223_v1  ;;  %v9242_v1 = vcombine.high %v9238_v7, %v9238_v7 }
 0x24e   :  { %5176 = vmatpush1.bf16.msra.mxu0 %v8220_v0  ;;  %5587 = vmatprep.subr.bf16.mxu1 %v8231_v3  ;;  %v8311_v0 = vld [vmem:[#allocation5 + $0xe2c] ss:$16 sps:$4 sm:$0xff]   ;;  %v8314_v3 = vld [vmem:[#allocation5 + $0x1244] ss:$16 sps:$4 sm:$0xff]  }
 0x24f   :  { %5177 = vmatprep.subr.bf16.mxu0 %v8228_v2  ;;  %v8309_v2 = vld [vmem:[#allocation5 + $0xe28] ss:$16 sps:$4 sm:$0xff]  }
 0x251   :  { %5588 = vmatpush1.bf16.msra.mxu1 %v8229_v41  ;;  %v8312_v41 = vld [vmem:[#allocation5 + $0x1240] ss:$16 sps:$4 sm:$0xff]  }
 0x252   :  { %5178 = vmatpush1.bf16.msra.mxu0 %v8226_v4  ;;  %5589 = vmatprep.subr.bf16.mxu1 %v8237_v8  ;;  %v8317_v4 = vld [vmem:[#allocation5 + $0xe4c] ss:$16 sps:$4 sm:$0xff]   ;;  %v8320_v8 = vld [vmem:[#allocation5 + $0x1264] ss:$16 sps:$4 sm:$0xff]  }
 0x253   :  { %5179 = vmatprep.subr.bf16.mxu0 %v8234_v5  ;;  %v8315_v5 = vld [vmem:[#allocation5 + $0xe48] ss:$16 sps:$4 sm:$0xff]  }
 0x255   :  { %5590 = vmatpush1.bf16.msra.mxu1 %v8235_v10  ;;  %v8321_v10 = vld [vmem:[#allocation5 + $0xe68] ss:$16 sps:$4 sm:$0xff]  }
 0x256   :  { %5180 = vmatpush1.bf16.msra.mxu0 %v8232_v9  ;;  %5591 = vmatprep.subr.bf16.mxu1 %v8243_v12  ;;  %v8318_v9 = vld [vmem:[#allocation5 + $0x1260] ss:$16 sps:$4 sm:$0xff]   ;;  %v8329_v12 = vld [vmem:[#allocation5 + $0xe8c] ss:$16 sps:$4 sm:$0xff]  }
 0x257   :  { %5181 = vmatprep.subr.bf16.mxu0 %v8240_v11  ;;  %v8326_v11 = vld [vmem:[#allocation5 + $0x1284] ss:$16 sps:$4 sm:$0xff]  }
 0x259   :  { %5592 = vmatpush1.bf16.msra.mxu1 %v8241_v15  ;;  %v8332_v15 = vld [vmem:[#allocation5 + $0x12a4] ss:$16 sps:$4 sm:$0xff]  }
 0x25a   :  { %5182 = vmatpush1.bf16.msra.mxu0 %v8238_v14  ;;  %5593 = vmatprep.subr.bf16.mxu1 %v8249_v17  ;;  %v8324_v14 = vld [vmem:[#allocation5 + $0x1280] ss:$16 sps:$4 sm:$0xff]  }
 0x25b   :  { %5183 = vmatprep.subr.bf16.mxu0 %v8246_v16  ;;  %v8335_v16 = vld [vmem:[#allocation5 + $0xeac] ss:$16 sps:$4 sm:$0xff]   ;;  %v8330_v17 = vld [vmem:[#allocation5 + $0x12a0] ss:$16 sps:$4 sm:$0xff]  }
 0x25d   :  { %5594 = vmatpush1.bf16.msra.mxu1 %v8247_v23  ;;  %v8338_v23 = vld [vmem:[#allocation5 + $0x12c4] ss:$16 sps:$4 sm:$0xff]  }
 0x25e   :  { %5184 = vmatpush1.bf16.msra.mxu0 %v8244_v20  ;;  %5595 = vmatprep.subr.bf16.mxu1 %v8255_v25  ;;  %v8333_v20 = vld [vmem:[#allocation5 + $0xea8] ss:$16 sps:$4 sm:$0xff]   ;;  %v8336_v25 = vld [vmem:[#allocation5 + $0x12c0] ss:$16 sps:$4 sm:$0xff]  }
 0x25f   :  { %5185 = vmatprep.subr.bf16.mxu0 %v8252_v24  ;;  %v8341_v24 = vld [vmem:[#allocation5 + $0xecc] ss:$16 sps:$4 sm:$0xff]  }
 0x261   :  { %5596 = vmatpush1.bf16.msra.mxu1 %v8253_v18  ;;  %v8344_v18 = vld [vmem:[#allocation5 + $0x12e4] ss:$16 sps:$4 sm:$0xff]  }
 0x262   :  { %5186 = vmatpush1.bf16.msra.mxu0 %v8250_v26  ;;  %5597 = vmatprep.subr.bf16.mxu1 %v8261_v30  ;;  %v8339_v26 = vld [vmem:[#allocation5 + $0xec8] ss:$16 sps:$4 sm:$0xff]   ;;  %v8342_v30 = vld [vmem:[#allocation5 + $0x12e0] ss:$16 sps:$4 sm:$0xff]  }
 0x263   :  { %5187 = vmatprep.subr.bf16.mxu0 %v8258_v28  ;;  %v8347_v28 = vld [vmem:[#allocation5 + $0xeec] ss:$16 sps:$4 sm:$0xff]  }
 0x265   :  { %5598 = vmatpush1.bf16.msra.mxu1 %v8259_v32  ;;  %v8350_v32 = vld [vmem:[#allocation5 + $0x1304] ss:$16 sps:$4 sm:$0xff]  }
 0x266   :  { %5188 = vmatpush1.bf16.msra.mxu0 %v8256_v31  ;;  %5599 = vmatprep.subr.bf16.mxu1 %v8267_v51  ;;  %v8345_v31 = vld [vmem:[#allocation5 + $0xee8] ss:$16 sps:$4 sm:$0xff]   ;;  %v8348_v51 = vld [vmem:[#allocation5 + $0x1300] ss:$16 sps:$4 sm:$0xff]  }
 0x267   :  { %5189 = vmatprep.subr.bf16.mxu0 %v8264_v22  ;;  %v8353_v22 = vld [vmem:[#allocation5 + $0xf0c] ss:$16 sps:$4 sm:$0xff]  }
 0x269   :  { %5600 = vmatpush1.bf16.msra.mxu1 %v8265_v35  ;;  %v8356_v35 = vld [vmem:[#allocation5 + $0x1324] ss:$16 sps:$4 sm:$0xff]  }
 0x26a   :  { %5190 = vmatpush1.bf16.msra.mxu0 %v8262_v33  ;;  %5601 = vmatprep.subr.bf16.mxu1 %v8273_v13  ;;  %v8351_v33 = vld [vmem:[#allocation5 + $0xf08] ss:$16 sps:$4 sm:$0xff]   ;;  %v8354_v13 = vld [vmem:[#allocation5 + $0x1320] ss:$16 sps:$4 sm:$0xff]  }
 0x26b   :  { %5191 = vmatprep.subr.bf16.mxu0 %v8270_v36  ;;  %v8359_v36 = vld [vmem:[#allocation5 + $0xf2c] ss:$16 sps:$4 sm:$0xff]  }
 0x26d   :  { %5602 = vmatpush1.bf16.msra.mxu1 %v8271_v39  ;;  %v8362_v39 = vld [vmem:[#allocation5 + $0x1344] ss:$16 sps:$4 sm:$0xff]  }
 0x26e   :  { %5192 = vmatpush1.bf16.msra.mxu0 %v8268_v38  ;;  %5603 = vmatprep.subr.bf16.mxu1 %v8279_v29  ;;  %v8357_v38 = vld [vmem:[#allocation5 + $0xf28] ss:$16 sps:$4 sm:$0xff]   ;;  %v8360_v29 = vld [vmem:[#allocation5 + $0x1340] ss:$16 sps:$4 sm:$0xff]  }
 0x26f   :  { %5193 = vmatprep.subr.bf16.mxu0 %v8276_v40  ;;  %v8365_v40 = vld [vmem:[#allocation5 + $0xf4c] ss:$16 sps:$4 sm:$0xff]  }
 0x271   :  { %5604 = vmatpush1.bf16.msra.mxu1 %v8277_v19  ;;  %v8368_v19 = vld [vmem:[#allocation5 + $0x1364] ss:$16 sps:$4 sm:$0xff]  }
 0x272   :  { %5194 = vmatpush1.bf16.msra.mxu0 %v8274_v42  ;;  %5605 = vmatprep.subr.bf16.mxu1 %v8285_v46  ;;  %v8363_v42 = vld [vmem:[#allocation5 + $0xf48] ss:$16 sps:$4 sm:$0xff]   ;;  %v8366_v46 = vld [vmem:[#allocation5 + $0x1360] ss:$16 sps:$4 sm:$0xff]  }
 0x273   :  { %5195 = vmatprep.subr.bf16.mxu0 %v8282_v45  ;;  %v8371_v45 = vld [vmem:[#allocation5 + $0xf6c] ss:$16 sps:$4 sm:$0xff]  }
 0x275   :  { %5606 = vmatpush1.bf16.msra.mxu1 %v8283_v47  ;;  %v8374_v47 = vld [vmem:[#allocation5 + $0x1384] ss:$16 sps:$4 sm:$0xff]  }
 0x276   :  { %5196 = vmatpush1.bf16.msra.mxu0 %v8280_v21  ;;  %5607 = vmatprep.subr.bf16.mxu1 %v8291_v52  ;;  %v8369_v21 = vld [vmem:[#allocation5 + $0xf68] ss:$16 sps:$4 sm:$0xff]   ;;  %v8372_v52 = vld [vmem:[#allocation5 + $0x1380] ss:$16 sps:$4 sm:$0xff]  }
 0x277   :  { %5197 = vmatprep.subr.bf16.mxu0 %v8288_v37  ;;  %v8377_v37 = vld [vmem:[#allocation5 + $0xf8c] ss:$16 sps:$4 sm:$0xff]  }
 0x279   :  { %5608 = vmatpush1.bf16.msra.mxu1 %v8289_v55  ;;  %v8380_v55 = vld [vmem:[#allocation5 + $0x13a4] ss:$16 sps:$4 sm:$0xff]  }
 0x27a   :  { %5198 = vmatpush1.bf16.msra.mxu0 %v8286_v53  ;;  %5609 = vmatprep.subr.bf16.mxu1 %v8297_v27  ;;  %v8375_v53 = vld [vmem:[#allocation5 + $0xf88] ss:$16 sps:$4 sm:$0xff]   ;;  %v8378_v27 = vld [vmem:[#allocation5 + $0x13a0] ss:$16 sps:$4 sm:$0xff]  }
 0x27b   :  { %5199 = vmatprep.subr.bf16.mxu0 %v8294_v56  ;;  %v8383_v56 = vld [vmem:[#allocation5 + $0xfac] ss:$16 sps:$4 sm:$0xff]  }
 0x27d   :  { %5610 = vmatpush1.bf16.msra.mxu1 %v8295_v43  ;;  %v8386_v43 = vld [vmem:[#allocation5 + $0x13c4] ss:$16 sps:$4 sm:$0xff]  }
 0x27e   :  { %5200 = vmatpush1.bf16.msra.mxu0 %v8292_v57  ;;  %5620 = vmatprep.subr.bf16.mxu1 %v8305_v60  ;;  %v8381_v57 = vld [vmem:[#allocation5 + $0xfa8] ss:$16 sps:$4 sm:$0xff]   ;;  %v8384_v60 = vld [vmem:[#allocation5 + $0x13c0] ss:$16 sps:$4 sm:$0xff]  }
 0x27f   :  { %5210 = vmatprep.subr.bf16.mxu0 %v8302_v59  ;;  %v8389_v59 = vld [vmem:[#allocation5 + $0xfcc] ss:$16 sps:$4 sm:$0xff]  }
 0x280   :  { %5612 = vmatmul.mubr.bf16.vlgmr.msra.gmra.mrb[4].mxu1 %v9210_v44  ;;  %v8323_v44 = vld [vmem:[#allocation5 + $0xe6c] ss:$16 sps:$4 sm:$0xff]  }
 0x281   :  { %5202 = vmatmul.mubr.bf16.vlgmr.msra.gmra.mrb[0].mxu0 %v9236_v61  ;;  %5621 = vmatpush1.bf16.msra.mxu1 %v8303_v63  ;;  %v8392_v63 = vld [vmem:[#allocation5 + $0x13e4] ss:$16 sps:$4 sm:$0xff]  }
 0x282   :  { %5211 = vmatpush1.bf16.msra.mxu0 %v8300_v62  ;;  %5622 = vmatprep.subr.bf16.mxu1 %v8311_v0  ;;  %v8387_v62 = vld [vmem:[#allocation5 + $0xfc8] ss:$16 sps:$4 sm:$0xff]   ;;  %v8390_v0 = vld [vmem:[#allocation5 + $0x13e0] ss:$16 sps:$4 sm:$0xff]  }
 0x283   :  { %5212 = vmatprep.subr.bf16.mxu0 %v8308_v34  ;;  %5242 = vmatprep.mubr.bf16.mxu0 %v9242_v1  ;;  %v8395_v34 = vld [vmem:[#allocation5 + $0xfec] ss:$16 sps:$4 sm:$0xff]  }
 0x284   :  { %5652 = vmatprep.mubr.bf16.mxu1 %v9214_v48  ;;  %v8327_v48 = vld [vmem:[#allocation5 + $0xe88] ss:$16 sps:$4 sm:$0xff]  }
 0x285   :  { %5623 = vmatpush1.bf16.msra.mxu1 %v8309_v2  ;;  %v8400_v2 = vld [vmem:[#allocation5 + $0x1404] ss:$16 sps:$4 sm:$0xff]  }
 0x286   :  { %5213 = vmatpush1.bf16.msra.mxu0 %v8306_v54  ;;  %5624 = vmatprep.subr.bf16.mxu1 %v8317_v4  ;;  %v8393_v54 = vld [vmem:[#allocation5 + $0xfe8] ss:$16 sps:$4 sm:$0xff]   ;;  %v9250_v4 = vcombine.low %v9238_v7, %v9238_v7  ;;  %v8404_v7 = vld [vmem:[#allocation5 + $0x1420] ss:$16 sps:$4 sm:$0xff]  }
 0x287   :  { %5214 = vmatprep.subr.bf16.mxu0 %v8314_v3  ;;  %v8403_v3 = vld [vmem:[#allocation5 + $0x100c] ss:$16 sps:$4 sm:$0xff]  }
 0x289   :  { %5625 = vmatpush1.bf16.msra.mxu1 %v8315_v5  ;;  %v8398_v5 = vld [vmem:[#allocation5 + $0x1400] ss:$16 sps:$4 sm:$0xff]  }
 0x28a   :  { %5215 = vmatpush1.bf16.msra.mxu0 %v8312_v41  ;;  %5626 = vmatprep.subr.bf16.mxu1 %v8323_v44  ;;  %v9252_v41 = vld [vmem:[#allocation2 + $0x50] sm:$0xff] }
 0x28b   :  { %5216 = vmatprep.subr.bf16.mxu0 %v8320_v8  ;;  %v8401_v8 = vld [vmem:[#allocation5 + $0x1008] ss:$16 sps:$4 sm:$0xff]   ;;  %v8406_v44 = vld [vmem:[#allocation5 + $0x1424] ss:$16 sps:$4 sm:$0xff]  }
 0x28d   :  { %5627 = vmatpush1.bf16.msra.mxu1 %v8321_v10  ;;  %v9256_v10 = vcombine.high %v9252_v41, %v9252_v41 }
 0x28e   :  { %5217 = vmatpush1.bf16.msra.mxu0 %v8318_v9  ;;  %5628 = vmatprep.subr.bf16.mxu1 %v8329_v12  ;;  %v8409_v9 = vld [vmem:[#allocation5 + $0x102c] ss:$16 sps:$4 sm:$0xff]   ;;  %v8412_v12 = vld [vmem:[#allocation5 + $0x1444] ss:$16 sps:$4 sm:$0xff]  }
 0x28f   :  { %5218 = vmatprep.subr.bf16.mxu0 %v8326_v11  ;;  %v8407_v11 = vld [vmem:[#allocation5 + $0x1028] ss:$16 sps:$4 sm:$0xff]  }
 0x291   :  { %5629 = vmatpush1.bf16.msra.mxu1 %v8327_v48  ;;  %v8410_v48 = vld [vmem:[#allocation5 + $0x1440] ss:$16 sps:$4 sm:$0xff]  }
 0x292   :  { %5219 = vmatpush1.bf16.msra.mxu0 %v8324_v14  ;;  %5630 = vmatprep.subr.bf16.mxu1 %v8335_v16  ;;  %v8415_v14 = vld [vmem:[#allocation5 + $0x104c] ss:$16 sps:$4 sm:$0xff]   ;;  %v8418_v16 = vld [vmem:[#allocation5 + $0x1464] ss:$16 sps:$4 sm:$0xff]  }
 0x293   :  { %5220 = vmatprep.subr.bf16.mxu0 %v8332_v15  ;;  %v8413_v15 = vld [vmem:[#allocation5 + $0x1048] ss:$16 sps:$4 sm:$0xff]  }
 0x295   :  { %5631 = vmatpush1.bf16.msra.mxu1 %v8333_v20  ;;  %v8419_v20 = vld [vmem:[#allocation5 + $0x1068] ss:$16 sps:$4 sm:$0xff]  }
 0x296   :  { %5221 = vmatpush1.bf16.msra.mxu0 %v8330_v17  ;;  %5632 = vmatprep.subr.bf16.mxu1 %v8341_v24  ;;  %v8416_v17 = vld [vmem:[#allocation5 + $0x1460] ss:$16 sps:$4 sm:$0xff]   ;;  %v8427_v24 = vld [vmem:[#allocation5 + $0x108c] ss:$16 sps:$4 sm:$0xff]  }
 0x297   :  { %5222 = vmatprep.subr.bf16.mxu0 %v8338_v23  ;;  %v8424_v23 = vld [vmem:[#allocation5 + $0x1484] ss:$16 sps:$4 sm:$0xff]  }
 0x299   :  { %5633 = vmatpush1.bf16.msra.mxu1 %v8339_v26  ;;  %v8430_v26 = vld [vmem:[#allocation5 + $0x14a4] ss:$16 sps:$4 sm:$0xff]  }
 0x29a   :  { %5223 = vmatpush1.bf16.msra.mxu0 %v8336_v25  ;;  %5634 = vmatprep.subr.bf16.mxu1 %v8347_v28  ;;  %v8422_v25 = vld [vmem:[#allocation5 + $0x1480] ss:$16 sps:$4 sm:$0xff]  }
 0x29b   :  { %5224 = vmatprep.subr.bf16.mxu0 %v8344_v18  ;;  %v8433_v18 = vld [vmem:[#allocation5 + $0x10ac] ss:$16 sps:$4 sm:$0xff]   ;;  %v8428_v28 = vld [vmem:[#allocation5 + $0x14a0] ss:$16 sps:$4 sm:$0xff]  }
 0x29d   :  { %5635 = vmatpush1.bf16.msra.mxu1 %v8345_v31  ;;  %v8436_v31 = vld [vmem:[#allocation5 + $0x14c4] ss:$16 sps:$4 sm:$0xff]  }
 0x29e   :  { %5225 = vmatpush1.bf16.msra.mxu0 %v8342_v30  ;;  %5636 = vmatprep.subr.bf16.mxu1 %v8353_v22  ;;  %v8431_v30 = vld [vmem:[#allocation5 + $0x10a8] ss:$16 sps:$4 sm:$0xff]   ;;  %v8434_v22 = vld [vmem:[#allocation5 + $0x14c0] ss:$16 sps:$4 sm:$0xff]  }
 0x29f   :  { %5226 = vmatprep.subr.bf16.mxu0 %v8350_v32  ;;  %v8439_v32 = vld [vmem:[#allocation5 + $0x10cc] ss:$16 sps:$4 sm:$0xff]  }
 0x2a1   :  { %5637 = vmatpush1.bf16.msra.mxu1 %v8351_v33  ;;  %v8442_v33 = vld [vmem:[#allocation5 + $0x14e4] ss:$16 sps:$4 sm:$0xff]  }
 0x2a2   :  { %5227 = vmatpush1.bf16.msra.mxu0 %v8348_v51  ;;  %5638 = vmatprep.subr.bf16.mxu1 %v8359_v36  ;;  %v8437_v51 = vld [vmem:[#allocation5 + $0x10c8] ss:$16 sps:$4 sm:$0xff]   ;;  %v8440_v36 = vld [vmem:[#allocation5 + $0x14e0] ss:$16 sps:$4 sm:$0xff]  }
 0x2a3   :  { %5228 = vmatprep.subr.bf16.mxu0 %v8356_v35  ;;  %v8445_v35 = vld [vmem:[#allocation5 + $0x10ec] ss:$16 sps:$4 sm:$0xff]  }
 0x2a5   :  { %5639 = vmatpush1.bf16.msra.mxu1 %v8357_v38  ;;  %v8448_v38 = vld [vmem:[#allocation5 + $0x1504] ss:$16 sps:$4 sm:$0xff]  }
 0x2a6   :  { %5229 = vmatpush1.bf16.msra.mxu0 %v8354_v13  ;;  %5640 = vmatprep.subr.bf16.mxu1 %v8365_v40  ;;  %v8443_v13 = vld [vmem:[#allocation5 + $0x10e8] ss:$16 sps:$4 sm:$0xff]   ;;  %v8446_v40 = vld [vmem:[#allocation5 + $0x1500] ss:$16 sps:$4 sm:$0xff]  }
 0x2a7   :  { %5230 = vmatprep.subr.bf16.mxu0 %v8362_v39  ;;  %v8451_v39 = vld [vmem:[#allocation5 + $0x110c] ss:$16 sps:$4 sm:$0xff]  }
 0x2a9   :  { %5641 = vmatpush1.bf16.msra.mxu1 %v8363_v42  ;;  %v8454_v42 = vld [vmem:[#allocation5 + $0x1524] ss:$16 sps:$4 sm:$0xff]  }
 0x2aa   :  { %5231 = vmatpush1.bf16.msra.mxu0 %v8360_v29  ;;  %5642 = vmatprep.subr.bf16.mxu1 %v8371_v45  ;;  %v8449_v29 = vld [vmem:[#allocation5 + $0x1108] ss:$16 sps:$4 sm:$0xff]   ;;  %v8452_v45 = vld [vmem:[#allocation5 + $0x1520] ss:$16 sps:$4 sm:$0xff]  }
 0x2ab   :  { %5232 = vmatprep.subr.bf16.mxu0 %v8368_v19  ;;  %v8457_v19 = vld [vmem:[#allocation5 + $0x112c] ss:$16 sps:$4 sm:$0xff]  }
 0x2ad   :  { %5643 = vmatpush1.bf16.msra.mxu1 %v8369_v21  ;;  %v8460_v21 = vld [vmem:[#allocation5 + $0x1544] ss:$16 sps:$4 sm:$0xff]  }
 0x2ae   :  { %5233 = vmatpush1.bf16.msra.mxu0 %v8366_v46  ;;  %5644 = vmatprep.subr.bf16.mxu1 %v8377_v37  ;;  %v8455_v46 = vld [vmem:[#allocation5 + $0x1128] ss:$16 sps:$4 sm:$0xff]   ;;  %v8458_v37 = vld [vmem:[#allocation5 + $0x1540] ss:$16 sps:$4 sm:$0xff]  }
 0x2af   :  { %5234 = vmatprep.subr.bf16.mxu0 %v8374_v47  ;;  %v8463_v47 = vld [vmem:[#allocation5 + $0x114c] ss:$16 sps:$4 sm:$0xff]  }
 0x2b1   :  { %5645 = vmatpush1.bf16.msra.mxu1 %v8375_v53  ;;  %v8466_v53 = vld [vmem:[#allocation5 + $0x1564] ss:$16 sps:$4 sm:$0xff]  }
 0x2b2   :  { %5235 = vmatpush1.bf16.msra.mxu0 %v8372_v52  ;;  %5646 = vmatprep.subr.bf16.mxu1 %v8383_v56  ;;  %v8461_v52 = vld [vmem:[#allocation5 + $0x1148] ss:$16 sps:$4 sm:$0xff]   ;;  %v8464_v56 = vld [vmem:[#allocation5 + $0x1560] ss:$16 sps:$4 sm:$0xff]  }
 0x2b3   :  { %5236 = vmatprep.subr.bf16.mxu0 %v8380_v55  ;;  %v8469_v55 = vld [vmem:[#allocation5 + $0x116c] ss:$16 sps:$4 sm:$0xff]  }
 0x2b5   :  { %5647 = vmatpush1.bf16.msra.mxu1 %v8381_v57  ;;  %v8472_v57 = vld [vmem:[#allocation5 + $0x1584] ss:$16 sps:$4 sm:$0xff]  }
 0x2b6   :  { %5237 = vmatpush1.bf16.msra.mxu0 %v8378_v27  ;;  %5648 = vmatprep.subr.bf16.mxu1 %v8389_v59  ;;  %v8467_v27 = vld [vmem:[#allocation5 + $0x1168] ss:$16 sps:$4 sm:$0xff]   ;;  %v8470_v59 = vld [vmem:[#allocation5 + $0x1580] ss:$16 sps:$4 sm:$0xff]  }
 0x2b7   :  { %5238 = vmatprep.subr.bf16.mxu0 %v8386_v43  ;;  %v8475_v43 = vld [vmem:[#allocation5 + $0x118c] ss:$16 sps:$4 sm:$0xff]  }
 0x2b9   :  { %5649 = vmatpush1.bf16.msra.mxu1 %v8387_v62  ;;  %v8478_v62 = vld [vmem:[#allocation5 + $0x15a4] ss:$16 sps:$4 sm:$0xff]  }
 0x2ba   :  { %5239 = vmatpush1.bf16.msra.mxu0 %v8384_v60  ;;  %5650 = vmatprep.subr.bf16.mxu1 %v8395_v34  ;;  %v8473_v60 = vld [vmem:[#allocation5 + $0x1188] ss:$16 sps:$4 sm:$0xff]   ;;  %v8476_v34 = vld [vmem:[#allocation5 + $0x15a0] ss:$16 sps:$4 sm:$0xff]  }
 0x2bb   :  { %5240 = vmatprep.subr.bf16.mxu0 %v8392_v63  ;;  %v8481_v63 = vld [vmem:[#allocation5 + $0x11ac] ss:$16 sps:$4 sm:$0xff]  }
 0x2bd   :  { %5651 = vmatpush1.bf16.msra.mxu1 %v8393_v54  ;;  %v8484_v54 = vld [vmem:[#allocation5 + $0x15c4] ss:$16 sps:$4 sm:$0xff]  }
 0x2be   :  { %5241 = vmatpush1.bf16.msra.mxu0 %v8390_v0  ;;  %5661 = vmatprep.subr.bf16.mxu1 %v8403_v3  ;;  %v8479_v0 = vld [vmem:[#allocation5 + $0x11a8] ss:$16 sps:$4 sm:$0xff]   ;;  %v8482_v3 = vld [vmem:[#allocation5 + $0x15c0] ss:$16 sps:$4 sm:$0xff]  }
 0x2bf   :  { %5251 = vmatprep.subr.bf16.mxu0 %v8400_v2  ;;  %v8487_v2 = vld [vmem:[#allocation5 + $0x11cc] ss:$16 sps:$4 sm:$0xff]  }
 0x2c0   :  { %5653 = vmatmul.mubr.bf16.vlgmr.msra.gmra.mrb[4].mxu1 %v9224_v6  ;;  %v8421_v6 = vld [vmem:[#allocation5 + $0x106c] ss:$16 sps:$4 sm:$0xff]  }
 0x2c1   :  { %5243 = vmatmul.mubr.bf16.vlgmr.msra.gmra.mrb[0].mxu0 %v9250_v4  ;;  %5662 = vmatpush1.bf16.msra.mxu1 %v8401_v8  ;;  %v8490_v8 = vld [vmem:[#allocation5 + $0x15e4] ss:$16 sps:$4 sm:$0xff]  }
 0x2c2   :  { %5252 = vmatpush1.bf16.msra.mxu0 %v8398_v5  ;;  %5663 = vmatprep.subr.bf16.mxu1 %v8409_v9  ;;  %v8485_v5 = vld [vmem:[#allocation5 + $0x11c8] ss:$16 sps:$4 sm:$0xff]   ;;  %v8488_v9 = vld [vmem:[#allocation5 + $0x15e0] ss:$16 sps:$4 sm:$0xff]  }
 0x2c3   :  { %5253 = vmatprep.subr.bf16.mxu0 %v8406_v44  ;;  %5283 = vmatprep.mubr.bf16.mxu0 %v9256_v10  ;;  %v8493_v44 = vld [vmem:[#allocation5 + $0x11ec] ss:$16 sps:$4 sm:$0xff]  }
 0x2c4   :  { %5693 = vmatprep.mubr.bf16.mxu1 %v9228_v58  ;;  %v8425_v58 = vld [vmem:[#allocation5 + $0x1088] ss:$16 sps:$4 sm:$0xff]  }
 0x2c5   :  { %5664 = vmatpush1.bf16.msra.mxu1 %v8407_v11  ;;  %v8498_v11 = vld [vmem:[#allocation5 + $0x1604] ss:$16 sps:$4 sm:$0xff]  }
 0x2c6   :  { %5254 = vmatpush1.bf16.msra.mxu0 %v8404_v7  ;;  %5665 = vmatprep.subr.bf16.mxu1 %v8415_v14  ;;  %v8491_v7 = vld [vmem:[#allocation5 + $0x11e8] ss:$16 sps:$4 sm:$0xff]   ;;  %v9264_v14 = vcombine.low %v9252_v41, %v9252_v41  ;;  %v8502_v41 = vld [vmem:[#allocation5 + $0x1620] ss:$16 sps:$4 sm:$0xff]  }
 0x2c7   :  { %5255 = vmatprep.subr.bf16.mxu0 %v8412_v12  ;;  %v8501_v12 = vld [vmem:[#allocation5 + $0x120c] ss:$16 sps:$4 sm:$0xff]  }
 0x2c9   :  { %5666 = vmatpush1.bf16.msra.mxu1 %v8413_v15  ;;  %v8496_v15 = vld [vmem:[#allocation5 + $0x1600] ss:$16 sps:$4 sm:$0xff]  }
 0x2ca   :  { %5256 = vmatpush1.bf16.msra.mxu0 %v8410_v48  ;;  %5667 = vmatprep.subr.bf16.mxu1 %v8421_v6  ;;  %v9266_v48 = vld [vmem:[#allocation2 + $0x58] sm:$0xff]  ;;  %v8504_v6 = vld [vmem:[#allocation5 + $0x1624] ss:$16 sps:$4 sm:$0xff]  }
 0x2cb   :  { %5257 = vmatprep.subr.bf16.mxu0 %v8418_v16  ;;  %v8499_v16 = vld [vmem:[#allocation5 + $0x1208] ss:$16 sps:$4 sm:$0xff]  }
 0x2cd   :  { %5668 = vmatpush1.bf16.msra.mxu1 %v8419_v20  ;;  %v9270_v20 = vcombine.high %v9266_v48, %v9266_v48 }
 0x2ce   :  { %5258 = vmatpush1.bf16.msra.mxu0 %v8416_v17  ;;  %5669 = vmatprep.subr.bf16.mxu1 %v8427_v24  ;;  %v8507_v17 = vld [vmem:[#allocation5 + $0x122c] ss:$16 sps:$4 sm:$0xff]   ;;  %v8510_v24 = vld [vmem:[#allocation5 + $0x1644] ss:$16 sps:$4 sm:$0xff]  }
 0x2cf   :  { %5259 = vmatprep.subr.bf16.mxu0 %v8424_v23  ;;  %v8505_v23 = vld [vmem:[#allocation5 + $0x1228] ss:$16 sps:$4 sm:$0xff]  }
 0x2d1   :  { %5670 = vmatpush1.bf16.msra.mxu1 %v8425_v58  ;;  %v8508_v58 = vld [vmem:[#allocation5 + $0x1640] ss:$16 sps:$4 sm:$0xff]  }
 0x2d2   :  { %5260 = vmatpush1.bf16.msra.mxu0 %v8422_v25  ;;  %5671 = vmatprep.subr.bf16.mxu1 %v8433_v18  ;;  %v8513_v25 = vld [vmem:[#allocation5 + $0x124c] ss:$16 sps:$4 sm:$0xff]   ;;  %v8516_v18 = vld [vmem:[#allocation5 + $0x1664] ss:$16 sps:$4 sm:$0xff]  }
 0x2d3   :  { %5261 = vmatprep.subr.bf16.mxu0 %v8430_v26  ;;  %v8511_v26 = vld [vmem:[#allocation5 + $0x1248] ss:$16 sps:$4 sm:$0xff]  }
 0x2d5   :  { %5672 = vmatpush1.bf16.msra.mxu1 %v8431_v30  ;;  %v8517_v30 = vld [vmem:[#allocation5 + $0x1268] ss:$16 sps:$4 sm:$0xff]  }
 0x2d6   :  { %5262 = vmatpush1.bf16.msra.mxu0 %v8428_v28  ;;  %5673 = vmatprep.subr.bf16.mxu1 %v8439_v32  ;;  %v8514_v28 = vld [vmem:[#allocation5 + $0x1660] ss:$16 sps:$4 sm:$0xff]   ;;  %v8525_v32 = vld [vmem:[#allocation5 + $0x128c] ss:$16 sps:$4 sm:$0xff]  }
 0x2d7   :  { %5263 = vmatprep.subr.bf16.mxu0 %v8436_v31  ;;  %v8522_v31 = vld [vmem:[#allocation5 + $0x1684] ss:$16 sps:$4 sm:$0xff]  }
 0x2d9   :  { %5674 = vmatpush1.bf16.msra.mxu1 %v8437_v51  ;;  %v8528_v51 = vld [vmem:[#allocation5 + $0x16a4] ss:$16 sps:$4 sm:$0xff]  }
 0x2da   :  { %5264 = vmatpush1.bf16.msra.mxu0 %v8434_v22  ;;  %5675 = vmatprep.subr.bf16.mxu1 %v8445_v35  ;;  %v8520_v22 = vld [vmem:[#allocation5 + $0x1680] ss:$16 sps:$4 sm:$0xff]  }
 0x2db   :  { %5265 = vmatprep.subr.bf16.mxu0 %v8442_v33  ;;  %v8531_v33 = vld [vmem:[#allocation5 + $0x12ac] ss:$16 sps:$4 sm:$0xff]   ;;  %v8526_v35 = vld [vmem:[#allocation5 + $0x16a0] ss:$16 sps:$4 sm:$0xff]  }
 0x2dd   :  { %5676 = vmatpush1.bf16.msra.mxu1 %v8443_v13  ;;  %v8534_v13 = vld [vmem:[#allocation5 + $0x16c4] ss:$16 sps:$4 sm:$0xff]  }
 0x2de   :  { %5266 = vmatpush1.bf16.msra.mxu0 %v8440_v36  ;;  %5677 = vmatprep.subr.bf16.mxu1 %v8451_v39  ;;  %v8529_v36 = vld [vmem:[#allocation5 + $0x12a8] ss:$16 sps:$4 sm:$0xff]   ;;  %v8532_v39 = vld [vmem:[#allocation5 + $0x16c0] ss:$16 sps:$4 sm:$0xff]  }
 0x2df   :  { %5267 = vmatprep.subr.bf16.mxu0 %v8448_v38  ;;  %v8537_v38 = vld [vmem:[#allocation5 + $0x12cc] ss:$16 sps:$4 sm:$0xff]  }
 0x2e1   :  { %5678 = vmatpush1.bf16.msra.mxu1 %v8449_v29  ;;  %v8540_v29 = vld [vmem:[#allocation5 + $0x16e4] ss:$16 sps:$4 sm:$0xff]  }
 0x2e2   :  { %5268 = vmatpush1.bf16.msra.mxu0 %v8446_v40  ;;  %5679 = vmatprep.subr.bf16.mxu1 %v8457_v19  ;;  %v8535_v40 = vld [vmem:[#allocation5 + $0x12c8] ss:$16 sps:$4 sm:$0xff]   ;;  %v8538_v19 = vld [vmem:[#allocation5 + $0x16e0] ss:$16 sps:$4 sm:$0xff]  }
 0x2e3   :  { %5269 = vmatprep.subr.bf16.mxu0 %v8454_v42  ;;  %v8543_v42 = vld [vmem:[#allocation5 + $0x12ec] ss:$16 sps:$4 sm:$0xff]  }
 0x2e5   :  { %5680 = vmatpush1.bf16.msra.mxu1 %v8455_v46  ;;  %v8546_v46 = vld [vmem:[#allocation5 + $0x1704] ss:$16 sps:$4 sm:$0xff]  }
 0x2e6   :  { %5270 = vmatpush1.bf16.msra.mxu0 %v8452_v45  ;;  %5681 = vmatprep.subr.bf16.mxu1 %v8463_v47  ;;  %v8541_v45 = vld [vmem:[#allocation5 + $0x12e8] ss:$16 sps:$4 sm:$0xff]   ;;  %v8544_v47 = vld [vmem:[#allocation5 + $0x1700] ss:$16 sps:$4 sm:$0xff]  }
 0x2e7   :  { %5271 = vmatprep.subr.bf16.mxu0 %v8460_v21  ;;  %v8549_v21 = vld [vmem:[#allocation5 + $0x130c] ss:$16 sps:$4 sm:$0xff]  }
 0x2e9   :  { %5682 = vmatpush1.bf16.msra.mxu1 %v8461_v52  ;;  %v8552_v52 = vld [vmem:[#allocation5 + $0x1724] ss:$16 sps:$4 sm:$0xff]  }
 0x2ea   :  { %5272 = vmatpush1.bf16.msra.mxu0 %v8458_v37  ;;  %5683 = vmatprep.subr.bf16.mxu1 %v8469_v55  ;;  %v8547_v37 = vld [vmem:[#allocation5 + $0x1308] ss:$16 sps:$4 sm:$0xff]   ;;  %v8550_v55 = vld [vmem:[#allocation5 + $0x1720] ss:$16 sps:$4 sm:$0xff]  }
 0x2eb   :  { %5273 = vmatprep.subr.bf16.mxu0 %v8466_v53  ;;  %v8555_v53 = vld [vmem:[#allocation5 + $0x132c] ss:$16 sps:$4 sm:$0xff]  }
 0x2ed   :  { %5684 = vmatpush1.bf16.msra.mxu1 %v8467_v27  ;;  %v8558_v27 = vld [vmem:[#allocation5 + $0x1744] ss:$16 sps:$4 sm:$0xff]  }
 0x2ee   :  { %5274 = vmatpush1.bf16.msra.mxu0 %v8464_v56  ;;  %5685 = vmatprep.subr.bf16.mxu1 %v8475_v43  ;;  %v8553_v56 = vld [vmem:[#allocation5 + $0x1328] ss:$16 sps:$4 sm:$0xff]   ;;  %v8556_v43 = vld [vmem:[#allocation5 + $0x1740] ss:$16 sps:$4 sm:$0xff]  }
 0x2ef   :  { %5275 = vmatprep.subr.bf16.mxu0 %v8472_v57  ;;  %v8561_v57 = vld [vmem:[#allocation5 + $0x134c] ss:$16 sps:$4 sm:$0xff]  }
 0x2f1   :  { %5686 = vmatpush1.bf16.msra.mxu1 %v8473_v60  ;;  %v8564_v60 = vld [vmem:[#allocation5 + $0x1764] ss:$16 sps:$4 sm:$0xff]  }
 0x2f2   :  { %5276 = vmatpush1.bf16.msra.mxu0 %v8470_v59  ;;  %5687 = vmatprep.subr.bf16.mxu1 %v8481_v63  ;;  %v8559_v59 = vld [vmem:[#allocation5 + $0x1348] ss:$16 sps:$4 sm:$0xff]   ;;  %v8562_v63 = vld [vmem:[#allocation5 + $0x1760] ss:$16 sps:$4 sm:$0xff]  }
 0x2f3   :  { %5277 = vmatprep.subr.bf16.mxu0 %v8478_v62  ;;  %v8567_v62 = vld [vmem:[#allocation5 + $0x136c] ss:$16 sps:$4 sm:$0xff]  }
 0x2f5   :  { %5688 = vmatpush1.bf16.msra.mxu1 %v8479_v0  ;;  %v8570_v0 = vld [vmem:[#allocation5 + $0x1784] ss:$16 sps:$4 sm:$0xff]  }
 0x2f6   :  { %5278 = vmatpush1.bf16.msra.mxu0 %v8476_v34  ;;  %5689 = vmatprep.subr.bf16.mxu1 %v8487_v2  ;;  %v8565_v34 = vld [vmem:[#allocation5 + $0x1368] ss:$16 sps:$4 sm:$0xff]   ;;  %v8568_v2 = vld [vmem:[#allocation5 + $0x1780] ss:$16 sps:$4 sm:$0xff]  }
 0x2f7   :  { %5279 = vmatprep.subr.bf16.mxu0 %v8484_v54  ;;  %v8573_v54 = vld [vmem:[#allocation5 + $0x138c] ss:$16 sps:$4 sm:$0xff]  }
 0x2f9   :  { %5690 = vmatpush1.bf16.msra.mxu1 %v8485_v5  ;;  %v8576_v5 = vld [vmem:[#allocation5 + $0x17a4] ss:$16 sps:$4 sm:$0xff]  }
 0x2fa   :  { %5280 = vmatpush1.bf16.msra.mxu0 %v8482_v3  ;;  %5691 = vmatprep.subr.bf16.mxu1 %v8493_v44  ;;  %v8571_v3 = vld [vmem:[#allocation5 + $0x1388] ss:$16 sps:$4 sm:$0xff]   ;;  %v8574_v44 = vld [vmem:[#allocation5 + $0x17a0] ss:$16 sps:$4 sm:$0xff]  }
 0x2fb   :  { %5281 = vmatprep.subr.bf16.mxu0 %v8490_v8  ;;  %v8579_v8 = vld [vmem:[#allocation5 + $0x13ac] ss:$16 sps:$4 sm:$0xff]  }
 0x2fd   :  { %5692 = vmatpush1.bf16.msra.mxu1 %v8491_v7  ;;  %v8582_v7 = vld [vmem:[#allocation5 + $0x17c4] ss:$16 sps:$4 sm:$0xff]  }
 0x2fe   :  { %5282 = vmatpush1.bf16.msra.mxu0 %v8488_v9  ;;  %5702 = vmatprep.subr.bf16.mxu1 %v8501_v12  ;;  %v8577_v9 = vld [vmem:[#allocation5 + $0x13a8] ss:$16 sps:$4 sm:$0xff]   ;;  %v8580_v12 = vld [vmem:[#allocation5 + $0x17c0] ss:$16 sps:$4 sm:$0xff]  }
 0x2ff   :  { %5292 = vmatprep.subr.bf16.mxu0 %v8498_v11  ;;  %v8585_v11 = vld [vmem:[#allocation5 + $0x13cc] ss:$16 sps:$4 sm:$0xff]  }
 0x300   :  { %5694 = vmatmul.mubr.bf16.vlgmr.msra.gmra.mrb[4].mxu1 %v9236_v61  ;;  %v8519_v61 = vld [vmem:[#allocation5 + $0x126c] ss:$16 sps:$4 sm:$0xff]  }
 0x301   :  { %5284 = vmatmul.mubr.bf16.vlgmr.msra.gmra.mrb[0].mxu0 %v9264_v14  ;;  %5703 = vmatpush1.bf16.msra.mxu1 %v8499_v16  ;;  %v8588_v16 = vld [vmem:[#allocation5 + $0x17e4] ss:$16 sps:$4 sm:$0xff]  }
 0x302   :  { %5293 = vmatpush1.bf16.msra.mxu0 %v8496_v15  ;;  %5704 = vmatprep.subr.bf16.mxu1 %v8507_v17  ;;  %v8583_v15 = vld [vmem:[#allocation5 + $0x13c8] ss:$16 sps:$4 sm:$0xff]   ;;  %v8586_v17 = vld [vmem:[#allocation5 + $0x17e0] ss:$16 sps:$4 sm:$0xff]  }
 0x303   :  { %5294 = vmatprep.subr.bf16.mxu0 %v8504_v6  ;;  %5324 = vmatprep.mubr.bf16.mxu0 %v9270_v20  ;;  %v8591_v6 = vld [vmem:[#allocation5 + $0x13ec] ss:$16 sps:$4 sm:$0xff]  }
 0x304   :  { %5734 = vmatprep.mubr.bf16.mxu1 %v9242_v1  ;;  %v8523_v1 = vld [vmem:[#allocation5 + $0x1288] ss:$16 sps:$4 sm:$0xff]  }
 0x305   :  { %5705 = vmatpush1.bf16.msra.mxu1 %v8505_v23  ;;  %v8596_v23 = vld [vmem:[#allocation5 + $0x140c] ss:$16 sps:$4 sm:$0xff]  }
 0x306   :  { %5295 = vmatpush1.bf16.msra.mxu0 %v8502_v41  ;;  %5706 = vmatprep.subr.bf16.mxu1 %v8513_v25  ;;  %v8589_v41 = vld [vmem:[#allocation5 + $0x13e8] ss:$16 sps:$4 sm:$0xff]  }
 0x307   :  { %5296 = vmatprep.subr.bf16.mxu0 %v8510_v24  ;;  %v9278_v24 = vcombine.low %v9266_v48, %v9266_v48  ;;  %v8594_v25 = vld [vmem:[#allocation5 + $0x1408] ss:$16 sps:$4 sm:$0xff]   ;;  %v8693_v48 = vld [vmem:[#allocation8 + $0x10] ss:$8 sps:$4 sm:$0xff]  }
 0x309   :  { %5707 = vmatpush1.bf16.msra.mxu1 %v8511_v26  ;;  %v8690_v26 = vld [vmem:[#allocation8] ss:$8 sps:$4 sm:$0xff]  }
 0x30a   :  { %5297 = vmatpush1.bf16.msra.mxu0 %v8508_v58  ;;  %5708 = vmatprep.subr.bf16.mxu1 %v8519_v61  ;;  %v8599_v58 = vld [vmem:[#allocation5 + $0x142c] ss:$16 sps:$4 sm:$0xff]   ;;  %v8597_v61 = vld [vmem:[#allocation5 + $0x1428] ss:$16 sps:$4 sm:$0xff]  }
 0x30b   :  { %5298 = vmatprep.subr.bf16.mxu0 %v8516_v18  ;;  %v8692_v18 = vld [vmem:[#allocation8 + $0x4] ss:$8 sps:$4 sm:$0xff]  }
 0x30d   :  { %5709 = vmatpush1.bf16.msra.mxu1 %v8517_v30  ;;  %v8602_v30 = vld [vmem:[#allocation5 + $0x144c] ss:$16 sps:$4 sm:$0xff]  }
 0x30e   :  { %5299 = vmatpush1.bf16.msra.mxu0 %v8514_v28  ;;  %5710 = vmatprep.subr.bf16.mxu1 %v8525_v32  ;;  %v8695_v28 = vld [vmem:[#allocation8 + $0x14] ss:$8 sps:$4 sm:$0xff]  }
 0x30f   :  { %5300 = vmatprep.subr.bf16.mxu0 %v8522_v31  ;;  %v8698_v31 = vld [vmem:[#allocation8 + $0x24] ss:$8 sps:$4 sm:$0xff]  }
 0x310   :  { %v8600_v32 = vld [vmem:[#allocation5 + $0x1448] ss:$16 sps:$4 sm:$0xff]  }
 0x311   :  { %5711 = vmatpush1.bf16.msra.mxu1 %v8523_v1  ;;  %v8701_v1 = vld [vmem:[#allocation8 + $0x34] ss:$8 sps:$4 sm:$0xff]  }
 0x312   :  { %5301 = vmatpush1.bf16.msra.mxu0 %v8520_v22  ;;  %5712 = vmatprep.subr.bf16.mxu1 %v8531_v33  ;;  %v8605_v22 = vld [vmem:[#allocation5 + $0x146c] ss:$16 sps:$4 sm:$0xff]  }
 0x313   :  { %5302 = vmatprep.subr.bf16.mxu0 %v8528_v51  ;;  %v8603_v51 = vld [vmem:[#allocation5 + $0x1468] ss:$16 sps:$4 sm:$0xff]   ;;  %v8699_v33 = vld [vmem:[#allocation8 + $0x30] ss:$8 sps:$4 sm:$0xff]  }
 0x315   :  { %5713 = vmatpush1.bf16.msra.mxu1 %v8529_v36  ;;  %v8606_v36 = vld [vmem:[#allocation5 + $0x1488] ss:$16 sps:$4 sm:$0xff]  }
 0x316   :  { %5303 = vmatpush1.bf16.msra.mxu0 %v8526_v35  ;;  %5714 = vmatprep.subr.bf16.mxu1 %v8537_v38  ;;  %v8704_v35 = vld [vmem:[#allocation8 + $0x44] ss:$8 sps:$4 sm:$0xff]   ;;  %v8702_v38 = vld [vmem:[#allocation8 + $0x40] ss:$8 sps:$4 sm:$0xff]  }
 0x317   :  { %5304 = vmatprep.subr.bf16.mxu0 %v8534_v13  ;;  %v8611_v13 = vld [vmem:[#allocation5 + $0x14ac] ss:$16 sps:$4 sm:$0xff]  }
 0x319   :  { %5715 = vmatpush1.bf16.msra.mxu1 %v8535_v40  ;;  %v8609_v40 = vld [vmem:[#allocation5 + $0x14a8] ss:$16 sps:$4 sm:$0xff]  }
 0x31a   :  { %5305 = vmatpush1.bf16.msra.mxu0 %v8532_v39  ;;  %5716 = vmatprep.subr.bf16.mxu1 %v8543_v42  ;;  %v8707_v39 = vld [vmem:[#allocation8 + $0x54] ss:$8 sps:$4 sm:$0xff]   ;;  %v8705_v42 = vld [vmem:[#allocation8 + $0x50] ss:$8 sps:$4 sm:$0xff]  }
 0x31b   :  { %5306 = vmatprep.subr.bf16.mxu0 %v8540_v29  ;;  %v8614_v29 = vld [vmem:[#allocation5 + $0x14cc] ss:$16 sps:$4 sm:$0xff]  }
 0x31d   :  { %5717 = vmatpush1.bf16.msra.mxu1 %v8541_v45  ;;  %v8612_v45 = vld [vmem:[#allocation5 + $0x14c8] ss:$16 sps:$4 sm:$0xff]  }
 0x31e   :  { %5307 = vmatpush1.bf16.msra.mxu0 %v8538_v19  ;;  %5718 = vmatprep.subr.bf16.mxu1 %v8549_v21  ;;  %v8710_v19 = vld [vmem:[#allocation8 + $0x64] ss:$8 sps:$4 sm:$0xff]   ;;  %v8708_v21 = vld [vmem:[#allocation8 + $0x60] ss:$8 sps:$4 sm:$0xff]  }
 0x31f   :  { %5308 = vmatprep.subr.bf16.mxu0 %v8546_v46  ;;  %v8617_v46 = vld [vmem:[#allocation5 + $0x14ec] ss:$16 sps:$4 sm:$0xff]  }
 0x321   :  { %5719 = vmatpush1.bf16.msra.mxu1 %v8547_v37  ;;  %v8615_v37 = vld [vmem:[#allocation5 + $0x14e8] ss:$16 sps:$4 sm:$0xff]  }
 0x322   :  { %5309 = vmatpush1.bf16.msra.mxu0 %v8544_v47  ;;  %5720 = vmatprep.subr.bf16.mxu1 %v8555_v53  ;;  %v8713_v47 = vld [vmem:[#allocation8 + $0x74] ss:$8 sps:$4 sm:$0xff]   ;;  %v8711_v53 = vld [vmem:[#allocation8 + $0x70] ss:$8 sps:$4 sm:$0xff]  }
 0x323   :  { %5310 = vmatprep.subr.bf16.mxu0 %v8552_v52  ;;  %v8620_v52 = vld [vmem:[#allocation5 + $0x150c] ss:$16 sps:$4 sm:$0xff]  }
 0x325   :  { %5721 = vmatpush1.bf16.msra.mxu1 %v8553_v56  ;;  %v8618_v56 = vld [vmem:[#allocation5 + $0x1508] ss:$16 sps:$4 sm:$0xff]  }
 0x326   :  { %5311 = vmatpush1.bf16.msra.mxu0 %v8550_v55  ;;  %5722 = vmatprep.subr.bf16.mxu1 %v8561_v57  ;;  %v8716_v55 = vld [vmem:[#allocation8 + $0x84] ss:$8 sps:$4 sm:$0xff]   ;;  %v8714_v57 = vld [vmem:[#allocation8 + $0x80] ss:$8 sps:$4 sm:$0xff]  }
 0x327   :  { %5312 = vmatprep.subr.bf16.mxu0 %v8558_v27  ;;  %v8623_v27 = vld [vmem:[#allocation5 + $0x152c] ss:$16 sps:$4 sm:$0xff]  }
 0x329   :  { %5723 = vmatpush1.bf16.msra.mxu1 %v8559_v59  ;;  %v8621_v59 = vld [vmem:[#allocation5 + $0x1528] ss:$16 sps:$4 sm:$0xff]  }
 0x32a   :  { %5313 = vmatpush1.bf16.msra.mxu0 %v8556_v43  ;;  %5724 = vmatprep.subr.bf16.mxu1 %v8567_v62  ;;  %v8719_v43 = vld [vmem:[#allocation8 + $0x94] ss:$8 sps:$4 sm:$0xff]   ;;  %v8717_v62 = vld [vmem:[#allocation8 + $0x90] ss:$8 sps:$4 sm:$0xff]  }
 0x32b   :  { %5314 = vmatprep.subr.bf16.mxu0 %v8564_v60  ;;  %v8626_v60 = vld [vmem:[#allocation5 + $0x154c] ss:$16 sps:$4 sm:$0xff]  }
 0x32d   :  { %5725 = vmatpush1.bf16.msra.mxu1 %v8565_v34  ;;  %v8624_v34 = vld [vmem:[#allocation5 + $0x1548] ss:$16 sps:$4 sm:$0xff]  }
 0x32e   :  { %5315 = vmatpush1.bf16.msra.mxu0 %v8562_v63  ;;  %5726 = vmatprep.subr.bf16.mxu1 %v8573_v54  ;;  %v8722_v63 = vld [vmem:[#allocation8 + $0xa4] ss:$8 sps:$4 sm:$0xff]   ;;  %v8720_v54 = vld [vmem:[#allocation8 + $0xa0] ss:$8 sps:$4 sm:$0xff]  }
 0x32f   :  { %5316 = vmatprep.subr.bf16.mxu0 %v8570_v0  ;;  %v8629_v0 = vld [vmem:[#allocation5 + $0x156c] ss:$16 sps:$4 sm:$0xff]  }
 0x331   :  { %5727 = vmatpush1.bf16.msra.mxu1 %v8571_v3  ;;  %v8627_v3 = vld [vmem:[#allocation5 + $0x1568] ss:$16 sps:$4 sm:$0xff]  }
 0x332   :  { %5317 = vmatpush1.bf16.msra.mxu0 %v8568_v2  ;;  %5728 = vmatprep.subr.bf16.mxu1 %v8579_v8  ;;  %v8725_v2 = vld [vmem:[#allocation8 + $0xb4] ss:$8 sps:$4 sm:$0xff]   ;;  %v8723_v8 = vld [vmem:[#allocation8 + $0xb0] ss:$8 sps:$4 sm:$0xff]  }
 0x333   :  { %5318 = vmatprep.subr.bf16.mxu0 %v8576_v5  ;;  %v8632_v5 = vld [vmem:[#allocation5 + $0x158c] ss:$16 sps:$4 sm:$0xff]  }
 0x335   :  { %5729 = vmatpush1.bf16.msra.mxu1 %v8577_v9  ;;  %v8630_v9 = vld [vmem:[#allocation5 + $0x1588] ss:$16 sps:$4 sm:$0xff]  }
 0x336   :  { %5319 = vmatpush1.bf16.msra.mxu0 %v8574_v44  ;;  %5730 = vmatprep.subr.bf16.mxu1 %v8585_v11  ;;  %v8728_v44 = vld [vmem:[#allocation8 + $0xc4] ss:$8 sps:$4 sm:$0xff]   ;;  %v8726_v11 = vld [vmem:[#allocation8 + $0xc0] ss:$8 sps:$4 sm:$0xff]  }
 0x337   :  { %5320 = vmatprep.subr.bf16.mxu0 %v8582_v7  ;;  %v8635_v7 = vld [vmem:[#allocation5 + $0x15ac] ss:$16 sps:$4 sm:$0xff]  }
 0x339   :  { %5731 = vmatpush1.bf16.msra.mxu1 %v8583_v15  ;;  %v8633_v15 = vld [vmem:[#allocation5 + $0x15a8] ss:$16 sps:$4 sm:$0xff]  }
 0x33a   :  { %5321 = vmatpush1.bf16.msra.mxu0 %v8580_v12  ;;  %5732 = vmatprep.subr.bf16.mxu1 %v8591_v6  ;;  %v8731_v12 = vld [vmem:[#allocation8 + $0xd4] ss:$8 sps:$4 sm:$0xff]   ;;  %v8729_v6 = vld [vmem:[#allocation8 + $0xd0] ss:$8 sps:$4 sm:$0xff]  }
 0x33b   :  { %5322 = vmatprep.subr.bf16.mxu0 %v8588_v16  ;;  %v8638_v16 = vld [vmem:[#allocation5 + $0x15cc] ss:$16 sps:$4 sm:$0xff]  }
 0x33d   :  { %5733 = vmatpush1.bf16.msra.mxu1 %v8589_v41  ;;  %v8641_v41 = vld [vmem:[#allocation5 + $0x15ec] ss:$16 sps:$4 sm:$0xff]  }
 0x33e   :  { %5323 = vmatpush1.bf16.msra.mxu0 %v8586_v17  ;;  %5743 = vmatprep.subr.bf16.mxu1 %v8596_v23  ;;  %v8636_v17 = vld [vmem:[#allocation5 + $0x15c8] ss:$16 sps:$4 sm:$0xff]  }
 0x33f   :  { %6229 = vmatprep.subr.bf16.mxu0 %v8692_v18  ;;  %v8639_v23 = vld [vmem:[#allocation5 + $0x15e8] ss:$16 sps:$4 sm:$0xff]  }
 0x340   :  { %5735 = vmatmul.mubr.bf16.vlgmr.msra.gmra.mrb[4].mxu1 %v9250_v4  ;;  %v8696_v4 = vld [vmem:[#allocation8 + $0x20] ss:$8 sps:$4 sm:$0xff]   ;;  %v8645_v18 = vld [vmem:[#allocation5 + $0x1628] ss:$16 sps:$4 sm:$0xff]  }
 0x341   :  { %5325 = vmatmul.mubr.bf16.vlgmr.msra.gmra.mrb[0].mxu0 %v9278_v24  ;;  %5744 = vmatpush1.bf16.msra.mxu1 %v8594_v25  ;;  %v8644_v25 = vld [vmem:[#allocation5 + $0x160c] ss:$16 sps:$4 sm:$0xff]  }
 0x342   :  { %5775 = vmatprep.mubr.bf16.mxu1 %v9256_v10  ;;  %5745 = vmatprep.subr.bf16.mxu1 %v8599_v58  ;;  %v8608_v10 = vld [vmem:[#allocation5 + $0x148c] ss:$16 sps:$4 sm:$0xff]   ;;  %v8642_v58 = vld [vmem:[#allocation5 + $0x1608] ss:$16 sps:$4 sm:$0xff]  }
 0x343   :  { %6230 = vmatpush1.bf16.msra.mxu0 %v8690_v26  ;;  %v8647_v26 = vld [vmem:[#allocation5 + $0x162c] ss:$16 sps:$4 sm:$0xff]  }
 0x344   :  { %6231 = vmatprep.subr.bf16.mxu0 %v8695_v28  ;;  %v8648_v28 = vld [vmem:[#allocation5 + $0x1648] ss:$16 sps:$4 sm:$0xff]  }
 0x345   :  { %5746 = vmatpush1.bf16.msra.mxu1 %v8597_v61  ;;  %v8650_v61 = vld [vmem:[#allocation5 + $0x164c] ss:$16 sps:$4 sm:$0xff]  }
 0x346   :  { %5747 = vmatprep.subr.bf16.mxu1 %v8602_v30  ;;  %v8653_v30 = vld [vmem:[#allocation5 + $0x166c] ss:$16 sps:$4 sm:$0xff]  }
 0x347   :  { %6232 = vmatpush1.bf16.msra.mxu0 %v8693_v48  ;;  %v8651_v48 = vld [vmem:[#allocation5 + $0x1668] ss:$16 sps:$4 sm:$0xff]  }
 0x348   :  { %6233 = vmatprep.subr.bf16.mxu0 %v8698_v31  ;;  %v8656_v31 = vld [vmem:[#allocation5 + $0x168c] ss:$16 sps:$4 sm:$0xff]  }
 0x349   :  { %5748 = vmatpush1.bf16.msra.mxu1 %v8600_v32  ;;  %v8654_v32 = vld [vmem:[#allocation5 + $0x1688] ss:$16 sps:$4 sm:$0xff]  }
 0x34a   :  { %5749 = vmatprep.subr.bf16.mxu1 %v8605_v22  ;;  %v8659_v22 = vld [vmem:[#allocation5 + $0x16ac] ss:$16 sps:$4 sm:$0xff]  }
 0x34b   :  { %6234 = vmatpush1.bf16.msra.mxu0 %v8696_v4  ;;  %v8662_v4 = vld [vmem:[#allocation5 + $0x16cc] ss:$16 sps:$4 sm:$0xff]  }
 0x34c   :  { %6235 = vmatprep.subr.bf16.mxu0 %v8701_v1  ;;  %v8734_v1 = vld [vmem:[#allocation8 + $0xe4] ss:$8 sps:$4 sm:$0xff]  }
 0x34d   :  { %5750 = vmatpush1.bf16.msra.mxu1 %v8603_v51  ;;  %v8660_v51 = vld [vmem:[#allocation5 + $0x16c8] ss:$16 sps:$4 sm:$0xff]  }
 0x34e   :  { %5751 = vmatprep.subr.bf16.mxu1 %v8608_v10  ;;  %v8665_v10 = vld [vmem:[#allocation5 + $0x16ec] ss:$16 sps:$4 sm:$0xff]  }
 0x34f   :  { %6236 = vmatpush1.bf16.msra.mxu0 %v8699_v33  ;;  %v8737_v33 = vld [vmem:[#allocation8 + $0xf4] ss:$8 sps:$4 sm:$0xff]  }
 0x350   :  { %6237 = vmatprep.subr.bf16.mxu0 %v8704_v35  ;;  %v8735_v35 = vld [vmem:[#allocation8 + $0xf0] ss:$8 sps:$4 sm:$0xff]  }
 0x351   :  { %5752 = vmatpush1.bf16.msra.mxu1 %v8606_v36  ;;  %v8663_v36 = vld [vmem:[#allocation5 + $0x16e8] ss:$16 sps:$4 sm:$0xff]  }
 0x352   :  { %5753 = vmatprep.subr.bf16.mxu1 %v8611_v13  ;;  %v8668_v13 = vld [vmem:[#allocation5 + $0x170c] ss:$16 sps:$4 sm:$0xff]  }
 0x353   :  { %6238 = vmatpush1.bf16.msra.mxu0 %v8702_v38  ;;  %v8740_v38 = vld [vmem:[#allocation8 + $0x104] ss:$8 sps:$4 sm:$0xff]  }
 0x354   :  { %6239 = vmatprep.subr.bf16.mxu0 %v8707_v39  ;;  %v8666_v39 = vld [vmem:[#allocation5 + $0x1708] ss:$16 sps:$4 sm:$0xff]  }
 0x355   :  { %5754 = vmatpush1.bf16.msra.mxu1 %v8609_v40  ;;  %v8671_v40 = vld [vmem:[#allocation5 + $0x172c] ss:$16 sps:$4 sm:$0xff]  }
 0x356   :  { %5755 = vmatprep.subr.bf16.mxu1 %v8614_v29  ;;  %v8669_v29 = vld [vmem:[#allocation5 + $0x1728] ss:$16 sps:$4 sm:$0xff]  }
 0x357   :  { %6240 = vmatpush1.bf16.msra.mxu0 %v8705_v42  ;;  %v8674_v42 = vld [vmem:[#allocation5 + $0x174c] ss:$16 sps:$4 sm:$0xff]  }
 0x358   :  { %6241 = vmatprep.subr.bf16.mxu0 %v8710_v19  ;;  %v8672_v19 = vld [vmem:[#allocation5 + $0x1748] ss:$16 sps:$4 sm:$0xff]  }
 0x359   :  { %5756 = vmatpush1.bf16.msra.mxu1 %v8612_v45  ;;  %v8677_v45 = vld [vmem:[#allocation5 + $0x176c] ss:$16 sps:$4 sm:$0xff]  }
 0x35a   :  { %5757 = vmatprep.subr.bf16.mxu1 %v8617_v46  ;;  %v8675_v46 = vld [vmem:[#allocation5 + $0x1768] ss:$16 sps:$4 sm:$0xff]  }
 0x35b   :  { %6242 = vmatpush1.bf16.msra.mxu0 %v8708_v21  ;;  %v8680_v21 = vld [vmem:[#allocation5 + $0x178c] ss:$16 sps:$4 sm:$0xff]  }
 0x35c   :  { %6243 = vmatprep.subr.bf16.mxu0 %v8713_v47  ;;  %v8678_v47 = vld [vmem:[#allocation5 + $0x1788] ss:$16 sps:$4 sm:$0xff]  }
 0x35d   :  { %5758 = vmatpush1.bf16.msra.mxu1 %v8615_v37  ;;  %v8683_v37 = vld [vmem:[#allocation5 + $0x17ac] ss:$16 sps:$4 sm:$0xff]  }
 0x35e   :  { %5759 = vmatprep.subr.bf16.mxu1 %v8620_v52  ;;  %v8681_v52 = vld [vmem:[#allocation5 + $0x17a8] ss:$16 sps:$4 sm:$0xff]  }
 0x35f   :  { %6244 = vmatpush1.bf16.msra.mxu0 %v8711_v53  ;;  %v8686_v53 = vld [vmem:[#allocation5 + $0x17cc] ss:$16 sps:$4 sm:$0xff]  }
 0x360   :  { %6245 = vmatprep.subr.bf16.mxu0 %v8716_v55  ;;  %v8684_v55 = vld [vmem:[#allocation5 + $0x17c8] ss:$16 sps:$4 sm:$0xff]  }
 0x361   :  { %5760 = vmatpush1.bf16.msra.mxu1 %v8618_v56  ;;  %v8689_v56 = vld [vmem:[#allocation5 + $0x17ec] ss:$16 sps:$4 sm:$0xff]  }
 0x362   :  { %5761 = vmatprep.subr.bf16.mxu1 %v8623_v27  ;;  %v8687_v27 = vld [vmem:[#allocation5 + $0x17e8] ss:$16 sps:$4 sm:$0xff]  }
 0x363   :  { %6246 = vmatpush1.bf16.msra.mxu0 %v8714_v57  ;;  %v897_v57 = vlaneseq }
 0x364   :  { %6247 = vmatprep.subr.bf16.mxu0 %v8719_v43 }
 0x365   :  { %5762 = vmatpush1.bf16.msra.mxu1 %v8621_v59  ;;  %v9286_v43 = vshrl.u32 %v897_v57, 7 }
 0x366   :  { %5763 = vmatprep.subr.bf16.mxu1 %v8626_v60  ;;  %v9289_v60 = vld [vmem:[#allocation7] sm:$0xf] }
 0x367   :  { %6248 = vmatpush1.bf16.msra.mxu0 %v8717_v62  ;;  %v899_v59 = vsub.s32 0, %v9286_v43  ;;  %v903_v62 = vsub.s32 1, %v9286_v43 }
 0x368   :  { %6249 = vmatprep.subr.bf16.mxu0 %v8722_v63 }
 0x369   :  { %5764 = vmatpush1.bf16.msra.mxu1 %v8624_v34  ;;  %v900_v63 = vrot.slane %v9289_v60, %v899_v59  ;;  %v904_v34 = vrot.slane %v9289_v60, %v903_v62 }
 0x36a   :  { %5765 = vmatprep.subr.bf16.mxu1 %v8629_v0 }
 0x36b   :  { %6250 = vmatpush1.bf16.msra.mxu0 %v8720_v54  ;;  %v4876_v0 = vadd.f32 %v9188_v49, %v900_v63  ;;  %v8741_v49 = vld [vmem:[#allocation8 + $0x110] ss:$8 sps:$4 sm:$0xff]  }
 0x36c   :  { %6251 = vmatprep.subr.bf16.mxu0 %v8725_v2 }
 0x36d   :  { %5766 = vmatpush1.bf16.msra.mxu1 %v8627_v3 }
 0x36e   :  { %5767 = vmatprep.subr.bf16.mxu1 %v8632_v5 }
 0x36f   :  { %6252 = vmatpush1.bf16.msra.mxu0 %v8723_v8 }
 0x370   :  { %6253 = vmatprep.subr.bf16.mxu0 %v8728_v44 }
 0x371   :  { %5768 = vmatpush1.bf16.msra.mxu1 %v8630_v9 }
 0x372   :  { %5769 = vmatprep.subr.bf16.mxu1 %v8635_v7 }
 0x373   :  { %6254 = vmatpush1.bf16.msra.mxu0 %v8726_v11 }
 0x374   :  { %6255 = vmatprep.subr.bf16.mxu0 %v8731_v12  ;;  %v8738_v12 = vld [vmem:[#allocation8 + $0x100] ss:$8 sps:$4 sm:$0xff]  }
 0x375   :  { %5770 = vmatpush1.bf16.msra.mxu1 %v8633_v15 }
 0x376   :  { %5771 = vmatprep.subr.bf16.mxu1 %v8638_v16  ;;  %v8743_v16 = vld [vmem:[#allocation8 + $0x114] ss:$8 sps:$4 sm:$0xff]  }
 0x377   :  { %6256 = vmatpush1.bf16.msra.mxu0 %v8729_v6  ;;  %v8786_v6 = vld [vmem:[#allocation11 + $0x40] sm:$0xff]  }
 0x378   :  { %6257 = vmatprep.subr.bf16.mxu0 %v8734_v1  ;;  %v8753_v1 = vld [vmem:[#allocation8 + $0x150] ss:$8 sps:$4 sm:$0xff]  }
 0x379   :  { %5772 = vmatpush1.bf16.msra.mxu1 %v8636_v17  ;;  %v8787_v17 = vld [vmem:[#allocation11] sm:$0xff]  }
 0x37a   :  { %5773 = vmatprep.subr.bf16.mxu1 %v8641_v41  ;;  %v8788_v41 = vld [vmem:[#allocation11 + $0x48] sm:$0xff]  }
 0x37d   :  { %5774 = vmatpush1.bf16.msra.mxu1 %v8639_v23  ;;  %v8789_v23 = vld [vmem:[#allocation11 + $0x8] sm:$0xff]  }
 0x37e   :  { %5784 = vmatprep.subr.bf16.mxu1 %v8644_v25  ;;  %v8790_v25 = vld [vmem:[#allocation11 + $0x50] sm:$0xff]  }
 0x380   :  { %5776 = vmatmul.mubr.bf16.vlgmr.msra.gmra.mrb[4].mxu1 %v9264_v14  ;;  %v8657_v14 = vld [vmem:[#allocation5 + $0x16a8] ss:$16 sps:$4 sm:$0xff]  }
 0x381   :  { %5785 = vmatpush1.bf16.msra.mxu1 %v8642_v58  ;;  %5816 = vmatprep.mubr.bf16.mxu1 %v9270_v20  ;;  %v8732_v20 = vld [vmem:[#allocation8 + $0xe0] ss:$8 sps:$4 sm:$0xff]  }
 0x382   :  { %5786 = vmatprep.subr.bf16.mxu1 %v8647_v26  ;;  %6258 = vmatpush1.bf16.msra.mxu0 %v8732_v20  ;;  %v8744_v58 = vld [vmem:[#allocation8 + $0x120] ss:$8 sps:$4 sm:$0xff]   ;;  %v8749_v26 = vld [vmem:[#allocation8 + $0x134] ss:$8 sps:$4 sm:$0xff]   ;;  %v8758_v20 = vld [vmem:[#allocation8 + $0x164] ss:$8 sps:$4 sm:$0xff]  }
 0x383   :  { %6259 = vmatprep.subr.bf16.mxu0 %v8737_v33  ;;  %v8761_v33 = vld [vmem:[#allocation8 + $0x174] ss:$8 sps:$4 sm:$0xff]  }
 0x385   :  { %5787 = vmatpush1.bf16.msra.mxu1 %v8645_v18  ;;  %v8791_v18 = vld [vmem:[#allocation11 + $0x10] sm:$0xff]  }
 0x386   :  { %5788 = vmatprep.subr.bf16.mxu1 %v8650_v61  ;;  %6260 = vmatpush1.bf16.msra.mxu0 %v8735_v35  ;;  %v8792_v61 = vld [vmem:[#allocation11 + $0x58] sm:$0xff]  }
 0x387   :  { %6270 = vmatprep.subr.bf16.mxu0 %v8740_v38  ;;  %v8759_v35 = vld [vmem:[#allocation8 + $0x170] ss:$8 sps:$4 sm:$0xff]   ;;  %v8767_v38 = vld [vmem:[#allocation8 + $0x194] ss:$8 sps:$4 sm:$0xff]  }
 0x389   :  { %5789 = vmatpush1.bf16.msra.mxu1 %v8648_v28  ;;  %v8747_v28 = vld [vmem:[#allocation8 + $0x130] ss:$8 sps:$4 sm:$0xff]  }
 0x38a   :  { %5790 = vmatprep.subr.bf16.mxu1 %v8653_v30  ;;  %v8752_v30 = vld [vmem:[#allocation8 + $0x144] ss:$8 sps:$4 sm:$0xff]  }
 0x38d   :  { %5791 = vmatpush1.bf16.msra.mxu1 %v8651_v48  ;;  %v8793_v48 = vld [vmem:[#allocation11 + $0x18] sm:$0xff]  }
 0x38e   :  { %5792 = vmatprep.subr.bf16.mxu1 %v8656_v31  ;;  %v8794_v31 = vld [vmem:[#allocation11 + $0x60] sm:$0xff]  }
 0x391   :  { %5793 = vmatpush1.bf16.msra.mxu1 %v8654_v32  ;;  %v8750_v32 = vld [vmem:[#allocation8 + $0x140] ss:$8 sps:$4 sm:$0xff]  }
 0x392   :  { %5794 = vmatprep.subr.bf16.mxu1 %v8659_v22  ;;  %v8755_v22 = vld [vmem:[#allocation8 + $0x154] ss:$8 sps:$4 sm:$0xff]  }
 0x395   :  { %5795 = vmatpush1.bf16.msra.mxu1 %v8657_v14  ;;  %v8795_v14 = vld [vmem:[#allocation11 + $0x20] sm:$0xff]  }
 0x396   :  { %5796 = vmatprep.subr.bf16.mxu1 %v8662_v4  ;;  %v8796_v4 = vld [vmem:[#allocation11 + $0x68] sm:$0xff]  }
 0x399   :  { %5797 = vmatpush1.bf16.msra.mxu1 %v8660_v51  ;;  %v8797_v51 = vld [vmem:[#allocation11 + $0x28] sm:$0xff]  }
 0x39a   :  { %5798 = vmatprep.subr.bf16.mxu1 %v8665_v10  ;;  %v8756_v10 = vld [vmem:[#allocation8 + $0x160] ss:$8 sps:$4 sm:$0xff]  }
 0x39d   :  { %5799 = vmatpush1.bf16.msra.mxu1 %v8663_v36  ;;  %v8764_v36 = vld [vmem:[#allocation8 + $0x184] ss:$8 sps:$4 sm:$0xff]  }
 0x39e   :  { %5800 = vmatprep.subr.bf16.mxu1 %v8668_v13  ;;  %v8762_v13 = vld [vmem:[#allocation8 + $0x180] ss:$8 sps:$4 sm:$0xff]  }
 0x3a1   :  { %5801 = vmatpush1.bf16.msra.mxu1 %v8666_v39  ;;  %v8765_v39 = vld [vmem:[#allocation8 + $0x190] ss:$8 sps:$4 sm:$0xff]  }
 0x3a2   :  { %5802 = vmatprep.subr.bf16.mxu1 %v8671_v40  ;;  %v8770_v40 = vld [vmem:[#allocation8 + $0x1a4] ss:$8 sps:$4 sm:$0xff]  }
 0x3a5   :  { %5803 = vmatpush1.bf16.msra.mxu1 %v8669_v29  ;;  %v8768_v29 = vld [vmem:[#allocation8 + $0x1a0] ss:$8 sps:$4 sm:$0xff]  }
 0x3a6   :  { %5804 = vmatprep.subr.bf16.mxu1 %v8674_v42  ;;  %v8773_v42 = vld [vmem:[#allocation8 + $0x1b4] ss:$8 sps:$4 sm:$0xff]  }
 0x3a9   :  { %5805 = vmatpush1.bf16.msra.mxu1 %v8672_v19  ;;  %v8771_v19 = vld [vmem:[#allocation8 + $0x1b0] ss:$8 sps:$4 sm:$0xff]  }
 0x3aa   :  { %5806 = vmatprep.subr.bf16.mxu1 %v8677_v45  ;;  %v8776_v45 = vld [vmem:[#allocation8 + $0x1c4] ss:$8 sps:$4 sm:$0xff]  }
 0x3ad   :  { %5807 = vmatpush1.bf16.msra.mxu1 %v8675_v46  ;;  %v8774_v46 = vld [vmem:[#allocation8 + $0x1c0] ss:$8 sps:$4 sm:$0xff]  }
 0x3ae   :  { %5808 = vmatprep.subr.bf16.mxu1 %v8680_v21  ;;  %v8779_v21 = vld [vmem:[#allocation8 + $0x1d4] ss:$8 sps:$4 sm:$0xff]  }
 0x3b1   :  { %5809 = vmatpush1.bf16.msra.mxu1 %v8678_v47  ;;  %v8777_v47 = vld [vmem:[#allocation8 + $0x1d0] ss:$8 sps:$4 sm:$0xff]  }
 0x3b2   :  { %5810 = vmatprep.subr.bf16.mxu1 %v8683_v37  ;;  %v8782_v37 = vld [vmem:[#allocation8 + $0x1e4] ss:$8 sps:$4 sm:$0xff]  }
 0x3b5   :  { %5811 = vmatpush1.bf16.msra.mxu1 %v8681_v52  ;;  %v8780_v52 = vld [vmem:[#allocation8 + $0x1e0] ss:$8 sps:$4 sm:$0xff]  }
 0x3b6   :  { %5812 = vmatprep.subr.bf16.mxu1 %v8686_v53  ;;  %v8785_v53 = vld [vmem:[#allocation8 + $0x1f4] ss:$8 sps:$4 sm:$0xff]  }
 0x3b9   :  { %5813 = vmatpush1.bf16.msra.mxu1 %v8684_v55  ;;  %v8783_v55 = vld [vmem:[#allocation8 + $0x1f0] ss:$8 sps:$4 sm:$0xff]  }
 0x3ba   :  { %5814 = vmatprep.subr.bf16.mxu1 %v8689_v56  ;;  %v907_v56 = vsub.s32 2, %v9286_v43 }
 0x3bc   :  { %v908_v57 = vrot.slane %v9289_v60, %v907_v56 }
 0x3bd   :  { %5815 = vmatpush1.bf16.msra.mxu1 %v8687_v27  ;;  %v911_v27 = vsub.s32 3, %v9286_v43 }
 0x3be   :  { %7382 = vmatprep.subr.bf16.mxu1 %v8786_v6 }
 0x3bf   :  { %v912_v63 = vrot.slane %v9289_v60, %v911_v27  ;;  %v5897_v60 = vld [vmem:[#allocation10] sm:$0x3] }
 0x3c0   :  { %5817 = vmatmul.mubr.bf16.vlgmr.msra.gmra.mrb[4].mxu1 %v9278_v24  ;;  %v4878_v24 = vadd.f32 %v9190_v50, %v904_v34  ;;  %v8746_v50 = vld [vmem:[#allocation8 + $0x124] ss:$8 sps:$4 sm:$0xff]   ;;  %v5906_v6 = vrot.slane %v5897_v60, %v903_v62 }
 0x3c1   :  { %7383 = vmatpush3.bf16.msra.mxu1 %v8787_v17 }
 0x3c2   :  { %7384 = vmatprep.subr.bf16.mxu1 %v8788_v41 }
 0x3c5   :  { %7385 = vmatpush3.bf16.msra.mxu1 %v8789_v23 }
 0x3c6   :  { %7386 = vmatprep.subr.bf16.mxu1 %v8790_v25 }
 0x3c9   :  { %7387 = vmatpush3.bf16.msra.mxu1 %v8791_v18 }
 0x3ca   :  { %7388 = vmatprep.subr.bf16.mxu1 %v8792_v61 }
 0x3cd   :  { %7389 = vmatpush3.bf16.msra.mxu1 %v8793_v48 }
 0x3ce   :  { %7390 = vmatprep.subr.bf16.mxu1 %v8794_v31 }
 0x3d1   :  { %7391 = vmatpush3.bf16.msra.mxu1 %v8795_v14 }
 0x3d2   :  { %7392 = vmatprep.subr.bf16.mxu1 %v8796_v4 }
 0x3d5   :  { %7393 = vmatpush3.bf16.msra.mxu1 %v8797_v51 }
 0x414   :  { %v5326_v54 = vpop.f32.mrb[0].mxu0 }
 0x415   :  { %v7405_v2 = vadd.f32 %v5326_v54, %v4876_v0  ;;  %v5328_v3 = vpop.f32.mrb[1].mxu0 }
 0x416   :  { %v7407_v5 = vadd.f32 %v5328_v3, %v4878_v24  ;;  %v5330_v8 = vpop.f32.mrb[2].mxu0 }
 0x417   :  { %v5825_v44 = vmax.f32 %v7405_v2, 0.0  ;;  %v5331_v9 = vpop.f32.mrb[3].mxu0 }
 0x418   :  { %v5826_v7 = vmax.f32 %v7407_v5, 0.0 }
 0x419   :  { %v5829_v15 = vpack.c.bf16 %v5825_v44, %v5825_v44 }
 0x41a   :  { %v5830_v11 = vpack.c.bf16 %v5826_v7, %v5826_v7  ;;  %v8798_v7 = vld [vmem:[#allocation11 + $0x70] sm:$0xff]  }
 0x41b   :  { %7394 = vmatprep.subr.bf16.mxu1 %v8798_v7 }
 0x41c   :  { %6261 = vmatprep.mubr.bf16.mxu0 %v5830_v11  ;;  %v8799_v11 = vld [vmem:[#allocation11 + $0x30] sm:$0xff]  }
 0x41d   :  { %6262 = vmatmul.mubr.bf16.vlgmr.msra.gmra.mrb[4].mxu0 %v5829_v15  ;;  %7395 = vmatpush3.bf16.msra.mxu1 %v8799_v11  ;;  %v8801_v15 = vld [vmem:[#allocation11 + $0x38] sm:$0xff]  }
 0x41e   :  { %6271 = vmatpush1.bf16.msra.mxu0 %v8738_v12  ;;  %v8800_v12 = vld [vmem:[#allocation11 + $0x78] sm:$0xff]  }
 0x41f   :  { %6272 = vmatprep.subr.bf16.mxu0 %v8743_v16  ;;  %7396 = vmatprep.subr.bf16.mxu1 %v8800_v12  ;;  %v5902_v16 = vrot.slane %v5897_v60, %v899_v59 }
 0x421   :  { %7397 = vmatpush3.bf16.msra.mxu1 %v8801_v15 }
 0x422   :  { %6273 = vmatpush1.bf16.msra.mxu0 %v8741_v49 }
 0x423   :  { %6274 = vmatprep.subr.bf16.mxu0 %v8746_v50 }
 0x426   :  { %6275 = vmatpush1.bf16.msra.mxu0 %v8744_v58 }
 0x427   :  { %6276 = vmatprep.subr.bf16.mxu0 %v8749_v26 }
 0x42a   :  { %6277 = vmatpush1.bf16.msra.mxu0 %v8747_v28 }
 0x42b   :  { %6278 = vmatprep.subr.bf16.mxu0 %v8752_v30  ;;  %v7365_v30 = vld [vmem:[#allocation13] ss:$0 sm:$0xff] }
 0x42e   :  { %6279 = vmatpush1.bf16.msra.mxu0 %v8750_v32 }
 0x42f   :  { %6280 = vmatprep.subr.bf16.mxu0 %v8755_v22 }
 0x432   :  { %6281 = vmatpush1.bf16.msra.mxu0 %v8753_v1 }
 0x433   :  { %6282 = vmatprep.subr.bf16.mxu0 %v8758_v20 }
 0x436   :  { %6283 = vmatpush1.bf16.msra.mxu0 %v8756_v10 }
 0x437   :  { %6284 = vmatprep.subr.bf16.mxu0 %v8761_v33 }
 0x43a   :  { %6285 = vmatpush1.bf16.msra.mxu0 %v8759_v35 }
 0x43b   :  { %6286 = vmatprep.subr.bf16.mxu0 %v8764_v36 }
 0x43e   :  { %6287 = vmatpush1.bf16.msra.mxu0 %v8762_v13 }
 0x43f   :  { %6288 = vmatprep.subr.bf16.mxu0 %v8767_v38 }
 0x442   :  { %6289 = vmatpush1.bf16.msra.mxu0 %v8765_v39 }
 0x443   :  { %6290 = vmatprep.subr.bf16.mxu0 %v8770_v40 }
 0x446   :  { %6291 = vmatpush1.bf16.msra.mxu0 %v8768_v29 }
 0x447   :  { %6292 = vmatprep.subr.bf16.mxu0 %v8773_v42 }
 0x44a   :  { %6293 = vmatpush1.bf16.msra.mxu0 %v8771_v19 }
 0x44b   :  { %6294 = vmatprep.subr.bf16.mxu0 %v8776_v45 }
 0x44e   :  { %6295 = vmatpush1.bf16.msra.mxu0 %v8774_v46 }
 0x44f   :  { %6296 = vmatprep.subr.bf16.mxu0 %v8779_v21 }
 0x452   :  { %6297 = vmatpush1.bf16.msra.mxu0 %v8777_v47 }
 0x453   :  { %6298 = vmatprep.subr.bf16.mxu0 %v8782_v37 }
 0x456   :  { %6299 = vmatpush1.bf16.msra.mxu0 %v8780_v52 }
 0x457   :  { %6300 = vmatprep.subr.bf16.mxu0 %v8785_v53 }
 0x45a   :  { %6301 = vmatpush1.bf16.msra.mxu0 %v8783_v55 }
 0x493   :  { %v5818_v34 = vpop.f32.mrb[4].mxu1 }
 0x494   :  { %v7408_v0 = vadd.f32 %v5818_v34, %v908_v57  ;;  %v5820_v24 = vpop.f32.mrb[5].mxu1 }
 0x495   :  { %v7409_v54 = vadd.f32 %v5820_v24, %v912_v63  ;;  %v5822_v2 = vpop.f32.mrb[6].mxu1 }
 0x496   :  { %v5827_v3 = vmax.f32 %v7408_v0, 0.0  ;;  %v5823_v5 = vpop.f32.mrb[7].mxu1 }
 0x497   :  { %v5828_v8 = vmax.f32 %v7409_v54, 0.0 }
 0x498   :  { %v5831_v9 = vpack.c.bf16 %v5827_v3, %v5827_v3 }
 0x499   :  { %v5832_v44 = vpack.c.bf16 %v5828_v8, %v5828_v8 }
 0x49b   :  { %6302 = vmatprep.mubr.bf16.mxu0 %v5832_v44 }
 0x49c   :  { %6303 = vmatmul.mubr.bf16.vlgmr.msra.gmra.mrb[4].mxu0 %v5831_v9 }
 0x56f   :  { %v6304_v17 = vpop.f32.mrb[4].mxu0 }
 0x570   :  { %v7410_v41 = vadd.f32 %v6304_v17, %v5902_v16  ;;  %v6306_v49 = vpop.f32.mrb[5].mxu0 }
 0x571   :  { %v7411_v50 = vadd.f32 %v6306_v49, %v5906_v6  ;;  %v6308_v23 = vpop.f32.mrb[6].mxu0 }
 0x572   :  { %v6311_v25 = vmax.f32 %v7410_v41, 0.0  ;;  %v6309_v58 = vpop.f32.mrb[7].mxu0 }
 0x573   :  { %v6312_v26 = vmax.f32 %v7411_v50, 0.0 }
 0x574   :  { %v6313_v61 = vpack.c.bf16 %v6311_v25, %v6311_v25 }
 0x575   :  { %v6314_v18 = vpack.c.bf16 %v6312_v26, %v6312_v26 }
 0x577   :  { %6482 = vmatprep.mubr.bf16.mxu1 %v6314_v18 }
 0x578   :  { %6483 = vmatmul.mubr.bf16.vlgmr.msra.gmra.mrb[8].mxu1 %v6313_v61 }
 0x64b   :  { %v7398_v28 = vpop.f32.mrb[8].mxu1 }
 0x64c   :  { %v7399_v48 = vpop.f32.mrb[9].mxu1 }
 0x64d   :  { %v7400_v59 = vadd.f32 %v7399_v48, %v7398_v28  ;;  %v7401_v43 = vpop.f32.mrb[10].mxu1 }
 0x64e   :  { %v7402_v62 = vpop.f32.mrb[11].mxu1 }
 0x64f   :  { %v6485_v31 = vadd.f32 %v7400_v59, %v7365_v30 }
 0x651   :  { %6490 = vst [vmem:[#allocation14] sm:$0xff] %v6485_v31 }
 0x652   :  { %8967 = shalt.err (!%p8964_p4)
}
 0x653   :  { %s8968_s15 = scalar_lea.hbm %s9327_s7, 128 }
 0x654   :  { %p8969_p5 = scmp.ne.s32.totalorder %s9327_s7, %s8968_s15  ;;  %p8972_p6 = scmp.lt.u32.totalorder %s8968_s15, %s9327_s7 }
 0x656   :  { %p8974_p7 = pnand %p8972_p6, %p8969_p5 }
 0x658   :  { %8977 = shalt.err (!%p8974_p7)
}
 0x659   :  { %6500 = dma.vmem_to_hbm [thread:$0]  %s6498_s13, 128, %s9327_s7, [#allocation4]  }
 0x65a   :  { %8986 = dma.done.wait [#allocation4], 128  }
 0x65b   :  { %8987 = vsyncadd [#allocation4], 4294967168 }
 0x65c   :  { %6504 = vsyncpa [#allocation3], 1 }
 0x65d   :  { %6505 = vsyncpa [#allocation6], 1 }
 0x65e   :  { %6506 = vsyncpa [#allocation9], 1 }
 0x65f   :  { %6507 = vsyncpa [#allocation12], 1 }
 0x660   :  { %6508 = vsyncpa [#allocation4], 1 }

</bundles_post_ra>
